<compile_context>
chip_gen: v6e
topology: v6e:2x2x1
jax: 0.10.0
libtpu: 0.0.40
codegen_flags: <defaults>
</compile_context>

<pallas_src>
import numpy as np
import jax
import jax.numpy as jnp
from jax.experimental import pallas as pl
from jax.experimental.pallas import tpu as pltpu

# ----- model / demo hyper-parameters (small, consistent with the module) -----
B = 2              # batch
S = 8              # seq_len
F = 16             # input features
H = 128            # lstm_hidden_size
H4 = 4 * H
NH = 4             # attention_heads
HD = H // NH       # head dim
FC1, FC2 = 64, 32  # fc_layers = [64, 32]
N_OUT = 1          # len(config.output_features)
LN_EPS = 1e-5
SB = S * B


def _sigmoid(x):
    # sigmoid(x) = 0.5*(tanh(x/2)+1): single EUP op, no divide on the recurrence path.
    return 0.5 * (jnp.tanh(0.5 * x) + 1.0)


def _layernorm(x, g, b):
    mu = jnp.mean(x, axis=-1, keepdims=True)
    var = jnp.mean((x - mu) ** 2, axis=-1, keepdims=True)
    return (x - mu) * jax.lax.rsqrt(var + LN_EPS) * g + b


def _cell(g, c):
    """PyTorch LSTM cell nonlinearity, gate order i,f,g,o; g: (B, 4H) f32."""
    i_g = _sigmoid(g[:, 0:H])
    f_g = _sigmoid(g[:, H:2 * H])
    g_g = jnp.tanh(g[:, 2 * H:3 * H])
    o_g = _sigmoid(g[:, 3 * H:4 * H])
    c = f_g * c + i_g * g_g
    h = o_g * jnp.tanh(c)
    return h, c


def price_lstm_kernel(x_ref, wl_ref, wa_ref, wf_ref, b_ref, out_ref, seq_ref):
    """
    x_ref  : (S*B, F)          f32   time-major flat input (row = t*B + b)
    wl_ref : (F+3H, 4H)        bf16  [Wi0 ; Wh0 ; Wi1 ; Wh1]  (rows 0:16,16:144,144:272,272:400)
    wa_ref : (H, 4H)           bf16  [Wq | Wk | Wv | Wo]       (lanes 0:128,...,384:512)
    wf_ref : (H+FC1+FC2, FC1)  bf16  [f1w ; f2w(pad) ; f3w(pad)]
    b_ref  : (5, 4H)           f32   row0=b0 row1=b1 row2=[ln1g|ln1b|ln2g|ln2b]
                                     row3=[bq|bk|bv|bo] row4=[f1b|0|f2b|0|f3b|0]
    out_ref: (B, N_OUT)        f32
    seq_ref: (S*B, H)          f32   VMEM scratch holding the layer-1 hidden states
    """
    f32, bf16 = jnp.float32, jnp.bfloat16

    # ---- layer-0 input projection hoisted over all timesteps (one matmul) ----
    gx0 = jnp.dot(x_ref[...].astype(bf16), wl_ref[0:F, :],
                  preferred_element_type=f32) + b_ref[0:1, :]          # (SB, 4H)
    b1b = jnp.broadcast_to(b_ref[1:2, :], (B, H4))                     # hoisted broadcast

    # ---- wavefront over the two LSTM layers: wave w = layer-0 step w +
    #      layer-1 step w-1; their matmuls are independent and co-issue. ----
    # TODO(synk): LSTM inter-layer dropout and all nn.Dropout are identity (eval mode).
    h0 = jnp.zeros((B, H), f32); c0 = jnp.zeros((B, H), f32)
    h1 = jnp.zeros((B, H), f32); c1 = jnp.zeros((B, H), f32)
    for w in range(S + 1):                       # fully unrolled (S static & small)
        h0_new = c0_new = None
        if w < S:                                # --- layer 0, timestep w
            gx = gx0[w * B:(w + 1) * B, :]
            if w == 0:
                g0 = gx                          # h0 == 0 at t == 0
            else:
                # weight slab re-read per use -> bounded live range, no spills
                g0 = gx + jnp.dot(h0.astype(bf16), wl_ref[F:F + H, :],
                                  preferred_element_type=f32)
            h0_new, c0_new = _cell(g0, c0)
        if w >= 1:                               # --- layer 1, timestep w-1
            t = w - 1
            if t == 0:
                # h1_{-1} == 0: only the Wi1 half contributes
                g1 = b1b + jnp.dot(h0.astype(bf16), wl_ref[F + H:F + 2 * H, :],
                                   preferred_element_type=f32)
            else:
                hcat = jnp.concatenate([h0, h1], axis=-1).astype(bf16)   # (B, 2H)
                g1 = b1b + jnp.dot(hcat, wl_ref[F + H:F + 3 * H, :],
                                   preferred_element_type=f32)
            h1, c1 = _cell(g1, c1)
            # TODO(synk): a vreg-level concat of the 8 (2,128) h1 pieces would drop
            # these masked stores entirely, but sub-tile sublane concat lowering is
            # alignment-sensitive; keep the tiny VMEM slab (8 stores + 1 reload).
            seq_ref[t * B:(t + 1) * B, :] = h1
        if w < S:
            h0, c0 = h0_new, c0_new

    # ---------------- model layer_norm over LSTM outputs (flat slab) ----------
    ln1g = b_ref[2:3, 0:H]; ln1b = b_ref[2:3, H:2 * H]
    y = _layernorm(seq_ref[...], ln1g, ln1b)                           # (SB, H) f32

    # ---------------- attention (fused over batch with additive mask) ---------
    y_bf = y.astype(bf16)
    qkv = jnp.dot(y_bf, wa_ref[:, 0:3 * H],
                  preferred_element_type=f32) + b_ref[3:4, 0:3 * H]    # (SB, 3H)
    scale = 1.0 / float(np.sqrt(HD))
    q = qkv[:, 0:H] * scale
    k = qkv[:, H:2 * H]
    v = qkv[:, 2 * H:3 * H]

    # additive batch mask built in-kernel: row t*B+b may only attend to same b
    rows = jax.lax.broadcasted_iota(jnp.int32, (SB, SB), 0)
    cols = jax.lax.broadcasted_iota(jnp.int32, (SB, SB), 1)
    mask = jnp.where((rows % B) == (cols % B), 0.0, -1e30)             # (SB, SB) f32

    attn_acc = jnp.zeros((SB, H), f32)
    for hh in range(NH):                         # static head loop (NH = 4)
        lo, hi = hh * HD, (hh + 1) * HD
        s = jax.lax.dot_general(q[:, lo:hi], k[:, lo:hi], (((1,), (1,)), ((), ())),
                                preferred_element_type=f32) + mask     # (SB, SB) f32
        m = jnp.max(s, axis=-1, keepdims=True)
        e = jnp.exp(s - m)
        den = jnp.sum(e, axis=-1, keepdims=True)
        inv = pl.reciprocal(den, approx=True)
        inv = inv * (2.0 - den * inv)            # one Newton step -> f32 accurate
        ctx = jnp.dot(e * inv, v[:, lo:hi], preferred_element_type=f32)  # (SB, HD)
        # per-head Wo row-slice accumulation (avoids a cross-lane head concat)
        attn_acc = attn_acc + jnp.dot(ctx.astype(bf16), wa_ref[lo:hi, 3 * H:4 * H],
                                      preferred_element_type=f32)
    attn_out = attn_acc + b_ref[3:4, 3 * H:4 * H]

    ln2g = b_ref[2:3, 2 * H:3 * H]; ln2b = b_ref[2:3, 3 * H:4 * H]
    y2 = _layernorm(y + attn_out, ln2g, ln2b)                          # (SB, H)

    # ---------------- FC head on the stacked last-timestep rows ---------------
    last = y2[(S - 1) * B:S * B, :]                                    # (B, H), contiguous
    z = jnp.maximum(jnp.dot(last.astype(bf16), wf_ref[0:H, :],
                            preferred_element_type=f32) + b_ref[4:5, 0:FC1], 0.0)
    z = jnp.maximum(jnp.dot(z.astype(bf16), wf_ref[H:H + FC1, 0:FC2],
                            preferred_element_type=f32) + b_ref[4:5, 128:128 + FC2], 0.0)
    out_ref[...] = (jnp.dot(z.astype(bf16), wf_ref[H + FC1:H + FC1 + FC2, 0:N_OUT],
                            preferred_element_type=f32) + b_ref[4:5, 256:256 + N_OUT])


# ------------------------------- wrapper -------------------------------------
@jax.jit
def price_lstm_forward(x, pk):
    """x: (B, S, F) batch_first (PyTorch layout). Returns (B, N_OUT)."""
    # time-major flat layout: row = t*B + b
    xt = jnp.transpose(x, (1, 0, 2)).reshape(S * B, F).astype(jnp.float32)
    return pl.pallas_call(
        price_lstm_kernel,
        out_shape=jax.ShapeDtypeStruct((B, N_OUT), jnp.float32),
        scratch_shapes=[pltpu.VMEM((S * B, H), jnp.float32)],   # layer-1 hidden slab
    )(xt, pk['w_lstm'], pk['w_attn'], pk['w_fc'], pk['bias'])


def pack_params(p):
    """Collapse the 27 small parameters into 4 DMA-friendly slabs (weights in bf16)."""
    bf16 = jnp.bfloat16
    w_lstm = jnp.concatenate([p['wi0'], p['wh0'], p['wi1'], p['wh1']],
                             axis=0).astype(bf16)                       # (F+3H, 4H)
    w_attn = jnp.concatenate([p['wq'], p['wk'], p['wv'], p['wo']],
                             axis=1).astype(bf16)                       # (H, 4H)
    w_fc = jnp.concatenate(
        [p['f1w'],
         jnp.pad(p['f2w'], ((0, 0), (0, FC1 - FC2))),
         jnp.pad(p['f3w'], ((0, 0), (0, FC1 - N_OUT)))],
        axis=0).astype(bf16)                                            # (H+FC1+FC2, FC1)

    def row(*pieces):
        cat = jnp.concatenate(pieces, axis=1)
        return jnp.pad(cat, ((0, 0), (0, H4 - cat.shape[1])))

    zeros = lambda n: jnp.zeros((1, n), jnp.float32)
    bias = jnp.concatenate([
        p['b0'],
        p['b1'],
        row(p['ln1g'], p['ln1b'], p['ln2g'], p['ln2b']),
        row(p['bq'], p['bk'], p['bv'], p['bo']),
        row(p['f1b'], zeros(128 - FC1), p['f2b'], zeros(128 - FC2), p['f3b']),
    ], axis=0)                                                          # (5, 4H) f32
    return {'w_lstm': w_lstm, 'w_attn': w_attn, 'w_fc': w_fc, 'bias': bias}


# --------------------------- parameter init ----------------------------------
def _uniform(key, shape, fan_in):
    bound = 1.0 / np.sqrt(float(fan_in))
    w = jax.random.uniform(key, shape, jnp.float32, minval=-bound, maxval=bound)
    # round to bf16-representable values so the bf16-MXU kernel and the f32
    # reference share exactly the same weights
    return w.astype(jnp.bfloat16).astype(jnp.float32)


def init_params(key):
    keys = iter(jax.random.split(key, 32))
    p = {}
    # LSTM (weights stored pre-transposed as (in, 4H); biases combined b_ih + b_hh)
    p['wi0'] = _uniform(next(keys), (F, 4 * H), H)
    p['wh0'] = _uniform(next(keys), (H, 4 * H), H)
    p['b0'] = _uniform(next(keys), (1, 4 * H), H) + _uniform(next(keys), (1, 4 * H), H)
    p['wi1'] = _uniform(next(keys), (H, 4 * H), H)
    p['wh1'] = _uniform(next(keys), (H, 4 * H), H)
    p['b1'] = _uniform(next(keys), (1, 4 * H), H) + _uniform(next(keys), (1, 4 * H), H)
    # model LayerNorm (PyTorch default: gamma=1, beta=0)
    p['ln1g'] = jnp.ones((1, H), jnp.float32)
    p['ln1b'] = jnp.zeros((1, H), jnp.float32)
    # attention projections (stored as (in, out))
    for name in ('q', 'k', 'v', 'o'):
        p['w' + name] = _uniform(next(keys), (H, H), H)
        p['b' + name] = _uniform(next(keys), (1, H), H)
    p['ln2g'] = jnp.ones((1, H), jnp.float32)
    p['ln2b'] = jnp.zeros((1, H), jnp.float32)
    # fc head
    p['f1w'] = _uniform(next(keys), (H, FC1), H)
    p['f1b'] = _uniform(next(keys), (1, FC1), H)
    p['f2w'] = _uniform(next(keys), (FC1, FC2), FC1)
    p['f2b'] = _uniform(next(keys), (1, FC2), FC1)
    p['f3w'] = _uniform(next(keys), (FC2, N_OUT), FC2)
    p['f3b'] = _uniform(next(keys), (1, N_OUT), FC2)
    return p


# ---------------------- pure-JAX reference (for checking) --------------------
def reference_forward(x, p):
    b_, s_, _ = x.shape

    def lstm_layer(inp, wi, wh, bias):
        def step(carry, xt):
            h, c = carry
            g = xt @ wi + h @ wh + bias[0]
            i = jax.nn.sigmoid(g[:, :H])
            f = jax.nn.sigmoid(g[:, H:2 * H])
            gg = jnp.tanh(g[:, 2 * H:3 * H])
            o = jax.nn.sigmoid(g[:, 3 * H:])
            c = f * c + i * gg
            h = o * jnp.tanh(c)
            return (h, c), h
        init = (jnp.zeros((b_, H), jnp.float32), jnp.zeros((b_, H), jnp.float32))
        _, hs = jax.lax.scan(step, init, jnp.swapaxes(inp, 0, 1))
        return jnp.swapaxes(hs, 0, 1)

    def layernorm(xx, g, b):
        mu = jnp.mean(xx, axis=-1, keepdims=True)
        var = jnp.mean((xx - mu) ** 2, axis=-1, keepdims=True)
        return (xx - mu) / jnp.sqrt(var + LN_EPS) * g[0] + b[0]

    h1 = lstm_layer(x.astype(jnp.float32), p['wi0'], p['wh0'], p['b0'])
    h2 = lstm_layer(h1, p['wi1'], p['wh1'], p['b1'])
    y = layernorm(h2, p['ln1g'], p['ln1b'])

    q = y @ p['wq'] + p['bq'][0]
    k = y @ p['wk'] + p['bk'][0]
    v = y @ p['wv'] + p['bv'][0]

    def split_heads(t):
        return jnp.transpose(t.reshape(b_, s_, NH, HD), (0, 2, 1, 3))

    qh, kh, vh = split_heads(q), split_heads(k), split_heads(v)
    scores = jnp.einsum('bhqd,bhkd->bhqk', qh, kh) / np.sqrt(float(HD))
    attn = jax.nn.softmax(scores, axis=-1)
    ctx = jnp.einsum('bhqk,bhkd->bhqd', attn, vh)
    ctx = jnp.transpose(ctx, (0, 2, 1, 3)).reshape(b_, s_, H)
    attn_out = ctx @ p['wo'] + p['bo'][0]
    y2 = layernorm(y + attn_out, p['ln2g'], p['ln2b'])

    last = y2[:, -1, :]
    z = jnp.maximum(last @ p['f1w'] + p['f1b'][0], 0.0)
    z = jnp.maximum(z @ p['f2w'] + p['f2b'][0], 0.0)
    return z @ p['f3w'] + p['f3b'][0]


if __name__ == "__main__":
    root = jax.random.PRNGKey(0)
    pkey, xkey = jax.random.split(root)
    params = init_params(pkey)
    packed = pack_params(params)
    x = jax.random.normal(xkey, (B, S, F), jnp.float32)

    out = jax.block_until_ready(price_lstm_forward(x, packed))

    ref = reference_forward(x, params)
    assert out.shape == (B, N_OUT)
    # bf16 MXU compute with f32 accumulation (weights shared bf16-representable);
    # tolerance reflects activation-rounding drift through the 8-step recurrence.
    np.testing.assert_allclose(np.asarray(out), np.asarray(ref), rtol=2e-2, atol=2e-2)
    print("KERNEL_OK")
</pallas_src>

<mosaic_0001>
module attributes {stable_mosaic.version = 11 : i64} {
  func.func @price_lstm_kernel(%arg0: memref<16x16xf32, #tpu.memory_space<vmem>>, %arg1: memref<400x512xbf16, #tpu.memory_space<vmem>>, %arg2: memref<128x512xbf16, #tpu.memory_space<vmem>>, %arg3: memref<224x64xbf16, #tpu.memory_space<vmem>>, %arg4: memref<5x512xf32, #tpu.memory_space<vmem>>, %arg5: memref<2x1xf32, #tpu.memory_space<vmem>>, %arg6: memref<16x128xf32, #tpu.memory_space<vmem>>) attributes {dimension_semantics = [], scalar_prefetch = 0 : i64, scratch_operands = 1 : i64, tpu.core_type = #tpu.core_type<tc>} {
    %c0 = arith.constant 0 : index
    %c0_0 = arith.constant 0 : index
    %0 = vector.load %arg0[%c0, %c0_0] : memref<16x16xf32, #tpu.memory_space<vmem>>, vector<16x16xf32>
    %1 = arith.truncf %0 : vector<16x16xf32> to vector<16x16xbf16>
    %c0_1 = arith.constant 0 : index
    %c0_2 = arith.constant 0 : index
    %2 = vector.load %arg1[%c0_1, %c0_2] : memref<400x512xbf16, #tpu.memory_space<vmem>>, vector<16x512xbf16>
    %cst = arith.constant dense<0.000000e+00> : vector<16x512xf32>
    %3 = tpu.matmul %1, %2, %cst {dimension_numbers = #tpu.dot_dimension_numbers<[1], [0], [0], [1], [0, 0, 1, 1], [], []>} : vector<16x16xbf16>, vector<16x512xbf16>, vector<16x512xf32> -> vector<16x512xf32>
    %c0_3 = arith.constant 0 : index
    %c0_4 = arith.constant 0 : index
    %4 = vector.load %arg4[%c0_3, %c0_4] : memref<5x512xf32, #tpu.memory_space<vmem>>, vector<1x512xf32>
    %5 = vector.broadcast %4 : vector<1x512xf32> to vector<16x512xf32>
    %6 = arith.addf %3, %5 : vector<16x512xf32>
    %c1 = arith.constant 1 : index
    %c0_5 = arith.constant 0 : index
    %7 = vector.load %arg4[%c1, %c0_5] : memref<5x512xf32, #tpu.memory_space<vmem>>, vector<1x512xf32>
    %8 = vector.shape_cast %7 : vector<1x512xf32> to vector<1x512xf32>
    %9 = vector.broadcast %8 : vector<1x512xf32> to vector<2x512xf32>
    %cst_6 = arith.constant 0.000000e+00 : f32
    %10 = vector.broadcast %cst_6 : f32 to vector<2x128xf32>
    %cst_7 = arith.constant 0.000000e+00 : f32
    %11 = vector.broadcast %cst_7 : f32 to vector<2x128xf32>
    %12 = vector.extract_strided_slice %6 {offsets = [0, 0], sizes = [2, 512], strides = [1, 1]} : vector<16x512xf32> to vector<2x512xf32>
    %13 = vector.extract_strided_slice %12 {offsets = [0, 0], sizes = [2, 128], strides = [1, 1]} : vector<2x512xf32> to vector<2x128xf32>
    %cst_8 = arith.constant 5.000000e-01 : f32
    %14 = vector.broadcast %cst_8 : f32 to vector<2x128xf32>
    %15 = arith.mulf %14, %13 : vector<2x128xf32>
    %16 = math.tanh %15 : vector<2x128xf32>
    %cst_9 = arith.constant 1.000000e+00 : f32
    %17 = vector.broadcast %cst_9 : f32 to vector<2x128xf32>
    %18 = arith.addf %16, %17 : vector<2x128xf32>
    %cst_10 = arith.constant 5.000000e-01 : f32
    %19 = vector.broadcast %cst_10 : f32 to vector<2x128xf32>
    %20 = arith.mulf %19, %18 : vector<2x128xf32>
    %21 = vector.extract_strided_slice %12 {offsets = [0, 128], sizes = [2, 128], strides = [1, 1]} : vector<2x512xf32> to vector<2x128xf32>
    %cst_11 = arith.constant 5.000000e-01 : f32
    %22 = vector.broadcast %cst_11 : f32 to vector<2x128xf32>
    %23 = arith.mulf %22, %21 : vector<2x128xf32>
    %24 = math.tanh %23 : vector<2x128xf32>
    %cst_12 = arith.constant 1.000000e+00 : f32
    %25 = vector.broadcast %cst_12 : f32 to vector<2x128xf32>
    %26 = arith.addf %24, %25 : vector<2x128xf32>
    %cst_13 = arith.constant 5.000000e-01 : f32
    %27 = vector.broadcast %cst_13 : f32 to vector<2x128xf32>
    %28 = arith.mulf %27, %26 : vector<2x128xf32>
    %29 = vector.extract_strided_slice %12 {offsets = [0, 256], sizes = [2, 128], strides = [1, 1]} : vector<2x512xf32> to vector<2x128xf32>
    %30 = math.tanh %29 : vector<2x128xf32>
    %31 = vector.extract_strided_slice %12 {offsets = [0, 384], sizes = [2, 128], strides = [1, 1]} : vector<2x512xf32> to vector<2x128xf32>
    %cst_14 = arith.constant 5.000000e-01 : f32
    %32 = vector.broadcast %cst_14 : f32 to vector<2x128xf32>
    %33 = arith.mulf %32, %31 : vector<2x128xf32>
    %34 = math.tanh %33 : vector<2x128xf32>
    %cst_15 = arith.constant 1.000000e+00 : f32
    %35 = vector.broadcast %cst_15 : f32 to vector<2x128xf32>
    %36 = arith.addf %34, %35 : vector<2x128xf32>
    %cst_16 = arith.constant 5.000000e-01 : f32
    %37 = vector.broadcast %cst_16 : f32 to vector<2x128xf32>
    %38 = arith.mulf %37, %36 : vector<2x128xf32>
    %39 = arith.mulf %28, %10 : vector<2x128xf32>
    %40 = arith.mulf %20, %30 : vector<2x128xf32>
    %41 = arith.addf %39, %40 : vector<2x128xf32>
    %42 = math.tanh %41 : vector<2x128xf32>
    %43 = arith.mulf %38, %42 : vector<2x128xf32>
    %44 = vector.extract_strided_slice %6 {offsets = [2, 0], sizes = [2, 512], strides = [1, 1]} : vector<16x512xf32> to vector<2x512xf32>
    %45 = arith.truncf %43 : vector<2x128xf32> to vector<2x128xbf16>
    %c16 = arith.constant 16 : index
    %c0_17 = arith.constant 0 : index
    %46 = vector.load %arg1[%c16, %c0_17] : memref<400x512xbf16, #tpu.memory_space<vmem>>, vector<128x512xbf16>
    %cst_18 = arith.constant dense<0.000000e+00> : vector<2x512xf32>
    %47 = tpu.matmul %45, %46, %cst_18 {dimension_numbers = #tpu.dot_dimension_numbers<[1], [0], [0], [1], [0, 0, 1, 1], [], []>} : vector<2x128xbf16>, vector<128x512xbf16>, vector<2x512xf32> -> vector<2x512xf32>
    %48 = arith.addf %44, %47 : vector<2x512xf32>
    %49 = vector.extract_strided_slice %48 {offsets = [0, 0], sizes = [2, 128], strides = [1, 1]} : vector<2x512xf32> to vector<2x128xf32>
    %cst_19 = arith.constant 5.000000e-01 : f32
    %50 = vector.broadcast %cst_19 : f32 to vector<2x128xf32>
    %51 = arith.mulf %50, %49 : vector<2x128xf32>
    %52 = math.tanh %51 : vector<2x128xf32>
    %cst_20 = arith.constant 1.000000e+00 : f32
    %53 = vector.broadcast %cst_20 : f32 to vector<2x128xf32>
    %54 = arith.addf %52, %53 : vector<2x128xf32>
    %cst_21 = arith.constant 5.000000e-01 : f32
    %55 = vector.broadcast %cst_21 : f32 to vector<2x128xf32>
    %56 = arith.mulf %55, %54 : vector<2x128xf32>
    %57 = vector.extract_strided_slice %48 {offsets = [0, 128], sizes = [2, 128], strides = [1, 1]} : vector<2x512xf32> to vector<2x128xf32>
    %cst_22 = arith.constant 5.000000e-01 : f32
    %58 = vector.broadcast %cst_22 : f32 to vector<2x128xf32>
    %59 = arith.mulf %58, %57 : vector<2x128xf32>
    %60 = math.tanh %59 : vector<2x128xf32>
    %cst_23 = arith.constant 1.000000e+00 : f32
    %61 = vector.broadcast %cst_23 : f32 to vector<2x128xf32>
    %62 = arith.addf %60, %61 : vector<2x128xf32>
    %cst_24 = arith.constant 5.000000e-01 : f32
    %63 = vector.broadcast %cst_24 : f32 to vector<2x128xf32>
    %64 = arith.mulf %63, %62 : vector<2x128xf32>
    %65 = vector.extract_strided_slice %48 {offsets = [0, 256], sizes = [2, 128], strides = [1, 1]} : vector<2x512xf32> to vector<2x128xf32>
    %66 = math.tanh %65 : vector<2x128xf32>
    %67 = vector.extract_strided_slice %48 {offsets = [0, 384], sizes = [2, 128], strides = [1, 1]} : vector<2x512xf32> to vector<2x128xf32>
    %cst_25 = arith.constant 5.000000e-01 : f32
    %68 = vector.broadcast %cst_25 : f32 to vector<2x128xf32>
    %69 = arith.mulf %68, %67 : vector<2x128xf32>
    %70 = math.tanh %69 : vector<2x128xf32>
    %cst_26 = arith.constant 1.000000e+00 : f32
    %71 = vector.broadcast %cst_26 : f32 to vector<2x128xf32>
    %72 = arith.addf %70, %71 : vector<2x128xf32>
    %cst_27 = arith.constant 5.000000e-01 : f32
    %73 = vector.broadcast %cst_27 : f32 to vector<2x128xf32>
    %74 = arith.mulf %73, %72 : vector<2x128xf32>
    %75 = arith.mulf %64, %41 : vector<2x128xf32>
    %76 = arith.mulf %56, %66 : vector<2x128xf32>
    %77 = arith.addf %75, %76 : vector<2x128xf32>
    %78 = math.tanh %77 : vector<2x128xf32>
    %79 = arith.mulf %74, %78 : vector<2x128xf32>
    %80 = arith.truncf %43 : vector<2x128xf32> to vector<2x128xbf16>
    %c144 = arith.constant 144 : index
    %c0_28 = arith.constant 0 : index
    %81 = vector.load %arg1[%c144, %c0_28] : memref<400x512xbf16, #tpu.memory_space<vmem>>, vector<128x512xbf16>
    %cst_29 = arith.constant dense<0.000000e+00> : vector<2x512xf32>
    %82 = tpu.matmul %80, %81, %cst_29 {dimension_numbers = #tpu.dot_dimension_numbers<[1], [0], [0], [1], [0, 0, 1, 1], [], []>} : vector<2x128xbf16>, vector<128x512xbf16>, vector<2x512xf32> -> vector<2x512xf32>
    %83 = arith.addf %9, %82 : vector<2x512xf32>
    %84 = vector.extract_strided_slice %83 {offsets = [0, 0], sizes = [2, 128], strides = [1, 1]} : vector<2x512xf32> to vector<2x128xf32>
    %cst_30 = arith.constant 5.000000e-01 : f32
    %85 = vector.broadcast %cst_30 : f32 to vector<2x128xf32>
    %86 = arith.mulf %85, %84 : vector<2x128xf32>
    %87 = math.tanh %86 : vector<2x128xf32>
    %cst_31 = arith.constant 1.000000e+00 : f32
    %88 = vector.broadcast %cst_31 : f32 to vector<2x128xf32>
    %89 = arith.addf %87, %88 : vector<2x128xf32>
    %cst_32 = arith.constant 5.000000e-01 : f32
    %90 = vector.broadcast %cst_32 : f32 to vector<2x128xf32>
    %91 = arith.mulf %90, %89 : vector<2x128xf32>
    %92 = vector.extract_strided_slice %83 {offsets = [0, 128], sizes = [2, 128], strides = [1, 1]} : vector<2x512xf32> to vector<2x128xf32>
    %cst_33 = arith.constant 5.000000e-01 : f32
    %93 = vector.broadcast %cst_33 : f32 to vector<2x128xf32>
    %94 = arith.mulf %93, %92 : vector<2x128xf32>
    %95 = math.tanh %94 : vector<2x128xf32>
    %cst_34 = arith.constant 1.000000e+00 : f32
    %96 = vector.broadcast %cst_34 : f32 to vector<2x128xf32>
    %97 = arith.addf %95, %96 : vector<2x128xf32>
    %cst_35 = arith.constant 5.000000e-01 : f32
    %98 = vector.broadcast %cst_35 : f32 to vector<2x128xf32>
    %99 = arith.mulf %98, %97 : vector<2x128xf32>
    %100 = vector.extract_strided_slice %83 {offsets = [0, 256], sizes = [2, 128], strides = [1, 1]} : vector<2x512xf32> to vector<2x128xf32>
    %101 = math.tanh %100 : vector<2x128xf32>
    %102 = vector.extract_strided_slice %83 {offsets = [0, 384], sizes = [2, 128], strides = [1, 1]} : vector<2x512xf32> to vector<2x128xf32>
    %cst_36 = arith.constant 5.000000e-01 : f32
    %103 = vector.broadcast %cst_36 : f32 to vector<2x128xf32>
    %104 = arith.mulf %103, %102 : vector<2x128xf32>
    %105 = math.tanh %104 : vector<2x128xf32>
    %cst_37 = arith.constant 1.000000e+00 : f32
    %106 = vector.broadcast %cst_37 : f32 to vector<2x128xf32>
    %107 = arith.addf %105, %106 : vector<2x128xf32>
    %cst_38 = arith.constant 5.000000e-01 : f32
    %108 = vector.broadcast %cst_38 : f32 to vector<2x128xf32>
    %109 = arith.mulf %108, %107 : vector<2x128xf32>
    %110 = arith.mulf %99, %11 : vector<2x128xf32>
    %111 = arith.mulf %91, %101 : vector<2x128xf32>
    %112 = arith.addf %110, %111 : vector<2x128xf32>
    %113 = math.tanh %112 : vector<2x128xf32>
    %114 = arith.mulf %109, %113 : vector<2x128xf32>
    %c0_39 = arith.constant 0 : index
    %c0_40 = arith.constant 0 : index
    %115 = vector.load %arg6[%c0_39, %c0_40] : memref<16x128xf32, #tpu.memory_space<vmem>>, vector<2x128xf32>
    tpu.vector_store %arg6[%c0_39, %c0_40], %114 {strides = array<i32>} : memref<16x128xf32, #tpu.memory_space<vmem>>, vector<2x128xf32>,
    %116 = vector.extract_strided_slice %6 {offsets = [4, 0], sizes = [2, 512], strides = [1, 1]} : vector<16x512xf32> to vector<2x512xf32>
    %117 = arith.truncf %79 : vector<2x128xf32> to vector<2x128xbf16>
    %c16_41 = arith.constant 16 : index
    %c0_42 = arith.constant 0 : index
    %118 = vector.load %arg1[%c16_41, %c0_42] : memref<400x512xbf16, #tpu.memory_space<vmem>>, vector<128x512xbf16>
    %cst_43 = arith.constant dense<0.000000e+00> : vector<2x512xf32>
    %119 = tpu.matmul %117, %118, %cst_43 {dimension_numbers = #tpu.dot_dimension_numbers<[1], [0], [0], [1], [0, 0, 1, 1], [], []>} : vector<2x128xbf16>, vector<128x512xbf16>, vector<2x512xf32> -> vector<2x512xf32>
    %120 = arith.addf %116, %119 : vector<2x512xf32>
    %121 = vector.extract_strided_slice %120 {offsets = [0, 0], sizes = [2, 128], strides = [1, 1]} : vector<2x512xf32> to vector<2x128xf32>
    %cst_44 = arith.constant 5.000000e-01 : f32
    %122 = vector.broadcast %cst_44 : f32 to vector<2x128xf32>
    %123 = arith.mulf %122, %121 : vector<2x128xf32>
    %124 = math.tanh %123 : vector<2x128xf32>
    %cst_45 = arith.constant 1.000000e+00 : f32
    %125 = vector.broadcast %cst_45 : f32 to vector<2x128xf32>
    %126 = arith.addf %124, %125 : vector<2x128xf32>
    %cst_46 = arith.constant 5.000000e-01 : f32
    %127 = vector.broadcast %cst_46 : f32 to vector<2x128xf32>
    %128 = arith.mulf %127, %126 : vector<2x128xf32>
    %129 = vector.extract_strided_slice %120 {offsets = [0, 128], sizes = [2, 128], strides = [1, 1]} : vector<2x512xf32> to vector<2x128xf32>
    %cst_47 = arith.constant 5.000000e-01 : f32
    %130 = vector.broadcast %cst_47 : f32 to vector<2x128xf32>
    %131 = arith.mulf %130, %129 : vector<2x128xf32>
    %132 = math.tanh %131 : vector<2x128xf32>
    %cst_48 = arith.constant 1.000000e+00 : f32
    %133 = vector.broadcast %cst_48 : f32 to vector<2x128xf32>
    %134 = arith.addf %132, %133 : vector<2x128xf32>
    %cst_49 = arith.constant 5.000000e-01 : f32
    %135 = vector.broadcast %cst_49 : f32 to vector<2x128xf32>
    %136 = arith.mulf %135, %134 : vector<2x128xf32>
    %137 = vector.extract_strided_slice %120 {offsets = [0, 256], sizes = [2, 128], strides = [1, 1]} : vector<2x512xf32> to vector<2x128xf32>
    %138 = math.tanh %137 : vector<2x128xf32>
    %139 = vector.extract_strided_slice %120 {offsets = [0, 384], sizes = [2, 128], strides = [1, 1]} : vector<2x512xf32> to vector<2x128xf32>
    %cst_50 = arith.constant 5.000000e-01 : f32
    %140 = vector.broadcast %cst_50 : f32 to vector<2x128xf32>
    %141 = arith.mulf %140, %139 : vector<2x128xf32>
    %142 = math.tanh %141 : vector<2x128xf32>
    %cst_51 = arith.constant 1.000000e+00 : f32
    %143 = vector.broadcast %cst_51 : f32 to vector<2x128xf32>
    %144 = arith.addf %142, %143 : vector<2x128xf32>
    %cst_52 = arith.constant 5.000000e-01 : f32
    %145 = vector.broadcast %cst_52 : f32 to vector<2x128xf32>
    %146 = arith.mulf %145, %144 : vector<2x128xf32>
    %147 = arith.mulf %136, %77 : vector<2x128xf32>
    %148 = arith.mulf %128, %138 : vector<2x128xf32>
    %149 = arith.addf %147, %148 : vector<2x128xf32>
    %150 = math.tanh %149 : vector<2x128xf32>
    %151 = arith.mulf %146, %150 : vector<2x128xf32>
    %152 = tpu.concatenate %79, %114 in 1 : vector<2x128xf32>, vector<2x128xf32> -> vector<2x256xf32>
    %153 = arith.truncf %152 : vector<2x256xf32> to vector<2x256xbf16>
    %c144_53 = arith.constant 144 : index
    %c0_54 = arith.constant 0 : index
    %154 = vector.load %arg1[%c144_53, %c0_54] : memref<400x512xbf16, #tpu.memory_space<vmem>>, vector<256x512xbf16>
    %cst_55 = arith.constant dense<0.000000e+00> : vector<2x512xf32>
    %155 = tpu.matmul %153, %154, %cst_55 {dimension_numbers = #tpu.dot_dimension_numbers<[1], [0], [0], [1], [0, 0, 1, 1], [], []>} : vector<2x256xbf16>, vector<256x512xbf16>, vector<2x512xf32> -> vector<2x512xf32>
    %156 = arith.addf %9, %155 : vector<2x512xf32>
    %157 = vector.extract_strided_slice %156 {offsets = [0, 0], sizes = [2, 128], strides = [1, 1]} : vector<2x512xf32> to vector<2x128xf32>
    %cst_56 = arith.constant 5.000000e-01 : f32
    %158 = vector.broadcast %cst_56 : f32 to vector<2x128xf32>
    %159 = arith.mulf %158, %157 : vector<2x128xf32>
    %160 = math.tanh %159 : vector<2x128xf32>
    %cst_57 = arith.constant 1.000000e+00 : f32
    %161 = vector.broadcast %cst_57 : f32 to vector<2x128xf32>
    %162 = arith.addf %160, %161 : vector<2x128xf32>
    %cst_58 = arith.constant 5.000000e-01 : f32
    %163 = vector.broadcast %cst_58 : f32 to vector<2x128xf32>
    %164 = arith.mulf %163, %162 : vector<2x128xf32>
    %165 = vector.extract_strided_slice %156 {offsets = [0, 128], sizes = [2, 128], strides = [1, 1]} : vector<2x512xf32> to vector<2x128xf32>
    %cst_59 = arith.constant 5.000000e-01 : f32
    %166 = vector.broadcast %cst_59 : f32 to vector<2x128xf32>
    %167 = arith.mulf %166, %165 : vector<2x128xf32>
    %168 = math.tanh %167 : vector<2x128xf32>
    %cst_60 = arith.constant 1.000000e+00 : f32
    %169 = vector.broadcast %cst_60 : f32 to vector<2x128xf32>
    %170 = arith.addf %168, %169 : vector<2x128xf32>
    %cst_61 = arith.constant 5.000000e-01 : f32
    %171 = vector.broadcast %cst_61 : f32 to vector<2x128xf32>
    %172 = arith.mulf %171, %170 : vector<2x128xf32>
    %173 = vector.extract_strided_slice %156 {offsets = [0, 256], sizes = [2, 128], strides = [1, 1]} : vector<2x512xf32> to vector<2x128xf32>
    %174 = math.tanh %173 : vector<2x128xf32>
    %175 = vector.extract_strided_slice %156 {offsets = [0, 384], sizes = [2, 128], strides = [1, 1]} : vector<2x512xf32> to vector<2x128xf32>
    %cst_62 = arith.constant 5.000000e-01 : f32
    %176 = vector.broadcast %cst_62 : f32 to vector<2x128xf32>
    %177 = arith.mulf %176, %175 : vector<2x128xf32>
    %178 = math.tanh %177 : vector<2x128xf32>
    %cst_63 = arith.constant 1.000000e+00 : f32
    %179 = vector.broadcast %cst_63 : f32 to vector<2x128xf32>
    %180 = arith.addf %178, %179 : vector<2x128xf32>
    %cst_64 = arith.constant 5.000000e-01 : f32
    %181 = vector.broadcast %cst_64 : f32 to vector<2x128xf32>
    %182 = arith.mulf %181, %180 : vector<2x128xf32>
    %183 = arith.mulf %172, %112 : vector<2x128xf32>
    %184 = arith.mulf %164, %174 : vector<2x128xf32>
    %185 = arith.addf %183, %184 : vector<2x128xf32>
    %186 = math.tanh %185 : vector<2x128xf32>
    %187 = arith.mulf %182, %186 : vector<2x128xf32>
    %c2 = arith.constant 2 : index
    %c0_65 = arith.constant 0 : index
    %188 = vector.load %arg6[%c2, %c0_65] : memref<16x128xf32, #tpu.memory_space<vmem>>, vector<2x128xf32>
    tpu.vector_store %arg6[%c2, %c0_65], %187 {strides = array<i32>} : memref<16x128xf32, #tpu.memory_space<vmem>>, vector<2x128xf32>,
    %189 = vector.extract_strided_slice %6 {offsets = [6, 0], sizes = [2, 512], strides = [1, 1]} : vector<16x512xf32> to vector<2x512xf32>
    %190 = arith.truncf %151 : vector<2x128xf32> to vector<2x128xbf16>
    %c16_66 = arith.constant 16 : index
    %c0_67 = arith.constant 0 : index
    %191 = vector.load %arg1[%c16_66, %c0_67] : memref<400x512xbf16, #tpu.memory_space<vmem>>, vector<128x512xbf16>
    %cst_68 = arith.constant dense<0.000000e+00> : vector<2x512xf32>
    %192 = tpu.matmul %190, %191, %cst_68 {dimension_numbers = #tpu.dot_dimension_numbers<[1], [0], [0], [1], [0, 0, 1, 1], [], []>} : vector<2x128xbf16>, vector<128x512xbf16>, vector<2x512xf32> -> vector<2x512xf32>
    %193 = arith.addf %189, %192 : vector<2x512xf32>
    %194 = vector.extract_strided_slice %193 {offsets = [0, 0], sizes = [2, 128], strides = [1, 1]} : vector<2x512xf32> to vector<2x128xf32>
    %cst_69 = arith.constant 5.000000e-01 : f32
    %195 = vector.broadcast %cst_69 : f32 to vector<2x128xf32>
    %196 = arith.mulf %195, %194 : vector<2x128xf32>
    %197 = math.tanh %196 : vector<2x128xf32>
    %cst_70 = arith.constant 1.000000e+00 : f32
    %198 = vector.broadcast %cst_70 : f32 to vector<2x128xf32>
    %199 = arith.addf %197, %198 : vector<2x128xf32>
    %cst_71 = arith.constant 5.000000e-01 : f32
    %200 = vector.broadcast %cst_71 : f32 to vector<2x128xf32>
    %201 = arith.mulf %200, %199 : vector<2x128xf32>
    %202 = vector.extract_strided_slice %193 {offsets = [0, 128], sizes = [2, 128], strides = [1, 1]} : vector<2x512xf32> to vector<2x128xf32>
    %cst_72 = arith.constant 5.000000e-01 : f32
    %203 = vector.broadcast %cst_72 : f32 to vector<2x128xf32>
    %204 = arith.mulf %203, %202 : vector<2x128xf32>
    %205 = math.tanh %204 : vector<2x128xf32>
    %cst_73 = arith.constant 1.000000e+00 : f32
    %206 = vector.broadcast %cst_73 : f32 to vector<2x128xf32>
    %207 = arith.addf %205, %206 : vector<2x128xf32>
    %cst_74 = arith.constant 5.000000e-01 : f32
    %208 = vector.broadcast %cst_74 : f32 to vector<2x128xf32>
    %209 = arith.mulf %208, %207 : vector<2x128xf32>
    %210 = vector.extract_strided_slice %193 {offsets = [0, 256], sizes = [2, 128], strides = [1, 1]} : vector<2x512xf32> to vector<2x128xf32>
    %211 = math.tanh %210 : vector<2x128xf32>
    %212 = vector.extract_strided_slice %193 {offsets = [0, 384], sizes = [2, 128], strides = [1, 1]} : vector<2x512xf32> to vector<2x128xf32>
    %cst_75 = arith.constant 5.000000e-01 : f32
    %213 = vector.broadcast %cst_75 : f32 to vector<2x128xf32>
    %214 = arith.mulf %213, %212 : vector<2x128xf32>
    %215 = math.tanh %214 : vector<2x128xf32>
    %cst_76 = arith.constant 1.000000e+00 : f32
    %216 = vector.broadcast %cst_76 : f32 to vector<2x128xf32>
    %217 = arith.addf %215, %216 : vector<2x128xf32>
    %cst_77 = arith.constant 5.000000e-01 : f32
    %218 = vector.broadcast %cst_77 : f32 to vector<2x128xf32>
    %219 = arith.mulf %218, %217 : vector<2x128xf32>
    %220 = arith.mulf %209, %149 : vector<2x128xf32>
    %221 = arith.mulf %201, %211 : vector<2x128xf32>
    %222 = arith.addf %220, %221 : vector<2x128xf32>
    %223 = math.tanh %222 : vector<2x128xf32>
    %224 = arith.mulf %219, %223 : vector<2x128xf32>
    %225 = tpu.concatenate %151, %187 in 1 : vector<2x128xf32>, vector<2x128xf32> -> vector<2x256xf32>
    %226 = arith.truncf %225 : vector<2x256xf32> to vector<2x256xbf16>
    %c144_78 = arith.constant 144 : index
    %c0_79 = arith.constant 0 : index
    %227 = vector.load %arg1[%c144_78, %c0_79] : memref<400x512xbf16, #tpu.memory_space<vmem>>, vector<256x512xbf16>
    %cst_80 = arith.constant dense<0.000000e+00> : vector<2x512xf32>
    %228 = tpu.matmul %226, %227, %cst_80 {dimension_numbers = #tpu.dot_dimension_numbers<[1], [0], [0], [1], [0, 0, 1, 1], [], []>} : vector<2x256xbf16>, vector<256x512xbf16>, vector<2x512xf32> -> vector<2x512xf32>
    %229 = arith.addf %9, %228 : vector<2x512xf32>
    %230 = vector.extract_strided_slice %229 {offsets = [0, 0], sizes = [2, 128], strides = [1, 1]} : vector<2x512xf32> to vector<2x128xf32>
    %cst_81 = arith.constant 5.000000e-01 : f32
    %231 = vector.broadcast %cst_81 : f32 to vector<2x128xf32>
    %232 = arith.mulf %231, %230 : vector<2x128xf32>
    %233 = math.tanh %232 : vector<2x128xf32>
    %cst_82 = arith.constant 1.000000e+00 : f32
    %234 = vector.broadcast %cst_82 : f32 to vector<2x128xf32>
    %235 = arith.addf %233, %234 : vector<2x128xf32>
    %cst_83 = arith.constant 5.000000e-01 : f32
    %236 = vector.broadcast %cst_83 : f32 to vector<2x128xf32>
    %237 = arith.mulf %236, %235 : vector<2x128xf32>
    %238 = vector.extract_strided_slice %229 {offsets = [0, 128], sizes = [2, 128], strides = [1, 1]} : vector<2x512xf32> to vector<2x128xf32>
    %cst_84 = arith.constant 5.000000e-01 : f32
    %239 = vector.broadcast %cst_84 : f32 to vector<2x128xf32>
    %240 = arith.mulf %239, %238 : vector<2x128xf32>
    %241 = math.tanh %240 : vector<2x128xf32>
    %cst_85 = arith.constant 1.000000e+00 : f32
    %242 = vector.broadcast %cst_85 : f32 to vector<2x128xf32>
    %243 = arith.addf %241, %242 : vector<2x128xf32>
    %cst_86 = arith.constant 5.000000e-01 : f32
    %244 = vector.broadcast %cst_86 : f32 to vector<2x128xf32>
    %245 = arith.mulf %244, %243 : vector<2x128xf32>
    %246 = vector.extract_strided_slice %229 {offsets = [0, 256], sizes = [2, 128], strides = [1, 1]} : vector<2x512xf32> to vector<2x128xf32>
    %247 = math.tanh %246 : vector<2x128xf32>
    %248 = vector.extract_strided_slice %229 {offsets = [0, 384], sizes = [2, 128], strides = [1, 1]} : vector<2x512xf32> to vector<2x128xf32>
    %cst_87 = arith.constant 5.000000e-01 : f32
    %249 = vector.broadcast %cst_87 : f32 to vector<2x128xf32>
    %250 = arith.mulf %249, %248 : vector<2x128xf32>
    %251 = math.tanh %250 : vector<2x128xf32>
    %cst_88 = arith.constant 1.000000e+00 : f32
    %252 = vector.broadcast %cst_88 : f32 to vector<2x128xf32>
    %253 = arith.addf %251, %252 : vector<2x128xf32>
    %cst_89 = arith.constant 5.000000e-01 : f32
    %254 = vector.broadcast %cst_89 : f32 to vector<2x128xf32>
    %255 = arith.mulf %254, %253 : vector<2x128xf32>
    %256 = arith.mulf %245, %185 : vector<2x128xf32>
    %257 = arith.mulf %237, %247 : vector<2x128xf32>
    %258 = arith.addf %256, %257 : vector<2x128xf32>
    %259 = math.tanh %258 : vector<2x128xf32>
    %260 = arith.mulf %255, %259 : vector<2x128xf32>
    %c4 = arith.constant 4 : index
    %c0_90 = arith.constant 0 : index
    %261 = vector.load %arg6[%c4, %c0_90] : memref<16x128xf32, #tpu.memory_space<vmem>>, vector<2x128xf32>
    tpu.vector_store %arg6[%c4, %c0_90], %260 {strides = array<i32>} : memref<16x128xf32, #tpu.memory_space<vmem>>, vector<2x128xf32>,
    %262 = vector.extract_strided_slice %6 {offsets = [8, 0], sizes = [2, 512], strides = [1, 1]} : vector<16x512xf32> to vector<2x512xf32>
    %263 = arith.truncf %224 : vector<2x128xf32> to vector<2x128xbf16>
    %c16_91 = arith.constant 16 : index
    %c0_92 = arith.constant 0 : index
    %264 = vector.load %arg1[%c16_91, %c0_92] : memref<400x512xbf16, #tpu.memory_space<vmem>>, vector<128x512xbf16>
    %cst_93 = arith.constant dense<0.000000e+00> : vector<2x512xf32>
    %265 = tpu.matmul %263, %264, %cst_93 {dimension_numbers = #tpu.dot_dimension_numbers<[1], [0], [0], [1], [0, 0, 1, 1], [], []>} : vector<2x128xbf16>, vector<128x512xbf16>, vector<2x512xf32> -> vector<2x512xf32>
    %266 = arith.addf %262, %265 : vector<2x512xf32>
    %267 = vector.extract_strided_slice %266 {offsets = [0, 0], sizes = [2, 128], strides = [1, 1]} : vector<2x512xf32> to vector<2x128xf32>
    %cst_94 = arith.constant 5.000000e-01 : f32
    %268 = vector.broadcast %cst_94 : f32 to vector<2x128xf32>
    %269 = arith.mulf %268, %267 : vector<2x128xf32>
    %270 = math.tanh %269 : vector<2x128xf32>
    %cst_95 = arith.constant 1.000000e+00 : f32
    %271 = vector.broadcast %cst_95 : f32 to vector<2x128xf32>
    %272 = arith.addf %270, %271 : vector<2x128xf32>
    %cst_96 = arith.constant 5.000000e-01 : f32
    %273 = vector.broadcast %cst_96 : f32 to vector<2x128xf32>
    %274 = arith.mulf %273, %272 : vector<2x128xf32>
    %275 = vector.extract_strided_slice %266 {offsets = [0, 128], sizes = [2, 128], strides = [1, 1]} : vector<2x512xf32> to vector<2x128xf32>
    %cst_97 = arith.constant 5.000000e-01 : f32
    %276 = vector.broadcast %cst_97 : f32 to vector<2x128xf32>
    %277 = arith.mulf %276, %275 : vector<2x128xf32>
    %278 = math.tanh %277 : vector<2x128xf32>
    %cst_98 = arith.constant 1.000000e+00 : f32
    %279 = vector.broadcast %cst_98 : f32 to vector<2x128xf32>
    %280 = arith.addf %278, %279 : vector<2x128xf32>
    %cst_99 = arith.constant 5.000000e-01 : f32
    %281 = vector.broadcast %cst_99 : f32 to vector<2x128xf32>
    %282 = arith.mulf %281, %280 : vector<2x128xf32>
    %283 = vector.extract_strided_slice %266 {offsets = [0, 256], sizes = [2, 128], strides = [1, 1]} : vector<2x512xf32> to vector<2x128xf32>
    %284 = math.tanh %283 : vector<2x128xf32>
    %285 = vector.extract_strided_slice %266 {offsets = [0, 384], sizes = [2, 128], strides = [1, 1]} : vector<2x512xf32> to vector<2x128xf32>
    %cst_100 = arith.constant 5.000000e-01 : f32
    %286 = vector.broadcast %cst_100 : f32 to vector<2x128xf32>
    %287 = arith.mulf %286, %285 : vector<2x128xf32>
    %288 = math.tanh %287 : vector<2x128xf32>
    %cst_101 = arith.constant 1.000000e+00 : f32
    %289 = vector.broadcast %cst_101 : f32 to vector<2x128xf32>
    %290 = arith.addf %288, %289 : vector<2x128xf32>
    %cst_102 = arith.constant 5.000000e-01 : f32
    %291 = vector.broadcast %cst_102 : f32 to vector<2x128xf32>
    %292 = arith.mulf %291, %290 : vector<2x128xf32>
    %293 = arith.mulf %282, %222 : vector<2x128xf32>
    %294 = arith.mulf %274, %284 : vector<2x128xf32>
    %295 = arith.addf %293, %294 : vector<2x128xf32>
    %296 = math.tanh %295 : vector<2x128xf32>
    %297 = arith.mulf %292, %296 : vector<2x128xf32>
    %298 = tpu.concatenate %224, %260 in 1 : vector<2x128xf32>, vector<2x128xf32> -> vector<2x256xf32>
    %299 = arith.truncf %298 : vector<2x256xf32> to vector<2x256xbf16>
    %c144_103 = arith.constant 144 : index
    %c0_104 = arith.constant 0 : index
    %300 = vector.load %arg1[%c144_103, %c0_104] : memref<400x512xbf16, #tpu.memory_space<vmem>>, vector<256x512xbf16>
    %cst_105 = arith.constant dense<0.000000e+00> : vector<2x512xf32>
    %301 = tpu.matmul %299, %300, %cst_105 {dimension_numbers = #tpu.dot_dimension_numbers<[1], [0], [0], [1], [0, 0, 1, 1], [], []>} : vector<2x256xbf16>, vector<256x512xbf16>, vector<2x512xf32> -> vector<2x512xf32>
    %302 = arith.addf %9, %301 : vector<2x512xf32>
    %303 = vector.extract_strided_slice %302 {offsets = [0, 0], sizes = [2, 128], strides = [1, 1]} : vector<2x512xf32> to vector<2x128xf32>
    %cst_106 = arith.constant 5.000000e-01 : f32
    %304 = vector.broadcast %cst_106 : f32 to vector<2x128xf32>
    %305 = arith.mulf %304, %303 : vector<2x128xf32>
    %306 = math.tanh %305 : vector<2x128xf32>
    %cst_107 = arith.constant 1.000000e+00 : f32
    %307 = vector.broadcast %cst_107 : f32 to vector<2x128xf32>
    %308 = arith.addf %306, %307 : vector<2x128xf32>
    %cst_108 = arith.constant 5.000000e-01 : f32
    %309 = vector.broadcast %cst_108 : f32 to vector<2x128xf32>
    %310 = arith.mulf %309, %308 : vector<2x128xf32>
    %311 = vector.extract_strided_slice %302 {offsets = [0, 128], sizes = [2, 128], strides = [1, 1]} : vector<2x512xf32> to vector<2x128xf32>
    %cst_109 = arith.constant 5.000000e-01 : f32
    %312 = vector.broadcast %cst_109 : f32 to vector<2x128xf32>
    %313 = arith.mulf %312, %311 : vector<2x128xf32>
    %314 = math.tanh %313 : vector<2x128xf32>
    %cst_110 = arith.constant 1.000000e+00 : f32
    %315 = vector.broadcast %cst_110 : f32 to vector<2x128xf32>
    %316 = arith.addf %314, %315 : vector<2x128xf32>
    %cst_111 = arith.constant 5.000000e-01 : f32
    %317 = vector.broadcast %cst_111 : f32 to vector<2x128xf32>
    %318 = arith.mulf %317, %316 : vector<2x128xf32>
    %319 = vector.extract_strided_slice %302 {offsets = [0, 256], sizes = [2, 128], strides = [1, 1]} : vector<2x512xf32> to vector<2x128xf32>
    %320 = math.tanh %319 : vector<2x128xf32>
    %321 = vector.extract_strided_slice %302 {offsets = [0, 384], sizes = [2, 128], strides = [1, 1]} : vector<2x512xf32> to vector<2x128xf32>
    %cst_112 = arith.constant 5.000000e-01 : f32
    %322 = vector.broadcast %cst_112 : f32 to vector<2x128xf32>
    %323 = arith.mulf %322, %321 : vector<2x128xf32>
    %324 = math.tanh %323 : vector<2x128xf32>
    %cst_113 = arith.constant 1.000000e+00 : f32
    %325 = vector.broadcast %cst_113 : f32 to vector<2x128xf32>
    %326 = arith.addf %324, %325 : vector<2x128xf32>
    %cst_114 = arith.constant 5.000000e-01 : f32
    %327 = vector.broadcast %cst_114 : f32 to vector<2x128xf32>
    %328 = arith.mulf %327, %326 : vector<2x128xf32>
    %329 = arith.mulf %318, %258 : vector<2x128xf32>
    %330 = arith.mulf %310, %320 : vector<2x128xf32>
    %331 = arith.addf %329, %330 : vector<2x128xf32>
    %332 = math.tanh %331 : vector<2x128xf32>
    %333 = arith.mulf %328, %332 : vector<2x128xf32>
    %c6 = arith.constant 6 : index
    %c0_115 = arith.constant 0 : index
    %334 = vector.load %arg6[%c6, %c0_115] : memref<16x128xf32, #tpu.memory_space<vmem>>, vector<2x128xf32>
    tpu.vector_store %arg6[%c6, %c0_115], %333 {strides = array<i32>} : memref<16x128xf32, #tpu.memory_space<vmem>>, vector<2x128xf32>,
    %335 = vector.extract_strided_slice %6 {offsets = [10, 0], sizes = [2, 512], strides = [1, 1]} : vector<16x512xf32> to vector<2x512xf32>
    %336 = arith.truncf %297 : vector<2x128xf32> to vector<2x128xbf16>
    %c16_116 = arith.constant 16 : index
    %c0_117 = arith.constant 0 : index
    %337 = vector.load %arg1[%c16_116, %c0_117] : memref<400x512xbf16, #tpu.memory_space<vmem>>, vector<128x512xbf16>
    %cst_118 = arith.constant dense<0.000000e+00> : vector<2x512xf32>
    %338 = tpu.matmul %336, %337, %cst_118 {dimension_numbers = #tpu.dot_dimension_numbers<[1], [0], [0], [1], [0, 0, 1, 1], [], []>} : vector<2x128xbf16>, vector<128x512xbf16>, vector<2x512xf32> -> vector<2x512xf32>
    %339 = arith.addf %335, %338 : vector<2x512xf32>
    %340 = vector.extract_strided_slice %339 {offsets = [0, 0], sizes = [2, 128], strides = [1, 1]} : vector<2x512xf32> to vector<2x128xf32>
    %cst_119 = arith.constant 5.000000e-01 : f32
    %341 = vector.broadcast %cst_119 : f32 to vector<2x128xf32>
    %342 = arith.mulf %341, %340 : vector<2x128xf32>
    %343 = math.tanh %342 : vector<2x128xf32>
    %cst_120 = arith.constant 1.000000e+00 : f32
    %344 = vector.broadcast %cst_120 : f32 to vector<2x128xf32>
    %345 = arith.addf %343, %344 : vector<2x128xf32>
    %cst_121 = arith.constant 5.000000e-01 : f32
    %346 = vector.broadcast %cst_121 : f32 to vector<2x128xf32>
    %347 = arith.mulf %346, %345 : vector<2x128xf32>
    %348 = vector.extract_strided_slice %339 {offsets = [0, 128], sizes = [2, 128], strides = [1, 1]} : vector<2x512xf32> to vector<2x128xf32>
    %cst_122 = arith.constant 5.000000e-01 : f32
    %349 = vector.broadcast %cst_122 : f32 to vector<2x128xf32>
    %350 = arith.mulf %349, %348 : vector<2x128xf32>
    %351 = math.tanh %350 : vector<2x128xf32>
    %cst_123 = arith.constant 1.000000e+00 : f32
    %352 = vector.broadcast %cst_123 : f32 to vector<2x128xf32>
    %353 = arith.addf %351, %352 : vector<2x128xf32>
    %cst_124 = arith.constant 5.000000e-01 : f32
    %354 = vector.broadcast %cst_124 : f32 to vector<2x128xf32>
    %355 = arith.mulf %354, %353 : vector<2x128xf32>
    %356 = vector.extract_strided_slice %339 {offsets = [0, 256], sizes = [2, 128], strides = [1, 1]} : vector<2x512xf32> to vector<2x128xf32>
    %357 = math.tanh %356 : vector<2x128xf32>
    %358 = vector.extract_strided_slice %339 {offsets = [0, 384], sizes = [2, 128], strides = [1, 1]} : vector<2x512xf32> to vector<2x128xf32>
    %cst_125 = arith.constant 5.000000e-01 : f32
    %359 = vector.broadcast %cst_125 : f32 to vector<2x128xf32>
    %360 = arith.mulf %359, %358 : vector<2x128xf32>
    %361 = math.tanh %360 : vector<2x128xf32>
    %cst_126 = arith.constant 1.000000e+00 : f32
    %362 = vector.broadcast %cst_126 : f32 to vector<2x128xf32>
    %363 = arith.addf %361, %362 : vector<2x128xf32>
    %cst_127 = arith.constant 5.000000e-01 : f32
    %364 = vector.broadcast %cst_127 : f32 to vector<2x128xf32>
    %365 = arith.mulf %364, %363 : vector<2x128xf32>
    %366 = arith.mulf %355, %295 : vector<2x128xf32>
    %367 = arith.mulf %347, %357 : vector<2x128xf32>
    %368 = arith.addf %366, %367 : vector<2x128xf32>
    %369 = math.tanh %368 : vector<2x128xf32>
    %370 = arith.mulf %365, %369 : vector<2x128xf32>
    %371 = tpu.concatenate %297, %333 in 1 : vector<2x128xf32>, vector<2x128xf32> -> vector<2x256xf32>
    %372 = arith.truncf %371 : vector<2x256xf32> to vector<2x256xbf16>
    %c144_128 = arith.constant 144 : index
    %c0_129 = arith.constant 0 : index
    %373 = vector.load %arg1[%c144_128, %c0_129] : memref<400x512xbf16, #tpu.memory_space<vmem>>, vector<256x512xbf16>
    %cst_130 = arith.constant dense<0.000000e+00> : vector<2x512xf32>
    %374 = tpu.matmul %372, %373, %cst_130 {dimension_numbers = #tpu.dot_dimension_numbers<[1], [0], [0], [1], [0, 0, 1, 1], [], []>} : vector<2x256xbf16>, vector<256x512xbf16>, vector<2x512xf32> -> vector<2x512xf32>
    %375 = arith.addf %9, %374 : vector<2x512xf32>
    %376 = vector.extract_strided_slice %375 {offsets = [0, 0], sizes = [2, 128], strides = [1, 1]} : vector<2x512xf32> to vector<2x128xf32>
    %cst_131 = arith.constant 5.000000e-01 : f32
    %377 = vector.broadcast %cst_131 : f32 to vector<2x128xf32>
    %378 = arith.mulf %377, %376 : vector<2x128xf32>
    %379 = math.tanh %378 : vector<2x128xf32>
    %cst_132 = arith.constant 1.000000e+00 : f32
    %380 = vector.broadcast %cst_132 : f32 to vector<2x128xf32>
    %381 = arith.addf %379, %380 : vector<2x128xf32>
    %cst_133 = arith.constant 5.000000e-01 : f32
    %382 = vector.broadcast %cst_133 : f32 to vector<2x128xf32>
    %383 = arith.mulf %382, %381 : vector<2x128xf32>
    %384 = vector.extract_strided_slice %375 {offsets = [0, 128], sizes = [2, 128], strides = [1, 1]} : vector<2x512xf32> to vector<2x128xf32>
    %cst_134 = arith.constant 5.000000e-01 : f32
    %385 = vector.broadcast %cst_134 : f32 to vector<2x128xf32>
    %386 = arith.mulf %385, %384 : vector<2x128xf32>
    %387 = math.tanh %386 : vector<2x128xf32>
    %cst_135 = arith.constant 1.000000e+00 : f32
    %388 = vector.broadcast %cst_135 : f32 to vector<2x128xf32>
    %389 = arith.addf %387, %388 : vector<2x128xf32>
    %cst_136 = arith.constant 5.000000e-01 : f32
    %390 = vector.broadcast %cst_136 : f32 to vector<2x128xf32>
    %391 = arith.mulf %390, %389 : vector<2x128xf32>
    %392 = vector.extract_strided_slice %375 {offsets = [0, 256], sizes = [2, 128], strides = [1, 1]} : vector<2x512xf32> to vector<2x128xf32>
    %393 = math.tanh %392 : vector<2x128xf32>
    %394 = vector.extract_strided_slice %375 {offsets = [0, 384], sizes = [2, 128], strides = [1, 1]} : vector<2x512xf32> to vector<2x128xf32>
    %cst_137 = arith.constant 5.000000e-01 : f32
    %395 = vector.broadcast %cst_137 : f32 to vector<2x128xf32>
    %396 = arith.mulf %395, %394 : vector<2x128xf32>
    %397 = math.tanh %396 : vector<2x128xf32>
    %cst_138 = arith.constant 1.000000e+00 : f32
    %398 = vector.broadcast %cst_138 : f32 to vector<2x128xf32>
    %399 = arith.addf %397, %398 : vector<2x128xf32>
    %cst_139 = arith.constant 5.000000e-01 : f32
    %400 = vector.broadcast %cst_139 : f32 to vector<2x128xf32>
    %401 = arith.mulf %400, %399 : vector<2x128xf32>
    %402 = arith.mulf %391, %331 : vector<2x128xf32>
    %403 = arith.mulf %383, %393 : vector<2x128xf32>
    %404 = arith.addf %402, %403 : vector<2x128xf32>
    %405 = math.tanh %404 : vector<2x128xf32>
    %406 = arith.mulf %401, %405 : vector<2x128xf32>
    %c8 = arith.constant 8 : index
    %c0_140 = arith.constant 0 : index
    %407 = vector.load %arg6[%c8, %c0_140] : memref<16x128xf32, #tpu.memory_space<vmem>>, vector<2x128xf32>
    tpu.vector_store %arg6[%c8, %c0_140], %406 {strides = array<i32>} : memref<16x128xf32, #tpu.memory_space<vmem>>, vector<2x128xf32>,
    %408 = vector.extract_strided_slice %6 {offsets = [12, 0], sizes = [2, 512], strides = [1, 1]} : vector<16x512xf32> to vector<2x512xf32>
    %409 = arith.truncf %370 : vector<2x128xf32> to vector<2x128xbf16>
    %c16_141 = arith.constant 16 : index
    %c0_142 = arith.constant 0 : index
    %410 = vector.load %arg1[%c16_141, %c0_142] : memref<400x512xbf16, #tpu.memory_space<vmem>>, vector<128x512xbf16>
    %cst_143 = arith.constant dense<0.000000e+00> : vector<2x512xf32>
    %411 = tpu.matmul %409, %410, %cst_143 {dimension_numbers = #tpu.dot_dimension_numbers<[1], [0], [0], [1], [0, 0, 1, 1], [], []>} : vector<2x128xbf16>, vector<128x512xbf16>, vector<2x512xf32> -> vector<2x512xf32>
    %412 = arith.addf %408, %411 : vector<2x512xf32>
    %413 = vector.extract_strided_slice %412 {offsets = [0, 0], sizes = [2, 128], strides = [1, 1]} : vector<2x512xf32> to vector<2x128xf32>
    %cst_144 = arith.constant 5.000000e-01 : f32
    %414 = vector.broadcast %cst_144 : f32 to vector<2x128xf32>
    %415 = arith.mulf %414, %413 : vector<2x128xf32>
    %416 = math.tanh %415 : vector<2x128xf32>
    %cst_145 = arith.constant 1.000000e+00 : f32
    %417 = vector.broadcast %cst_145 : f32 to vector<2x128xf32>
    %418 = arith.addf %416, %417 : vector<2x128xf32>
    %cst_146 = arith.constant 5.000000e-01 : f32
    %419 = vector.broadcast %cst_146 : f32 to vector<2x128xf32>
    %420 = arith.mulf %419, %418 : vector<2x128xf32>
    %421 = vector.extract_strided_slice %412 {offsets = [0, 128], sizes = [2, 128], strides = [1, 1]} : vector<2x512xf32> to vector<2x128xf32>
    %cst_147 = arith.constant 5.000000e-01 : f32
    %422 = vector.broadcast %cst_147 : f32 to vector<2x128xf32>
    %423 = arith.mulf %422, %421 : vector<2x128xf32>
    %424 = math.tanh %423 : vector<2x128xf32>
    %cst_148 = arith.constant 1.000000e+00 : f32
    %425 = vector.broadcast %cst_148 : f32 to vector<2x128xf32>
    %426 = arith.addf %424, %425 : vector<2x128xf32>
    %cst_149 = arith.constant 5.000000e-01 : f32
    %427 = vector.broadcast %cst_149 : f32 to vector<2x128xf32>
    %428 = arith.mulf %427, %426 : vector<2x128xf32>
    %429 = vector.extract_strided_slice %412 {offsets = [0, 256], sizes = [2, 128], strides = [1, 1]} : vector<2x512xf32> to vector<2x128xf32>
    %430 = math.tanh %429 : vector<2x128xf32>
    %431 = vector.extract_strided_slice %412 {offsets = [0, 384], sizes = [2, 128], strides = [1, 1]} : vector<2x512xf32> to vector<2x128xf32>
    %cst_150 = arith.constant 5.000000e-01 : f32
    %432 = vector.broadcast %cst_150 : f32 to vector<2x128xf32>
    %433 = arith.mulf %432, %431 : vector<2x128xf32>
    %434 = math.tanh %433 : vector<2x128xf32>
    %cst_151 = arith.constant 1.000000e+00 : f32
    %435 = vector.broadcast %cst_151 : f32 to vector<2x128xf32>
    %436 = arith.addf %434, %435 : vector<2x128xf32>
    %cst_152 = arith.constant 5.000000e-01 : f32
    %437 = vector.broadcast %cst_152 : f32 to vector<2x128xf32>
    %438 = arith.mulf %437, %436 : vector<2x128xf32>
    %439 = arith.mulf %428, %368 : vector<2x128xf32>
    %440 = arith.mulf %420, %430 : vector<2x128xf32>
    %441 = arith.addf %439, %440 : vector<2x128xf32>
    %442 = math.tanh %441 : vector<2x128xf32>
    %443 = arith.mulf %438, %442 : vector<2x128xf32>
    %444 = tpu.concatenate %370, %406 in 1 : vector<2x128xf32>, vector<2x128xf32> -> vector<2x256xf32>
    %445 = arith.truncf %444 : vector<2x256xf32> to vector<2x256xbf16>
    %c144_153 = arith.constant 144 : index
    %c0_154 = arith.constant 0 : index
    %446 = vector.load %arg1[%c144_153, %c0_154] : memref<400x512xbf16, #tpu.memory_space<vmem>>, vector<256x512xbf16>
    %cst_155 = arith.constant dense<0.000000e+00> : vector<2x512xf32>
    %447 = tpu.matmul %445, %446, %cst_155 {dimension_numbers = #tpu.dot_dimension_numbers<[1], [0], [0], [1], [0, 0, 1, 1], [], []>} : vector<2x256xbf16>, vector<256x512xbf16>, vector<2x512xf32> -> vector<2x512xf32>
    %448 = arith.addf %9, %447 : vector<2x512xf32>
    %449 = vector.extract_strided_slice %448 {offsets = [0, 0], sizes = [2, 128], strides = [1, 1]} : vector<2x512xf32> to vector<2x128xf32>
    %cst_156 = arith.constant 5.000000e-01 : f32
    %450 = vector.broadcast %cst_156 : f32 to vector<2x128xf32>
    %451 = arith.mulf %450, %449 : vector<2x128xf32>
    %452 = math.tanh %451 : vector<2x128xf32>
    %cst_157 = arith.constant 1.000000e+00 : f32
    %453 = vector.broadcast %cst_157 : f32 to vector<2x128xf32>
    %454 = arith.addf %452, %453 : vector<2x128xf32>
    %cst_158 = arith.constant 5.000000e-01 : f32
    %455 = vector.broadcast %cst_158 : f32 to vector<2x128xf32>
    %456 = arith.mulf %455, %454 : vector<2x128xf32>
    %457 = vector.extract_strided_slice %448 {offsets = [0, 128], sizes = [2, 128], strides = [1, 1]} : vector<2x512xf32> to vector<2x128xf32>
    %cst_159 = arith.constant 5.000000e-01 : f32
    %458 = vector.broadcast %cst_159 : f32 to vector<2x128xf32>
    %459 = arith.mulf %458, %457 : vector<2x128xf32>
    %460 = math.tanh %459 : vector<2x128xf32>
    %cst_160 = arith.constant 1.000000e+00 : f32
    %461 = vector.broadcast %cst_160 : f32 to vector<2x128xf32>
    %462 = arith.addf %460, %461 : vector<2x128xf32>
    %cst_161 = arith.constant 5.000000e-01 : f32
    %463 = vector.broadcast %cst_161 : f32 to vector<2x128xf32>
    %464 = arith.mulf %463, %462 : vector<2x128xf32>
    %465 = vector.extract_strided_slice %448 {offsets = [0, 256], sizes = [2, 128], strides = [1, 1]} : vector<2x512xf32> to vector<2x128xf32>
    %466 = math.tanh %465 : vector<2x128xf32>
    %467 = vector.extract_strided_slice %448 {offsets = [0, 384], sizes = [2, 128], strides = [1, 1]} : vector<2x512xf32> to vector<2x128xf32>
    %cst_162 = arith.constant 5.000000e-01 : f32
    %468 = vector.broadcast %cst_162 : f32 to vector<2x128xf32>
    %469 = arith.mulf %468, %467 : vector<2x128xf32>
    %470 = math.tanh %469 : vector<2x128xf32>
    %cst_163 = arith.constant 1.000000e+00 : f32
    %471 = vector.broadcast %cst_163 : f32 to vector<2x128xf32>
    %472 = arith.addf %470, %471 : vector<2x128xf32>
    %cst_164 = arith.constant 5.000000e-01 : f32
    %473 = vector.broadcast %cst_164 : f32 to vector<2x128xf32>
    %474 = arith.mulf %473, %472 : vector<2x128xf32>
    %475 = arith.mulf %464, %404 : vector<2x128xf32>
    %476 = arith.mulf %456, %466 : vector<2x128xf32>
    %477 = arith.addf %475, %476 : vector<2x128xf32>
    %478 = math.tanh %477 : vector<2x128xf32>
    %479 = arith.mulf %474, %478 : vector<2x128xf32>
    %c10 = arith.constant 10 : index
    %c0_165 = arith.constant 0 : index
    %480 = vector.load %arg6[%c10, %c0_165] : memref<16x128xf32, #tpu.memory_space<vmem>>, vector<2x128xf32>
    tpu.vector_store %arg6[%c10, %c0_165], %479 {strides = array<i32>} : memref<16x128xf32, #tpu.memory_space<vmem>>, vector<2x128xf32>,
    %481 = vector.extract_strided_slice %6 {offsets = [14, 0], sizes = [2, 512], strides = [1, 1]} : vector<16x512xf32> to vector<2x512xf32>
    %482 = arith.truncf %443 : vector<2x128xf32> to vector<2x128xbf16>
    %c16_166 = arith.constant 16 : index
    %c0_167 = arith.constant 0 : index
    %483 = vector.load %arg1[%c16_166, %c0_167] : memref<400x512xbf16, #tpu.memory_space<vmem>>, vector<128x512xbf16>
    %cst_168 = arith.constant dense<0.000000e+00> : vector<2x512xf32>
    %484 = tpu.matmul %482, %483, %cst_168 {dimension_numbers = #tpu.dot_dimension_numbers<[1], [0], [0], [1], [0, 0, 1, 1], [], []>} : vector<2x128xbf16>, vector<128x512xbf16>, vector<2x512xf32> -> vector<2x512xf32>
    %485 = arith.addf %481, %484 : vector<2x512xf32>
    %486 = vector.extract_strided_slice %485 {offsets = [0, 0], sizes = [2, 128], strides = [1, 1]} : vector<2x512xf32> to vector<2x128xf32>
    %cst_169 = arith.constant 5.000000e-01 : f32
    %487 = vector.broadcast %cst_169 : f32 to vector<2x128xf32>
    %488 = arith.mulf %487, %486 : vector<2x128xf32>
    %489 = math.tanh %488 : vector<2x128xf32>
    %cst_170 = arith.constant 1.000000e+00 : f32
    %490 = vector.broadcast %cst_170 : f32 to vector<2x128xf32>
    %491 = arith.addf %489, %490 : vector<2x128xf32>
    %cst_171 = arith.constant 5.000000e-01 : f32
    %492 = vector.broadcast %cst_171 : f32 to vector<2x128xf32>
    %493 = arith.mulf %492, %491 : vector<2x128xf32>
    %494 = vector.extract_strided_slice %485 {offsets = [0, 128], sizes = [2, 128], strides = [1, 1]} : vector<2x512xf32> to vector<2x128xf32>
    %cst_172 = arith.constant 5.000000e-01 : f32
    %495 = vector.broadcast %cst_172 : f32 to vector<2x128xf32>
    %496 = arith.mulf %495, %494 : vector<2x128xf32>
    %497 = math.tanh %496 : vector<2x128xf32>
    %cst_173 = arith.constant 1.000000e+00 : f32
    %498 = vector.broadcast %cst_173 : f32 to vector<2x128xf32>
    %499 = arith.addf %497, %498 : vector<2x128xf32>
    %cst_174 = arith.constant 5.000000e-01 : f32
    %500 = vector.broadcast %cst_174 : f32 to vector<2x128xf32>
    %501 = arith.mulf %500, %499 : vector<2x128xf32>
    %502 = vector.extract_strided_slice %485 {offsets = [0, 256], sizes = [2, 128], strides = [1, 1]} : vector<2x512xf32> to vector<2x128xf32>
    %503 = math.tanh %502 : vector<2x128xf32>
    %504 = vector.extract_strided_slice %485 {offsets = [0, 384], sizes = [2, 128], strides = [1, 1]} : vector<2x512xf32> to vector<2x128xf32>
    %cst_175 = arith.constant 5.000000e-01 : f32
    %505 = vector.broadcast %cst_175 : f32 to vector<2x128xf32>
    %506 = arith.mulf %505, %504 : vector<2x128xf32>
    %507 = math.tanh %506 : vector<2x128xf32>
    %cst_176 = arith.constant 1.000000e+00 : f32
    %508 = vector.broadcast %cst_176 : f32 to vector<2x128xf32>
    %509 = arith.addf %507, %508 : vector<2x128xf32>
    %cst_177 = arith.constant 5.000000e-01 : f32
    %510 = vector.broadcast %cst_177 : f32 to vector<2x128xf32>
    %511 = arith.mulf %510, %509 : vector<2x128xf32>
    %512 = arith.mulf %501, %441 : vector<2x128xf32>
    %513 = arith.mulf %493, %503 : vector<2x128xf32>
    %514 = arith.addf %512, %513 : vector<2x128xf32>
    %515 = math.tanh %514 : vector<2x128xf32>
    %516 = arith.mulf %511, %515 : vector<2x128xf32>
    %517 = tpu.concatenate %443, %479 in 1 : vector<2x128xf32>, vector<2x128xf32> -> vector<2x256xf32>
    %518 = arith.truncf %517 : vector<2x256xf32> to vector<2x256xbf16>
    %c144_178 = arith.constant 144 : index
    %c0_179 = arith.constant 0 : index
    %519 = vector.load %arg1[%c144_178, %c0_179] : memref<400x512xbf16, #tpu.memory_space<vmem>>, vector<256x512xbf16>
    %cst_180 = arith.constant dense<0.000000e+00> : vector<2x512xf32>
    %520 = tpu.matmul %518, %519, %cst_180 {dimension_numbers = #tpu.dot_dimension_numbers<[1], [0], [0], [1], [0, 0, 1, 1], [], []>} : vector<2x256xbf16>, vector<256x512xbf16>, vector<2x512xf32> -> vector<2x512xf32>
    %521 = arith.addf %9, %520 : vector<2x512xf32>
    %522 = vector.extract_strided_slice %521 {offsets = [0, 0], sizes = [2, 128], strides = [1, 1]} : vector<2x512xf32> to vector<2x128xf32>
    %cst_181 = arith.constant 5.000000e-01 : f32
    %523 = vector.broadcast %cst_181 : f32 to vector<2x128xf32>
    %524 = arith.mulf %523, %522 : vector<2x128xf32>
    %525 = math.tanh %524 : vector<2x128xf32>
    %cst_182 = arith.constant 1.000000e+00 : f32
    %526 = vector.broadcast %cst_182 : f32 to vector<2x128xf32>
    %527 = arith.addf %525, %526 : vector<2x128xf32>
    %cst_183 = arith.constant 5.000000e-01 : f32
    %528 = vector.broadcast %cst_183 : f32 to vector<2x128xf32>
    %529 = arith.mulf %528, %527 : vector<2x128xf32>
    %530 = vector.extract_strided_slice %521 {offsets = [0, 128], sizes = [2, 128], strides = [1, 1]} : vector<2x512xf32> to vector<2x128xf32>
    %cst_184 = arith.constant 5.000000e-01 : f32
    %531 = vector.broadcast %cst_184 : f32 to vector<2x128xf32>
    %532 = arith.mulf %531, %530 : vector<2x128xf32>
    %533 = math.tanh %532 : vector<2x128xf32>
    %cst_185 = arith.constant 1.000000e+00 : f32
    %534 = vector.broadcast %cst_185 : f32 to vector<2x128xf32>
    %535 = arith.addf %533, %534 : vector<2x128xf32>
    %cst_186 = arith.constant 5.000000e-01 : f32
    %536 = vector.broadcast %cst_186 : f32 to vector<2x128xf32>
    %537 = arith.mulf %536, %535 : vector<2x128xf32>
    %538 = vector.extract_strided_slice %521 {offsets = [0, 256], sizes = [2, 128], strides = [1, 1]} : vector<2x512xf32> to vector<2x128xf32>
    %539 = math.tanh %538 : vector<2x128xf32>
    %540 = vector.extract_strided_slice %521 {offsets = [0, 384], sizes = [2, 128], strides = [1, 1]} : vector<2x512xf32> to vector<2x128xf32>
    %cst_187 = arith.constant 5.000000e-01 : f32
    %541 = vector.broadcast %cst_187 : f32 to vector<2x128xf32>
    %542 = arith.mulf %541, %540 : vector<2x128xf32>
    %543 = math.tanh %542 : vector<2x128xf32>
    %cst_188 = arith.constant 1.000000e+00 : f32
    %544 = vector.broadcast %cst_188 : f32 to vector<2x128xf32>
    %545 = arith.addf %543, %544 : vector<2x128xf32>
    %cst_189 = arith.constant 5.000000e-01 : f32
    %546 = vector.broadcast %cst_189 : f32 to vector<2x128xf32>
    %547 = arith.mulf %546, %545 : vector<2x128xf32>
    %548 = arith.mulf %537, %477 : vector<2x128xf32>
    %549 = arith.mulf %529, %539 : vector<2x128xf32>
    %550 = arith.addf %548, %549 : vector<2x128xf32>
    %551 = math.tanh %550 : vector<2x128xf32>
    %552 = arith.mulf %547, %551 : vector<2x128xf32>
    %c12 = arith.constant 12 : index
    %c0_190 = arith.constant 0 : index
    %553 = vector.load %arg6[%c12, %c0_190] : memref<16x128xf32, #tpu.memory_space<vmem>>, vector<2x128xf32>
    tpu.vector_store %arg6[%c12, %c0_190], %552 {strides = array<i32>} : memref<16x128xf32, #tpu.memory_space<vmem>>, vector<2x128xf32>,
    %554 = tpu.concatenate %516, %552 in 1 : vector<2x128xf32>, vector<2x128xf32> -> vector<2x256xf32>
    %555 = arith.truncf %554 : vector<2x256xf32> to vector<2x256xbf16>
    %c144_191 = arith.constant 144 : index
    %c0_192 = arith.constant 0 : index
    %556 = vector.load %arg1[%c144_191, %c0_192] : memref<400x512xbf16, #tpu.memory_space<vmem>>, vector<256x512xbf16>
    %cst_193 = arith.constant dense<0.000000e+00> : vector<2x512xf32>
    %557 = tpu.matmul %555, %556, %cst_193 {dimension_numbers = #tpu.dot_dimension_numbers<[1], [0], [0], [1], [0, 0, 1, 1], [], []>} : vector<2x256xbf16>, vector<256x512xbf16>, vector<2x512xf32> -> vector<2x512xf32>
    %558 = arith.addf %9, %557 : vector<2x512xf32>
    %559 = vector.extract_strided_slice %558 {offsets = [0, 0], sizes = [2, 128], strides = [1, 1]} : vector<2x512xf32> to vector<2x128xf32>
    %cst_194 = arith.constant 5.000000e-01 : f32
    %560 = vector.broadcast %cst_194 : f32 to vector<2x128xf32>
    %561 = arith.mulf %560, %559 : vector<2x128xf32>
    %562 = math.tanh %561 : vector<2x128xf32>
    %cst_195 = arith.constant 1.000000e+00 : f32
    %563 = vector.broadcast %cst_195 : f32 to vector<2x128xf32>
    %564 = arith.addf %562, %563 : vector<2x128xf32>
    %cst_196 = arith.constant 5.000000e-01 : f32
    %565 = vector.broadcast %cst_196 : f32 to vector<2x128xf32>
    %566 = arith.mulf %565, %564 : vector<2x128xf32>
    %567 = vector.extract_strided_slice %558 {offsets = [0, 128], sizes = [2, 128], strides = [1, 1]} : vector<2x512xf32> to vector<2x128xf32>
    %cst_197 = arith.constant 5.000000e-01 : f32
    %568 = vector.broadcast %cst_197 : f32 to vector<2x128xf32>
    %569 = arith.mulf %568, %567 : vector<2x128xf32>
    %570 = math.tanh %569 : vector<2x128xf32>
    %cst_198 = arith.constant 1.000000e+00 : f32
    %571 = vector.broadcast %cst_198 : f32 to vector<2x128xf32>
    %572 = arith.addf %570, %571 : vector<2x128xf32>
    %cst_199 = arith.constant 5.000000e-01 : f32
    %573 = vector.broadcast %cst_199 : f32 to vector<2x128xf32>
    %574 = arith.mulf %573, %572 : vector<2x128xf32>
    %575 = vector.extract_strided_slice %558 {offsets = [0, 256], sizes = [2, 128], strides = [1, 1]} : vector<2x512xf32> to vector<2x128xf32>
    %576 = math.tanh %575 : vector<2x128xf32>
    %577 = vector.extract_strided_slice %558 {offsets = [0, 384], sizes = [2, 128], strides = [1, 1]} : vector<2x512xf32> to vector<2x128xf32>
    %cst_200 = arith.constant 5.000000e-01 : f32
    %578 = vector.broadcast %cst_200 : f32 to vector<2x128xf32>
    %579 = arith.mulf %578, %577 : vector<2x128xf32>
    %580 = math.tanh %579 : vector<2x128xf32>
    %cst_201 = arith.constant 1.000000e+00 : f32
    %581 = vector.broadcast %cst_201 : f32 to vector<2x128xf32>
    %582 = arith.addf %580, %581 : vector<2x128xf32>
    %cst_202 = arith.constant 5.000000e-01 : f32
    %583 = vector.broadcast %cst_202 : f32 to vector<2x128xf32>
    %584 = arith.mulf %583, %582 : vector<2x128xf32>
    %585 = arith.mulf %574, %550 : vector<2x128xf32>
    %586 = arith.mulf %566, %576 : vector<2x128xf32>
    %587 = arith.addf %585, %586 : vector<2x128xf32>
    %588 = math.tanh %587 : vector<2x128xf32>
    %589 = arith.mulf %584, %588 : vector<2x128xf32>
    %c14 = arith.constant 14 : index
    %c0_203 = arith.constant 0 : index
    %590 = vector.load %arg6[%c14, %c0_203] : memref<16x128xf32, #tpu.memory_space<vmem>>, vector<2x128xf32>
    tpu.vector_store %arg6[%c14, %c0_203], %589 {strides = array<i32>} : memref<16x128xf32, #tpu.memory_space<vmem>>, vector<2x128xf32>,
    %c2_204 = arith.constant 2 : index
    %c0_205 = arith.constant 0 : index
    %591 = vector.load %arg4[%c2_204, %c0_205] : memref<5x512xf32, #tpu.memory_space<vmem>>, vector<1x128xf32>
    %c2_206 = arith.constant 2 : index
    %c128 = arith.constant 128 : index
    %592 = vector.load %arg4[%c2_206, %c128] : memref<5x512xf32, #tpu.memory_space<vmem>>, vector<1x128xf32>
    %c0_207 = arith.constant 0 : index
    %c0_208 = arith.constant 0 : index
    %593 = vector.load %arg6[%c0_207, %c0_208] : memref<16x128xf32, #tpu.memory_space<vmem>>, vector<16x128xf32>
    %cst_209 = arith.constant dense<0.000000e+00> : vector<16xf32>
    %594 = vector.multi_reduction <add>, %593, %cst_209 [1] : vector<16x128xf32> to vector<16xf32>
    %595 = vector.shape_cast %594 : vector<16xf32> to vector<16x1xf32>
    %cst_210 = arith.constant 1.280000e+02 : f32
    %596 = vector.broadcast %cst_210 : f32 to vector<16x1xf32>
    %597 = arith.divf %595, %596 : vector<16x1xf32>
    %598 = vector.broadcast %597 : vector<16x1xf32> to vector<16x128xf32>
    %599 = arith.subf %593, %598 : vector<16x128xf32>
    %600 = arith.mulf %599, %599 : vector<16x128xf32>
    %cst_211 = arith.constant dense<0.000000e+00> : vector<16xf32>
    %601 = vector.multi_reduction <add>, %600, %cst_211 [1] : vector<16x128xf32> to vector<16xf32>
    %602 = vector.shape_cast %601 : vector<16xf32> to vector<16x1xf32>
    %cst_212 = arith.constant 1.280000e+02 : f32
    %603 = vector.broadcast %cst_212 : f32 to vector<16x1xf32>
    %604 = arith.divf %602, %603 : vector<16x1xf32>
    %605 = vector.broadcast %597 : vector<16x1xf32> to vector<16x128xf32>
    %606 = arith.subf %593, %605 : vector<16x128xf32>
    %cst_213 = arith.constant 9.99999974E-6 : f32
    %607 = vector.broadcast %cst_213 : f32 to vector<16x1xf32>
    %608 = arith.addf %604, %607 : vector<16x1xf32>
    %609 = math.rsqrt %608 : vector<16x1xf32>
    %610 = vector.broadcast %609 : vector<16x1xf32> to vector<16x128xf32>
    %611 = arith.mulf %606, %610 : vector<16x128xf32>
    %612 = vector.broadcast %591 : vector<1x128xf32> to vector<16x128xf32>
    %613 = arith.mulf %611, %612 : vector<16x128xf32>
    %614 = vector.broadcast %592 : vector<1x128xf32> to vector<16x128xf32>
    %615 = arith.addf %613, %614 : vector<16x128xf32>
    %616 = arith.truncf %615 : vector<16x128xf32> to vector<16x128xbf16>
    %c0_214 = arith.constant 0 : index
    %c0_215 = arith.constant 0 : index
    %617 = vector.load %arg2[%c0_214, %c0_215] : memref<128x512xbf16, #tpu.memory_space<vmem>>, vector<128x384xbf16>
    %cst_216 = arith.constant dense<0.000000e+00> : vector<16x384xf32>
    %618 = tpu.matmul %616, %617, %cst_216 {dimension_numbers = #tpu.dot_dimension_numbers<[1], [0], [0], [1], [0, 0, 1, 1], [], []>} : vector<16x128xbf16>, vector<128x384xbf16>, vector<16x384xf32> -> vector<16x384xf32>
    %c3 = arith.constant 3 : index
    %c0_217 = arith.constant 0 : index
    %619 = vector.load %arg4[%c3, %c0_217] : memref<5x512xf32, #tpu.memory_space<vmem>>, vector<1x384xf32>
    %620 = vector.broadcast %619 : vector<1x384xf32> to vector<16x384xf32>
    %621 = arith.addf %618, %620 : vector<16x384xf32>
    %622 = vector.extract_strided_slice %621 {offsets = [0, 0], sizes = [16, 128], strides = [1, 1]} : vector<16x384xf32> to vector<16x128xf32>
    %cst_218 = arith.constant 0.176776692 : f32
    %623 = vector.broadcast %cst_218 : f32 to vector<16x128xf32>
    %624 = arith.mulf %622, %623 : vector<16x128xf32>
    %625 = vector.extract_strided_slice %621 {offsets = [0, 128], sizes = [16, 128], strides = [1, 1]} : vector<16x384xf32> to vector<16x128xf32>
    %626 = vector.extract_strided_slice %621 {offsets = [0, 256], sizes = [16, 128], strides = [1, 1]} : vector<16x384xf32> to vector<16x128xf32>
    %627 = tpu.iota {dimensions = array<i32: 0>} : vector<16x16xi32>
    %628 = tpu.iota {dimensions = array<i32: 1>} : vector<16x16xi32>
    %c2_i32 = arith.constant 2 : i32
    %c0_i32 = arith.constant 0 : i32
    %629 = arith.cmpi eq, %c2_i32, %c0_i32 : i32
    %c1_i32 = arith.constant 1 : i32
    %630 = arith.select %629, %c1_i32, %c2_i32 : i32
    %631 = vector.broadcast %630 : i32 to vector<16x16xi32>
    %632 = arith.remsi %627, %631 : vector<16x16xi32>
    %c0_i32_219 = arith.constant 0 : i32
    %633 = vector.broadcast %c0_i32_219 : i32 to vector<16x16xi32>
    %634 = arith.cmpi ne, %632, %633 : vector<16x16xi32>
    %c0_i32_220 = arith.constant 0 : i32
    %635 = vector.broadcast %c0_i32_220 : i32 to vector<16x16xi32>
    %636 = arith.cmpi slt, %632, %635 : vector<16x16xi32>
    %c0_i32_221 = arith.constant 0 : i32
    %637 = arith.cmpi slt, %630, %c0_i32_221 : i32
    %638 = vector.broadcast %637 : i1 to vector<16x16xi1>
    %639 = vector.broadcast %638 : vector<16x16xi1> to vector<16x16xi1>
    %640 = arith.xori %636, %639 : vector<16x16xi1>
    %641 = arith.andi %640, %634 : vector<16x16xi1>
    %642 = vector.broadcast %630 : i32 to vector<16x16xi32>
    %643 = arith.addi %632, %642 : vector<16x16xi32>
    %644 = arith.select %641, %643, %632 : vector<16x16xi1>, vector<16x16xi32>
    %c2_i32_222 = arith.constant 2 : i32
    %c0_i32_223 = arith.constant 0 : i32
    %645 = arith.cmpi eq, %c2_i32_222, %c0_i32_223 : i32
    %c1_i32_224 = arith.constant 1 : i32
    %646 = arith.select %645, %c1_i32_224, %c2_i32_222 : i32
    %647 = vector.broadcast %646 : i32 to vector<16x16xi32>
    %648 = arith.remsi %628, %647 : vector<16x16xi32>
    %c0_i32_225 = arith.constant 0 : i32
    %649 = vector.broadcast %c0_i32_225 : i32 to vector<16x16xi32>
    %650 = arith.cmpi ne, %648, %649 : vector<16x16xi32>
    %c0_i32_226 = arith.constant 0 : i32
    %651 = vector.broadcast %c0_i32_226 : i32 to vector<16x16xi32>
    %652 = arith.cmpi slt, %648, %651 : vector<16x16xi32>
    %c0_i32_227 = arith.constant 0 : i32
    %653 = arith.cmpi slt, %646, %c0_i32_227 : i32
    %654 = vector.broadcast %653 : i1 to vector<16x16xi1>
    %655 = vector.broadcast %654 : vector<16x16xi1> to vector<16x16xi1>
    %656 = arith.xori %652, %655 : vector<16x16xi1>
    %657 = arith.andi %656, %650 : vector<16x16xi1>
    %658 = vector.broadcast %646 : i32 to vector<16x16xi32>
    %659 = arith.addi %648, %658 : vector<16x16xi32>
    %660 = arith.select %657, %659, %648 : vector<16x16xi1>, vector<16x16xi32>
    %661 = arith.cmpi eq, %644, %660 : vector<16x16xi32>
    %cst_228 = arith.constant 0.000000e+00 : f32
    %cst_229 = arith.constant -1.000000e+30 : f32
    %662 = vector.broadcast %cst_228 : f32 to vector<16x16xf32>
    %663 = vector.broadcast %cst_229 : f32 to vector<16x16xf32>
    %664 = arith.select %661, %662, %663 : vector<16x16xi1>, vector<16x16xf32>
    %cst_230 = arith.constant 0.000000e+00 : f32
    %665 = vector.broadcast %cst_230 : f32 to vector<16x128xf32>
    %666 = vector.extract_strided_slice %624 {offsets = [0, 0], sizes = [16, 32], strides = [1, 1]} : vector<16x128xf32> to vector<16x32xf32>
    %667 = vector.extract_strided_slice %625 {offsets = [0, 0], sizes = [16, 32], strides = [1, 1]} : vector<16x128xf32> to vector<16x32xf32>
    %cst_231 = arith.constant dense<0.000000e+00> : vector<16x16xf32>
    %668 = tpu.matmul %666, %667, %cst_231 {dimension_numbers = #tpu.dot_dimension_numbers<[1], [1], [0], [0], [0, 0, 1, 0], [], []>} : vector<16x32xf32>, vector<16x32xf32>, vector<16x16xf32> -> vector<16x16xf32>
    %669 = arith.addf %668, %664 : vector<16x16xf32>
    %cst_232 = arith.constant dense<0xFF800000> : vector<16xf32>
    %670 = vector.multi_reduction <maximumf>, %669, %cst_232 [1] : vector<16x16xf32> to vector<16xf32>
    %671 = vector.shape_cast %670 : vector<16xf32> to vector<16x1xf32>
    %672 = vector.broadcast %671 : vector<16x1xf32> to vector<16x16xf32>
    %673 = arith.subf %669, %672 : vector<16x16xf32>
    %674 = math.exp %673 : vector<16x16xf32>
    %cst_233 = arith.constant dense<0.000000e+00> : vector<16xf32>
    %675 = vector.multi_reduction <add>, %674, %cst_233 [1] : vector<16x16xf32> to vector<16xf32>
    %676 = vector.shape_cast %675 : vector<16xf32> to vector<16x1xf32>
    %677 = tpu.reciprocal %676 {approx = true} : vector<16x1xf32> -> vector<16x1xf32>
    %678 = arith.mulf %676, %677 : vector<16x1xf32>
    %cst_234 = arith.constant 2.000000e+00 : f32
    %679 = vector.broadcast %cst_234 : f32 to vector<16x1xf32>
    %680 = arith.subf %679, %678 : vector<16x1xf32>
    %681 = arith.mulf %677, %680 : vector<16x1xf32>
    %682 = vector.broadcast %681 : vector<16x1xf32> to vector<16x16xf32>
    %683 = arith.mulf %674, %682 : vector<16x16xf32>
    %684 = vector.extract_strided_slice %626 {offsets = [0, 0], sizes = [16, 32], strides = [1, 1]} : vector<16x128xf32> to vector<16x32xf32>
    %cst_235 = arith.constant dense<0.000000e+00> : vector<16x32xf32>
    %685 = tpu.matmul %683, %684, %cst_235 {dimension_numbers = #tpu.dot_dimension_numbers<[1], [0], [0], [1], [0, 0, 1, 1], [], []>} : vector<16x16xf32>, vector<16x32xf32>, vector<16x32xf32> -> vector<16x32xf32>
    %686 = arith.truncf %685 : vector<16x32xf32> to vector<16x32xbf16>
    %c0_236 = arith.constant 0 : index
    %c384 = arith.constant 384 : index
    %687 = vector.load %arg2[%c0_236, %c384] : memref<128x512xbf16, #tpu.memory_space<vmem>>, vector<32x128xbf16>
    %cst_237 = arith.constant dense<0.000000e+00> : vector<16x128xf32>
    %688 = tpu.matmul %686, %687, %cst_237 {dimension_numbers = #tpu.dot_dimension_numbers<[1], [0], [0], [1], [0, 0, 1, 1], [], []>} : vector<16x32xbf16>, vector<32x128xbf16>, vector<16x128xf32> -> vector<16x128xf32>
    %689 = arith.addf %665, %688 : vector<16x128xf32>
    %690 = vector.extract_strided_slice %624 {offsets = [0, 32], sizes = [16, 32], strides = [1, 1]} : vector<16x128xf32> to vector<16x32xf32>
    %691 = vector.extract_strided_slice %625 {offsets = [0, 32], sizes = [16, 32], strides = [1, 1]} : vector<16x128xf32> to vector<16x32xf32>
    %cst_238 = arith.constant dense<0.000000e+00> : vector<16x16xf32>
    %692 = tpu.matmul %690, %691, %cst_238 {dimension_numbers = #tpu.dot_dimension_numbers<[1], [1], [0], [0], [0, 0, 1, 0], [], []>} : vector<16x32xf32>, vector<16x32xf32>, vector<16x16xf32> -> vector<16x16xf32>
    %693 = arith.addf %692, %664 : vector<16x16xf32>
    %cst_239 = arith.constant dense<0xFF800000> : vector<16xf32>
    %694 = vector.multi_reduction <maximumf>, %693, %cst_239 [1] : vector<16x16xf32> to vector<16xf32>
    %695 = vector.shape_cast %694 : vector<16xf32> to vector<16x1xf32>
    %696 = vector.broadcast %695 : vector<16x1xf32> to vector<16x16xf32>
    %697 = arith.subf %693, %696 : vector<16x16xf32>
    %698 = math.exp %697 : vector<16x16xf32>
    %cst_240 = arith.constant dense<0.000000e+00> : vector<16xf32>
    %699 = vector.multi_reduction <add>, %698, %cst_240 [1] : vector<16x16xf32> to vector<16xf32>
    %700 = vector.shape_cast %699 : vector<16xf32> to vector<16x1xf32>
    %701 = tpu.reciprocal %700 {approx = true} : vector<16x1xf32> -> vector<16x1xf32>
    %702 = arith.mulf %700, %701 : vector<16x1xf32>
    %cst_241 = arith.constant 2.000000e+00 : f32
    %703 = vector.broadcast %cst_241 : f32 to vector<16x1xf32>
    %704 = arith.subf %703, %702 : vector<16x1xf32>
    %705 = arith.mulf %701, %704 : vector<16x1xf32>
    %706 = vector.broadcast %705 : vector<16x1xf32> to vector<16x16xf32>
    %707 = arith.mulf %698, %706 : vector<16x16xf32>
    %708 = vector.extract_strided_slice %626 {offsets = [0, 32], sizes = [16, 32], strides = [1, 1]} : vector<16x128xf32> to vector<16x32xf32>
    %cst_242 = arith.constant dense<0.000000e+00> : vector<16x32xf32>
    %709 = tpu.matmul %707, %708, %cst_242 {dimension_numbers = #tpu.dot_dimension_numbers<[1], [0], [0], [1], [0, 0, 1, 1], [], []>} : vector<16x16xf32>, vector<16x32xf32>, vector<16x32xf32> -> vector<16x32xf32>
    %710 = arith.truncf %709 : vector<16x32xf32> to vector<16x32xbf16>
    %c32 = arith.constant 32 : index
    %c384_243 = arith.constant 384 : index
    %711 = vector.load %arg2[%c32, %c384_243] : memref<128x512xbf16, #tpu.memory_space<vmem>>, vector<32x128xbf16>
    %cst_244 = arith.constant dense<0.000000e+00> : vector<16x128xf32>
    %712 = tpu.matmul %710, %711, %cst_244 {dimension_numbers = #tpu.dot_dimension_numbers<[1], [0], [0], [1], [0, 0, 1, 1], [], []>} : vector<16x32xbf16>, vector<32x128xbf16>, vector<16x128xf32> -> vector<16x128xf32>
    %713 = arith.addf %689, %712 : vector<16x128xf32>
    %714 = vector.extract_strided_slice %624 {offsets = [0, 64], sizes = [16, 32], strides = [1, 1]} : vector<16x128xf32> to vector<16x32xf32>
    %715 = vector.extract_strided_slice %625 {offsets = [0, 64], sizes = [16, 32], strides = [1, 1]} : vector<16x128xf32> to vector<16x32xf32>
    %cst_245 = arith.constant dense<0.000000e+00> : vector<16x16xf32>
    %716 = tpu.matmul %714, %715, %cst_245 {dimension_numbers = #tpu.dot_dimension_numbers<[1], [1], [0], [0], [0, 0, 1, 0], [], []>} : vector<16x32xf32>, vector<16x32xf32>, vector<16x16xf32> -> vector<16x16xf32>
    %717 = arith.addf %716, %664 : vector<16x16xf32>
    %cst_246 = arith.constant dense<0xFF800000> : vector<16xf32>
    %718 = vector.multi_reduction <maximumf>, %717, %cst_246 [1] : vector<16x16xf32> to vector<16xf32>
    %719 = vector.shape_cast %718 : vector<16xf32> to vector<16x1xf32>
    %720 = vector.broadcast %719 : vector<16x1xf32> to vector<16x16xf32>
    %721 = arith.subf %717, %720 : vector<16x16xf32>
    %722 = math.exp %721 : vector<16x16xf32>
    %cst_247 = arith.constant dense<0.000000e+00> : vector<16xf32>
    %723 = vector.multi_reduction <add>, %722, %cst_247 [1] : vector<16x16xf32> to vector<16xf32>
    %724 = vector.shape_cast %723 : vector<16xf32> to vector<16x1xf32>
    %725 = tpu.reciprocal %724 {approx = true} : vector<16x1xf32> -> vector<16x1xf32>
    %726 = arith.mulf %724, %725 : vector<16x1xf32>
    %cst_248 = arith.constant 2.000000e+00 : f32
    %727 = vector.broadcast %cst_248 : f32 to vector<16x1xf32>
    %728 = arith.subf %727, %726 : vector<16x1xf32>
    %729 = arith.mulf %725, %728 : vector<16x1xf32>
    %730 = vector.broadcast %729 : vector<16x1xf32> to vector<16x16xf32>
    %731 = arith.mulf %722, %730 : vector<16x16xf32>
    %732 = vector.extract_strided_slice %626 {offsets = [0, 64], sizes = [16, 32], strides = [1, 1]} : vector<16x128xf32> to vector<16x32xf32>
    %cst_249 = arith.constant dense<0.000000e+00> : vector<16x32xf32>
    %733 = tpu.matmul %731, %732, %cst_249 {dimension_numbers = #tpu.dot_dimension_numbers<[1], [0], [0], [1], [0, 0, 1, 1], [], []>} : vector<16x16xf32>, vector<16x32xf32>, vector<16x32xf32> -> vector<16x32xf32>
    %734 = arith.truncf %733 : vector<16x32xf32> to vector<16x32xbf16>
    %c64 = arith.constant 64 : index
    %c384_250 = arith.constant 384 : index
    %735 = vector.load %arg2[%c64, %c384_250] : memref<128x512xbf16, #tpu.memory_space<vmem>>, vector<32x128xbf16>
    %cst_251 = arith.constant dense<0.000000e+00> : vector<16x128xf32>
    %736 = tpu.matmul %734, %735, %cst_251 {dimension_numbers = #tpu.dot_dimension_numbers<[1], [0], [0], [1], [0, 0, 1, 1], [], []>} : vector<16x32xbf16>, vector<32x128xbf16>, vector<16x128xf32> -> vector<16x128xf32>
    %737 = arith.addf %713, %736 : vector<16x128xf32>
    %738 = vector.extract_strided_slice %624 {offsets = [0, 96], sizes = [16, 32], strides = [1, 1]} : vector<16x128xf32> to vector<16x32xf32>
    %739 = vector.extract_strided_slice %625 {offsets = [0, 96], sizes = [16, 32], strides = [1, 1]} : vector<16x128xf32> to vector<16x32xf32>
    %cst_252 = arith.constant dense<0.000000e+00> : vector<16x16xf32>
    %740 = tpu.matmul %738, %739, %cst_252 {dimension_numbers = #tpu.dot_dimension_numbers<[1], [1], [0], [0], [0, 0, 1, 0], [], []>} : vector<16x32xf32>, vector<16x32xf32>, vector<16x16xf32> -> vector<16x16xf32>
    %741 = arith.addf %740, %664 : vector<16x16xf32>
    %cst_253 = arith.constant dense<0xFF800000> : vector<16xf32>
    %742 = vector.multi_reduction <maximumf>, %741, %cst_253 [1] : vector<16x16xf32> to vector<16xf32>
    %743 = vector.shape_cast %742 : vector<16xf32> to vector<16x1xf32>
    %744 = vector.broadcast %743 : vector<16x1xf32> to vector<16x16xf32>
    %745 = arith.subf %741, %744 : vector<16x16xf32>
    %746 = math.exp %745 : vector<16x16xf32>
    %cst_254 = arith.constant dense<0.000000e+00> : vector<16xf32>
    %747 = vector.multi_reduction <add>, %746, %cst_254 [1] : vector<16x16xf32> to vector<16xf32>
    %748 = vector.shape_cast %747 : vector<16xf32> to vector<16x1xf32>
    %749 = tpu.reciprocal %748 {approx = true} : vector<16x1xf32> -> vector<16x1xf32>
    %750 = arith.mulf %748, %749 : vector<16x1xf32>
    %cst_255 = arith.constant 2.000000e+00 : f32
    %751 = vector.broadcast %cst_255 : f32 to vector<16x1xf32>
    %752 = arith.subf %751, %750 : vector<16x1xf32>
    %753 = arith.mulf %749, %752 : vector<16x1xf32>
    %754 = vector.broadcast %753 : vector<16x1xf32> to vector<16x16xf32>
    %755 = arith.mulf %746, %754 : vector<16x16xf32>
    %756 = vector.extract_strided_slice %626 {offsets = [0, 96], sizes = [16, 32], strides = [1, 1]} : vector<16x128xf32> to vector<16x32xf32>
    %cst_256 = arith.constant dense<0.000000e+00> : vector<16x32xf32>
    %757 = tpu.matmul %755, %756, %cst_256 {dimension_numbers = #tpu.dot_dimension_numbers<[1], [0], [0], [1], [0, 0, 1, 1], [], []>} : vector<16x16xf32>, vector<16x32xf32>, vector<16x32xf32> -> vector<16x32xf32>
    %758 = arith.truncf %757 : vector<16x32xf32> to vector<16x32xbf16>
    %c96 = arith.constant 96 : index
    %c384_257 = arith.constant 384 : index
    %759 = vector.load %arg2[%c96, %c384_257] : memref<128x512xbf16, #tpu.memory_space<vmem>>, vector<32x128xbf16>
    %cst_258 = arith.constant dense<0.000000e+00> : vector<16x128xf32>
    %760 = tpu.matmul %758, %759, %cst_258 {dimension_numbers = #tpu.dot_dimension_numbers<[1], [0], [0], [1], [0, 0, 1, 1], [], []>} : vector<16x32xbf16>, vector<32x128xbf16>, vector<16x128xf32> -> vector<16x128xf32>
    %761 = arith.addf %737, %760 : vector<16x128xf32>
    %c3_259 = arith.constant 3 : index
    %c384_260 = arith.constant 384 : index
    %762 = vector.load %arg4[%c3_259, %c384_260] : memref<5x512xf32, #tpu.memory_space<vmem>>, vector<1x128xf32>
    %763 = vector.broadcast %762 : vector<1x128xf32> to vector<16x128xf32>
    %764 = arith.addf %761, %763 : vector<16x128xf32>
    %c2_261 = arith.constant 2 : index
    %c256 = arith.constant 256 : index
    %765 = vector.load %arg4[%c2_261, %c256] : memref<5x512xf32, #tpu.memory_space<vmem>>, vector<1x128xf32>
    %c2_262 = arith.constant 2 : index
    %c384_263 = arith.constant 384 : index
    %766 = vector.load %arg4[%c2_262, %c384_263] : memref<5x512xf32, #tpu.memory_space<vmem>>, vector<1x128xf32>
    %767 = arith.addf %615, %764 : vector<16x128xf32>
    %cst_264 = arith.constant dense<0.000000e+00> : vector<16xf32>
    %768 = vector.multi_reduction <add>, %767, %cst_264 [1] : vector<16x128xf32> to vector<16xf32>
    %769 = vector.shape_cast %768 : vector<16xf32> to vector<16x1xf32>
    %cst_265 = arith.constant 1.280000e+02 : f32
    %770 = vector.broadcast %cst_265 : f32 to vector<16x1xf32>
    %771 = arith.divf %769, %770 : vector<16x1xf32>
    %772 = vector.broadcast %771 : vector<16x1xf32> to vector<16x128xf32>
    %773 = arith.subf %767, %772 : vector<16x128xf32>
    %774 = arith.mulf %773, %773 : vector<16x128xf32>
    %cst_266 = arith.constant dense<0.000000e+00> : vector<16xf32>
    %775 = vector.multi_reduction <add>, %774, %cst_266 [1] : vector<16x128xf32> to vector<16xf32>
    %776 = vector.shape_cast %775 : vector<16xf32> to vector<16x1xf32>
    %cst_267 = arith.constant 1.280000e+02 : f32
    %777 = vector.broadcast %cst_267 : f32 to vector<16x1xf32>
    %778 = arith.divf %776, %777 : vector<16x1xf32>
    %779 = vector.broadcast %771 : vector<16x1xf32> to vector<16x128xf32>
    %780 = arith.subf %767, %779 : vector<16x128xf32>
    %cst_268 = arith.constant 9.99999974E-6 : f32
    %781 = vector.broadcast %cst_268 : f32 to vector<16x1xf32>
    %782 = arith.addf %778, %781 : vector<16x1xf32>
    %783 = math.rsqrt %782 : vector<16x1xf32>
    %784 = vector.broadcast %783 : vector<16x1xf32> to vector<16x128xf32>
    %785 = arith.mulf %780, %784 : vector<16x128xf32>
    %786 = vector.broadcast %765 : vector<1x128xf32> to vector<16x128xf32>
    %787 = arith.mulf %785, %786 : vector<16x128xf32>
    %788 = vector.broadcast %766 : vector<1x128xf32> to vector<16x128xf32>
    %789 = arith.addf %787, %788 : vector<16x128xf32>
    %790 = vector.extract_strided_slice %789 {offsets = [14, 0], sizes = [2, 128], strides = [1, 1]} : vector<16x128xf32> to vector<2x128xf32>
    %791 = arith.truncf %790 : vector<2x128xf32> to vector<2x128xbf16>
    %c0_269 = arith.constant 0 : index
    %c0_270 = arith.constant 0 : index
    %792 = vector.load %arg3[%c0_269, %c0_270] : memref<224x64xbf16, #tpu.memory_space<vmem>>, vector<128x64xbf16>
    %cst_271 = arith.constant dense<0.000000e+00> : vector<2x64xf32>
    %793 = tpu.matmul %791, %792, %cst_271 {dimension_numbers = #tpu.dot_dimension_numbers<[1], [0], [0], [1], [0, 0, 1, 1], [], []>} : vector<2x128xbf16>, vector<128x64xbf16>, vector<2x64xf32> -> vector<2x64xf32>
    %c4_272 = arith.constant 4 : index
    %c0_273 = arith.constant 0 : index
    %794 = vector.load %arg4[%c4_272, %c0_273] : memref<5x512xf32, #tpu.memory_space<vmem>>, vector<1x64xf32>
    %795 = vector.broadcast %794 : vector<1x64xf32> to vector<2x64xf32>
    %796 = arith.addf %793, %795 : vector<2x64xf32>
    %cst_274 = arith.constant 0.000000e+00 : f32
    %797 = vector.broadcast %cst_274 : f32 to vector<2x64xf32>
    %798 = arith.maximumf %796, %797 : vector<2x64xf32>
    %799 = arith.truncf %798 : vector<2x64xf32> to vector<2x64xbf16>
    %c128_275 = arith.constant 128 : index
    %c0_276 = arith.constant 0 : index
    %800 = vector.load %arg3[%c128_275, %c0_276] : memref<224x64xbf16, #tpu.memory_space<vmem>>, vector<64x32xbf16>
    %cst_277 = arith.constant dense<0.000000e+00> : vector<2x32xf32>
    %801 = tpu.matmul %799, %800, %cst_277 {dimension_numbers = #tpu.dot_dimension_numbers<[1], [0], [0], [1], [0, 0, 1, 1], [], []>} : vector<2x64xbf16>, vector<64x32xbf16>, vector<2x32xf32> -> vector<2x32xf32>
    %c4_278 = arith.constant 4 : index
    %c128_279 = arith.constant 128 : index
    %802 = vector.load %arg4[%c4_278, %c128_279] : memref<5x512xf32, #tpu.memory_space<vmem>>, vector<1x32xf32>
    %803 = vector.broadcast %802 : vector<1x32xf32> to vector<2x32xf32>
    %804 = arith.addf %801, %803 : vector<2x32xf32>
    %cst_280 = arith.constant 0.000000e+00 : f32
    %805 = vector.broadcast %cst_280 : f32 to vector<2x32xf32>
    %806 = arith.maximumf %804, %805 : vector<2x32xf32>
    %807 = arith.truncf %806 : vector<2x32xf32> to vector<2x32xbf16>
    %c192 = arith.constant 192 : index
    %c0_281 = arith.constant 0 : index
    %808 = vector.load %arg3[%c192, %c0_281] : memref<224x64xbf16, #tpu.memory_space<vmem>>, vector<32x1xbf16>
    %cst_282 = arith.constant dense<0.000000e+00> : vector<2x1xf32>
    %809 = tpu.matmul %807, %808, %cst_282 {dimension_numbers = #tpu.dot_dimension_numbers<[1], [0], [0], [1], [0, 0, 1, 1], [], []>} : vector<2x32xbf16>, vector<32x1xbf16>, vector<2x1xf32> -> vector<2x1xf32>
    %c4_283 = arith.constant 4 : index
    %c256_284 = arith.constant 256 : index
    %810 = vector.load %arg4[%c4_283, %c256_284] : memref<5x512xf32, #tpu.memory_space<vmem>>, vector<1x1xf32>
    %811 = vector.broadcast %810 : vector<1x1xf32> to vector<2x1xf32>
    %812 = arith.addf %809, %811 : vector<2x1xf32>
    %c0_285 = arith.constant 0 : index
    %c0_286 = arith.constant 0 : index
    %813 = vector.load %arg5[%c0_285, %c0_286] : memref<2x1xf32, #tpu.memory_space<vmem>>, vector<2x1xf32>
    tpu.vector_store %arg5[%c0_285, %c0_286], %812 {strides = array<i32>} : memref<2x1xf32, #tpu.memory_space<vmem>>, vector<2x1xf32>,
    return
  }
}

</mosaic_0001>

<bundles_post_ra>
// kernel: price_lstm_forward.1
= control target key start
LH: loop header
LB: loop body
LE: loop exit
PB: predicated region body
PF: predicated region fallthrough
CT: control target
= control target key end

     0   :  { %10 = vsyncpa [#allocation4], 0  ;;  %s11595_s0 = inlined_call_operand.vmem [shape: f32[16,16], index: 0, kind: input, shape index: {}]   ;;  %s11596_s1 = inlined_call_operand.hbm [shape: bf16[400,512], index: 1, kind: input, shape index: {}]   ;;  %s11597_s2 = inlined_call_operand.hbm [shape: bf16[128,512], index: 2, kind: input, shape index: {}]   ;;  %s11598_s3 = inlined_call_operand.vmem [shape: bf16[224,64], index: 3, kind: input, shape index: {}]   ;;  %s11599_s4 = inlined_call_operand.vmem [shape: f32[5,512], index: 4, kind: input, shape index: {}]   ;;  %s11600_s5 = inlined_call_operand.vmem [shape: f32[2,1], index: 5, kind: output, shape index: {}]  }
   0x1   :  { %11 = vsyncpa [#allocation6], 0  ;;  %s9754_s18 = smov [#allocation3]  }
   0x2   :  { %s19_s19 = sshll.u32 %s9754_s18, 4  ;;  %s20_s19 = int_to_ptr.vmem [resolvable:$true] %s19_s19 }
   0x3   :  { %s9718_s20 = scalar_lea.vmem %s20_s19, 12800  ;;  %p9723_p1 = scmp.lt.s32.totalorder %s20_s19, %s20_s19 }
   0x4   :  { %p9719_p0 = scmp.ne.s32.totalorder %s20_s19, %s9718_s20  ;;  %p9724_p2 = scmp.lt.s32.totalorder %s9718_s20, %s9718_s20 }
   0x6   :  { %p9725_p3 = por %p9724_p2, %p9723_p1 }
   0x8   :  { %p9726_p4 = pnand %p9725_p3, %p9719_p0 }
   0xa   :  { %9729 = shalt.err (!%p9726_p4)
}
   0xb   :  { %s9755_s21 = smov 256   ;;  %s9756_s22 = smov 16  }
   0xc   :  { %25 = dma.hbm_to_vmem [thread:$0]  %s11596_s1, 12800, %s20_s19, [#allocation4], %s9755_s21, %s9755_s21, %s9756_s22  }
   0xd   :  { %s9757_s25 = smov [#allocation5]  }
   0xe   :  { %s31_s26 = sshll.u32 %s9757_s25, 4  ;;  %s32_s26 = int_to_ptr.vmem [resolvable:$true] %s31_s26 }
   0xf   :  { %s9738_s27 = scalar_lea.vmem %s32_s26, 4096  ;;  %p9743_p6 = scmp.lt.s32.totalorder %s32_s26, %s32_s26 }
  0x10   :  { %p9739_p5 = scmp.ne.s32.totalorder %s32_s26, %s9738_s27  ;;  %p9744_p7 = scmp.lt.s32.totalorder %s9738_s27, %s9738_s27 }
  0x12   :  { %p9745_p8 = por %p9744_p7, %p9743_p6 }
  0x14   :  { %p9746_p9 = pnand %p9745_p8, %p9739_p5 }
  0x16   :  { %9749 = shalt.err (!%p9746_p9)
}
  0x17   :  { %37 = dma.hbm_to_vmem [thread:$0]  %s11597_s2, 4096, %s32_s26, [#allocation6], %s9755_s21, %s9755_s21, %s9756_s22  }
  0x18   :  { %9750 = dma.done.wait [#allocation4], 12800  }
  0x19   :  { %9751 = vsyncadd [#allocation4], 4294954496 }
  0x1a   :  { %9752 = dma.done.wait [#allocation6], 4096  }
  0x1b   :  { %9753 = vsyncadd [#allocation6], 4294963200  ;;  %v11603_v0 = vmov 0   ;;  %v8876_v1 = vld [vmem:[#allocation3 + $0x4] ss:$16 sps:$4 sm:$0xff]   ;;  %v50_v6 = vld [vmem:[%s11595_s0 + $0x8] sm:$0xff]  ;;  %v11601_v42 = vlaneseq }
  0x1c   :  { %134 = vmatprep.mubr.bf16.mxu0 %v11603_v0  ;;  %177 = vmatprep.mubr.bf16.mxu1 %v11603_v0  ;;  %v8878_v2 = vld [vmem:[#allocation3] ss:$16 sps:$4 sm:$0xff]   ;;  %v8879_v3 = vld [vmem:[#allocation3 + $0xc] ss:$16 sps:$4 sm:$0xff]   ;;  %v8881_v4 = vld [vmem:[#allocation3 + $0x8] ss:$16 sps:$4 sm:$0xff]  }
  0x1d   :  { %116 = vmatprep.subr.bf16.mxu0 %v8876_v1  ;;  %v49_v5 = vld [vmem:[%s11595_s0] sm:$0xff]  ;;  %vm98_vm0 = vcmask 130048   ;;  %159 = vmatprep.subr.bf16.mxu1 %v8879_v3  ;;  %v9815_v9 = vld [vmem:[#allocation3 + $0x10c] ss:$16 sps:$4 sm:$0xff]   ;;  %v9819_v11 = vld [vmem:[#allocation3 + $0x108] ss:$16 sps:$4 sm:$0xff]  }
  0x1e   :  { %117 = vmatpush1.bf16.msra.mxu0 %v8878_v2  ;;  %v51_v7 = vpack.c.bf16 %v50_v6, %v49_v5  ;;  %160 = vmatpush1.bf16.msra.mxu1 %v8881_v4  ;;  %v9813_v8 = vld [vmem:[#allocation3 + $0x104] ss:$16 sps:$4 sm:$0xff]   ;;  %v9817_v10 = vld [vmem:[#allocation3 + $0x100] ss:$16 sps:$4 sm:$0xff]   ;;  %v9827_v13 = vld [vmem:[#allocation3 + $0xec] ss:$16 sps:$4 sm:$0xff]  }
  0x1f   :  { %422 = vmatprep.subr.bf16.mxu0 %v9813_v8  ;;  %463 = vmatprep.subr.bf16.mxu1 %v9815_v9  ;;  %v9825_v12 = vld [vmem:[#allocation3 + $0xe4] ss:$16 sps:$4 sm:$0xff]   ;;  %v9829_v14 = vld [vmem:[#allocation3 + $0xe0] ss:$16 sps:$4 sm:$0xff]   ;;  %v9831_v15 = vld [vmem:[#allocation3 + $0xe8] ss:$16 sps:$4 sm:$0xff]  }
  0x20   :  { %v9837_v16 = vld [vmem:[#allocation3 + $0xc4] ss:$16 sps:$4 sm:$0xff]   ;;  %v9839_v17 = vld [vmem:[#allocation3 + $0xcc] ss:$16 sps:$4 sm:$0xff]   ;;  %v9841_v18 = vld [vmem:[#allocation3 + $0xc0] ss:$16 sps:$4 sm:$0xff]  }
  0x21   :  { %7863 = vmatmul.mubr.msk.bf16.vlgmr.msra.gmra.mxu0 %vm98_vm0, %v51_v7  ;;  %7864 = vmatmul.mubr.msk.bf16.vlgmr.msra.gmra.mxu1 %vm98_vm0, %v51_v7  ;;  %v9843_v19 = vld [vmem:[#allocation3 + $0xc8] ss:$16 sps:$4 sm:$0xff]   ;;  %v9849_v20 = vld [vmem:[#allocation3 + $0xa4] ss:$16 sps:$4 sm:$0xff]   ;;  %v9851_v21 = vld [vmem:[#allocation3 + $0xac] ss:$16 sps:$4 sm:$0xff]  }
  0x22   :  { %454 = vmatprep.mubr.bf16.mxu0 %v11603_v0  ;;  %495 = vmatprep.mubr.bf16.mxu1 %v11603_v0  ;;  %v9853_v22 = vld [vmem:[#allocation3 + $0xa0] ss:$16 sps:$4 sm:$0xff]   ;;  %v9856_v23 = vld [vmem:[#allocation3 + $0xa8] ss:$16 sps:$4 sm:$0xff]   ;;  %v9858_v24 = vld [vmem:[#allocation3 + $0x84] ss:$16 sps:$4 sm:$0xff]  }
  0x23   :  { %423 = vmatpush1.bf16.msra.mxu0 %v9817_v10  ;;  %464 = vmatpush1.bf16.msra.mxu1 %v9819_v11  ;;  %v9862_v25 = vld [vmem:[#allocation3 + $0x80] ss:$16 sps:$4 sm:$0xff]   ;;  %v9864_v26 = vld [vmem:[#allocation3 + $0x8c] ss:$16 sps:$4 sm:$0xff]   ;;  %v9868_v27 = vld [vmem:[#allocation3 + $0x88] ss:$16 sps:$4 sm:$0xff]  }
  0x24   :  { %424 = vmatprep.subr.bf16.mxu0 %v9825_v12  ;;  %465 = vmatprep.subr.bf16.mxu1 %v9827_v13  ;;  %v9870_v28 = vld [vmem:[#allocation3 + $0x64] ss:$16 sps:$4 sm:$0xff]   ;;  %v9873_v29 = vld [vmem:[#allocation3 + $0x6c] ss:$16 sps:$4 sm:$0xff]   ;;  %v9876_v30 = vld [vmem:[#allocation3 + $0x60] ss:$16 sps:$4 sm:$0xff]  }
  0x25   :  { %v9880_v31 = vld [vmem:[#allocation3 + $0x68] ss:$16 sps:$4 sm:$0xff]   ;;  %v9882_v32 = vld [vmem:[#allocation3 + $0x44] ss:$16 sps:$4 sm:$0xff]   ;;  %v9884_v33 = vld [vmem:[#allocation3 + $0x4c] ss:$16 sps:$4 sm:$0xff]  }
  0x26   :  { %v9887_v34 = vld [vmem:[#allocation3 + $0x40] ss:$16 sps:$4 sm:$0xff]   ;;  %v9889_v35 = vld [vmem:[#allocation3 + $0x48] ss:$16 sps:$4 sm:$0xff]   ;;  %v9891_v36 = vld [vmem:[#allocation3 + $0x24] ss:$16 sps:$4 sm:$0xff]  }
  0x27   :  { %425 = vmatpush1.bf16.msra.mxu0 %v9829_v14  ;;  %466 = vmatpush1.bf16.msra.mxu1 %v9831_v15  ;;  %v9894_v37 = vld [vmem:[#allocation3 + $0x2c] ss:$16 sps:$4 sm:$0xff]   ;;  %v9899_v38 = vld [vmem:[#allocation3 + $0x20] ss:$16 sps:$4 sm:$0xff]   ;;  %v9901_v39 = vld [vmem:[#allocation3 + $0x28] ss:$16 sps:$4 sm:$0xff]  }
  0x28   :  { %426 = vmatprep.subr.bf16.mxu0 %v9837_v16  ;;  %467 = vmatprep.subr.bf16.mxu1 %v9839_v17  ;;  %v9903_v40 = vld [vmem:[#allocation3 + $0x204] ss:$16 sps:$4 sm:$0xff]   ;;  %v9906_v41 = vld [vmem:[#allocation3 + $0x20c] ss:$16 sps:$4 sm:$0xff]   ;;  %v9916_v43 = vshrl.u32 %v11601_v42, 7  ;;  %vm9760_vm1 = vmmov 0  }
  0x29   :  { %v56_v45 = vld [vmem:[%s11599_s4] ss:$8 sm:$0xf]  ;;  %vm6524_vm2 = vcmask 261120   ;;  %s9761_s16 = smov 96   ;;  %s9763_s17 = smov 64  }
  0x2a   :  { %11753 = vst [vmem:[#allocation9_spill] sm:$0xff] %v9916_v43  ;;  %v9919_v44 = vsub.s32 0, %v9916_v43  ;;  %v9925_v46 = vsub.s32 1, %v9916_v43  ;;  %v9929_v48 = vsub.s32 2, %v9916_v43  ;;  %v11602_v58 = vsub.s32 3, %v9916_v43  ;;  %s9764_s18 = smov 32  }
  0x2b   :  { %427 = vmatpush1.bf16.msra.mxu0 %v9841_v18  ;;  %468 = vmatpush1.bf16.msra.mxu1 %v9843_v19  ;;  %vm7745_vm5 = vcmask 523264   ;;  %vm7851_vm6 = vcmask 1024  }
  0x2c   :  { %428 = vmatprep.subr.bf16.mxu0 %v9849_v20  ;;  %469 = vmatprep.subr.bf16.mxu1 %v9851_v21  ;;  %11754 = vst [vmem:[#allocation10_spill] sm:$0xff] %v9919_v44  ;;  %11755 = vst [vmem:[#allocation11_spill] sm:$0xff] %v9925_v46  ;;  %v61_v47 = vrot.slane %v56_v45, %v9919_v44  ;;  %v9932_v49 = vrot.slane %v56_v45, %v9925_v46 }
  0x2d   :  { %11756 = vst [vmem:[#allocation12_spill] sm:$0xff] %v9929_v48  ;;  %v69_v52 = vrot.slane %v56_v45, %v9929_v48  ;;  %v9952_v2 = vrot.slane %v56_v45, %v11602_v58  ;;  %v9961_v58 = vld [vmem:[#allocation3 + $0x200] ss:$16 sps:$4 sm:$0xff]  }
  0x2e   :  { %11757 = vst [vmem:[#allocation13_spill] sm:$0xff] %v9932_v49 }
  0x2f   :  { %429 = vmatpush1.bf16.msra.mxu0 %v9853_v22  ;;  %470 = vmatpush1.bf16.msra.mxu1 %v9856_v23  ;;  %11760 = vst [vmem:[#allocation16_spill] sm:$0xff] %v9952_v2 }
  0x30   :  { %430 = vmatprep.subr.bf16.mxu0 %v9858_v24  ;;  %471 = vmatprep.subr.bf16.mxu1 %v9864_v26 }
  0x33   :  { %431 = vmatpush1.bf16.msra.mxu0 %v9862_v25  ;;  %472 = vmatpush1.bf16.msra.mxu1 %v9868_v27 }
  0x34   :  { %432 = vmatprep.subr.bf16.mxu0 %v9870_v28  ;;  %473 = vmatprep.subr.bf16.mxu1 %v9873_v29 }
  0x37   :  { %433 = vmatpush1.bf16.msra.mxu0 %v9876_v30  ;;  %474 = vmatpush1.bf16.msra.mxu1 %v9880_v31 }
  0x38   :  { %434 = vmatprep.subr.bf16.mxu0 %v9882_v32  ;;  %475 = vmatprep.subr.bf16.mxu1 %v9884_v33 }
  0x3b   :  { %435 = vmatpush1.bf16.msra.mxu0 %v9887_v34  ;;  %476 = vmatpush1.bf16.msra.mxu1 %v9889_v35 }
  0x3c   :  { %436 = vmatprep.subr.bf16.mxu0 %v9891_v36  ;;  %477 = vmatprep.subr.bf16.mxu1 %v9894_v37 }
  0x3f   :  { %437 = vmatpush1.bf16.msra.mxu0 %v9899_v38  ;;  %478 = vmatpush1.bf16.msra.mxu1 %v9901_v39 }
  0x40   :  { %733 = vmatprep.subr.bf16.mxu0 %v9903_v40  ;;  %774 = vmatprep.subr.bf16.mxu1 %v9906_v41 }
  0xe1   :  { %v136_v50 = vpop.f32.mrf.mxu0  ;;  %v179_v54 = vpop.f32.mrf.mxu1 }
  0xe2   :  { %v9934_v51 = vadd.f32 %v136_v50, %v61_v47  ;;  %v9943_v61 = vadd.f32 %v179_v54, %v69_v52 }
  0xe3   :  { %v138_v53 = vpop.f32.mrf.mxu0  ;;  %v181_v59 = vpop.f32.mrf.mxu1 }
  0xe4   :  { %v211_v55 = vmul.f32 0.5, %v9934_v51  ;;  %v9939_v56 = vadd.f32 %v138_v53, %v9932_v49  ;;  %v9955_v3 = vadd.f32 %v181_v59, %v9952_v2  ;;  %v10013_v2 = vld [vmem:[#allocation3 + $0x180] ss:$16 sps:$4 sm:$0xff]   ;;  %v10021_v49 = vld [vmem:[#allocation3 + $0x16c] ss:$16 sps:$4 sm:$0xff]  }
  0xe5   :  { %v140_v57 = vpop.f32.mrf.mxu0  ;;  %v183_v63 = vpop.f32.mrf.mxu1  ;;  %11766 = vst [vmem:[#allocation22_spill] sm:$0xff] %v10013_v2  ;;  %11769 = vst [vmem:[#allocation25_spill] sm:$0xff] %v10021_v49 }
  0xe6   :  { %9512 = vtanh.f32 %v211_v55  ;;  %v215_v60 = vmul.f32 0.5, %v9939_v56  ;;  %v9945_v62 = vadd.f32 %v140_v57, %v61_v47  ;;  %v9947_v1 = vadd.f32 %v183_v63, %v69_v52 }
  0xe7   :  { %v220_v4 = vmul.f32 0.5, %v9955_v3 }
  0xe8   :  { %11758 = vst [vmem:[#allocation14_spill] sm:$0xff] %v9945_v62  ;;  %9514 = vtanh.f32 %v215_v60  ;;  %11759 = vst [vmem:[#allocation15_spill] sm:$0xff] %v9947_v1  ;;  %v10015_v1 = vld [vmem:[#allocation3 + $0x188] ss:$16 sps:$4 sm:$0xff]   ;;  %v10019_v62 = vld [vmem:[#allocation3 + $0x164] ss:$16 sps:$4 sm:$0xff]  }
  0xe9   :  { %9516 = vtanh.f32 %v9943_v61  ;;  %11767 = vst [vmem:[#allocation23_spill] sm:$0xff] %v10015_v1  ;;  %11768 = vst [vmem:[#allocation24_spill] sm:$0xff] %v10019_v62 }
  0xea   :  { %9518 = vtanh.f32 %v220_v4  ;;  %v9967_v4 = vld [vmem:[#allocation3 + $0x1e4] ss:$16 sps:$4 sm:$0xff]  }
  0xf3   :  { %v9513_v5 = vpop.eup %9512 }
  0xf4   :  { %v213_v6 = vadd.f32 1.0, %v9513_v5  ;;  %v9963_v5 = vld [vmem:[#allocation3 + $0x208] ss:$16 sps:$4 sm:$0xff]  }
  0xf5   :  { %v9515_v7 = vpop.eup %9514 }
  0xf6   :  { %v214_v47 = vmul.f32 0.5, %v213_v6  ;;  %v217_v50 = vadd.f32 1.0, %v9515_v7  ;;  %v9517_v53 = vpop.eup %9516  ;;  %v9969_v7 = vld [vmem:[#allocation3 + $0x1ec] ss:$16 sps:$4 sm:$0xff]  }
  0xf7   :  { %v9519_v45 = vpop.eup %9518 }
  0xf8   :  { %v218_v52 = vmul.f32 0.5, %v217_v50  ;;  %v225_v55 = vmul.f32 %v9517_v53, %v214_v47  ;;  %v222_v60 = vadd.f32 1.0, %v9519_v45  ;;  %v9975_v47 = vld [vmem:[#allocation3 + $0x1e0] ss:$16 sps:$4 sm:$0xff]   ;;  %v9977_v50 = vld [vmem:[#allocation3 + $0x1e8] ss:$16 sps:$4 sm:$0xff]  }
  0xf9   :  { %v9983_v53 = vld [vmem:[#allocation3 + $0x1cc] ss:$16 sps:$4 sm:$0xff]  }
  0xfa   :  { %v224_v54 = vmul.f32 0.0, %v218_v52  ;;  %v223_v59 = vmul.f32 0.5, %v222_v60  ;;  %v9989_v52 = vld [vmem:[#allocation3 + $0x1c0] ss:$16 sps:$4 sm:$0xff]   ;;  %v9997_v45 = vld [vmem:[#allocation3 + $0x1ac] ss:$16 sps:$4 sm:$0xff]  }
  0xfb   :  { %11761 = vst [vmem:[#allocation17_spill] sm:$0xff] %v9997_v45  ;;  %v10001_v60 = vld [vmem:[#allocation3 + $0x1a0] ss:$16 sps:$4 sm:$0xff]  }
  0xfc   :  { %v9958_v57 = vadd.f32 %v225_v55, %v224_v54  ;;  %v9991_v54 = vld [vmem:[#allocation3 + $0x1c8] ss:$16 sps:$4 sm:$0xff]   ;;  %v9995_v55 = vld [vmem:[#allocation3 + $0x1a4] ss:$16 sps:$4 sm:$0xff]   ;;  %11762 = vst [vmem:[#allocation18_spill] sm:$0xff] %v10001_v60 }
  0xfe   :  { %9520 = vtanh.f32 %v9958_v57 }
 0x10b   :  { %v9521_v63 = vpop.eup %9520 }
 0x10c   :  { %v228_v42 = vmul.f32 %v9521_v63, %v223_v59  ;;  %v10003_v59 = vld [vmem:[#allocation3 + $0x1a8] ss:$16 sps:$4 sm:$0xff]   ;;  %v10007_v63 = vld [vmem:[#allocation3 + $0x184] ss:$16 sps:$4 sm:$0xff]  }
 0x10d   :  { %11763 = vst [vmem:[#allocation19_spill] sm:$0xff] %v10003_v59  ;;  %11764 = vst [vmem:[#allocation20_spill] sm:$0xff] %v10007_v63 }
 0x10e   :  { %v9965_v6 = vpack.c.bf16 %v228_v42, %v228_v42  ;;  %v9981_v42 = vld [vmem:[#allocation3 + $0x1c4] ss:$16 sps:$4 sm:$0xff]  }
 0x110   :  { %455 = vmatmul.mubr.bf16.vlgmr.msra.gmra.mxu0 %v9965_v6  ;;  %496 = vmatmul.mubr.bf16.vlgmr.msra.gmra.mxu1 %v9965_v6 }
 0x111   :  { %734 = vmatpush1.bf16.msra.mxu0 %v9961_v58  ;;  %775 = vmatpush1.bf16.msra.mxu1 %v9963_v5 }
 0x112   :  { %735 = vmatprep.subr.bf16.mxu0 %v9967_v4  ;;  %776 = vmatprep.subr.bf16.mxu1 %v9969_v7 }
 0x113   :  { %765 = vmatprep.mubr.bf16.mxu0 %v11603_v0  ;;  %806 = vmatprep.mubr.bf16.mxu1 %v11603_v0  ;;  %v10009_v0 = vld [vmem:[#allocation3 + $0x18c] ss:$16 sps:$4 sm:$0xff]  }
 0x114   :  { %11765 = vst [vmem:[#allocation21_spill] sm:$0xff] %v10009_v0 }
 0x115   :  { %736 = vmatpush1.bf16.msra.mxu0 %v9975_v47  ;;  %777 = vmatpush1.bf16.msra.mxu1 %v9977_v50 }
 0x116   :  { %737 = vmatprep.subr.bf16.mxu0 %v9981_v42  ;;  %778 = vmatprep.subr.bf16.mxu1 %v9983_v53 }
 0x119   :  { %738 = vmatpush1.bf16.msra.mxu0 %v9989_v52  ;;  %779 = vmatpush1.bf16.msra.mxu1 %v9991_v54 }
 0x11a   :  { %739 = vmatprep.subr.bf16.mxu0 %v9995_v55  ;;  %780 = vmatprep.subr.bf16.mxu1 %v9997_v45  ;;  %v10025_v45 = vld [vmem:[#allocation3 + $0x160] ss:$16 sps:$4 sm:$0xff]  }
 0x11b   :  { %11770 = vst [vmem:[#allocation26_spill] sm:$0xff] %v10025_v45 }
 0x11d   :  { %740 = vmatpush1.bf16.msra.mxu0 %v10001_v60  ;;  %781 = vmatpush1.bf16.msra.mxu1 %v10003_v59  ;;  %v10027_v60 = vld [vmem:[#allocation3 + $0x168] ss:$16 sps:$4 sm:$0xff]   ;;  %v10031_v59 = vld [vmem:[#allocation3 + $0x144] ss:$16 sps:$4 sm:$0xff]  }
 0x11e   :  { %741 = vmatprep.subr.bf16.mxu0 %v10007_v63  ;;  %782 = vmatprep.subr.bf16.mxu1 %v10009_v0  ;;  %v10033_v63 = vld [vmem:[#allocation3 + $0x14c] ss:$16 sps:$4 sm:$0xff]   ;;  %v10037_v0 = vld [vmem:[#allocation3 + $0x140] ss:$16 sps:$4 sm:$0xff]  }
 0x121   :  { %742 = vmatpush1.bf16.msra.mxu0 %v10013_v2  ;;  %783 = vmatpush1.bf16.msra.mxu1 %v10015_v1  ;;  %v10039_v2 = vld [vmem:[#allocation3 + $0x148] ss:$16 sps:$4 sm:$0xff]   ;;  %v10043_v1 = vld [vmem:[#allocation3 + $0x124] ss:$16 sps:$4 sm:$0xff]  }
 0x122   :  { %743 = vmatprep.subr.bf16.mxu0 %v10019_v62  ;;  %784 = vmatprep.subr.bf16.mxu1 %v10021_v49  ;;  %v10045_v62 = vld [vmem:[#allocation3 + $0x12c] ss:$16 sps:$4 sm:$0xff]   ;;  %v10049_v49 = vld [vmem:[#allocation3 + $0x120] ss:$16 sps:$4 sm:$0xff]  }
 0x123   :  { %11771 = vst [vmem:[#allocation27_spill] sm:$0xff] %v10045_v62 }
 0x125   :  { %744 = vmatpush1.bf16.msra.mxu0 %v10025_v45  ;;  %785 = vmatpush1.bf16.msra.mxu1 %v10027_v60  ;;  %v10051_v45 = vld [vmem:[#allocation3 + $0x128] ss:$16 sps:$4 sm:$0xff]  }
 0x126   :  { %745 = vmatprep.subr.bf16.mxu0 %v10031_v59  ;;  %786 = vmatprep.subr.bf16.mxu1 %v10033_v63 }
 0x129   :  { %746 = vmatpush1.bf16.msra.mxu0 %v10037_v0  ;;  %787 = vmatpush1.bf16.msra.mxu1 %v10039_v2 }
 0x12a   :  { %747 = vmatprep.subr.bf16.mxu0 %v10043_v1  ;;  %788 = vmatprep.subr.bf16.mxu1 %v10045_v62  ;;  %v11772_v62 = vmov 0  }
 0x12d   :  { %748 = vmatpush1.bf16.msra.mxu0 %v10049_v49  ;;  %789 = vmatpush1.bf16.msra.mxu1 %v10051_v45 }
 0x12e   :  { %1034 = vmatprep.subr.bf16.mxu0 %v9813_v8  ;;  %1075 = vmatprep.subr.bf16.mxu1 %v9815_v9  ;;  %v10095_v8 = vpop.f32.mrf.mxu0  ;;  %v10097_v9 = vpop.f32.mrf.mxu1 }
 0x12f   :  { %11773 = vst [vmem:[#allocation28_spill] sm:$0xff] %v10095_v8  ;;  %11774 = vst [vmem:[#allocation29_spill] sm:$0xff] %v10097_v9  ;;  %v10319_v9 = vld [vmem:[#allocation3 + $0x88] ss:$16 sps:$4 sm:$0xff]   ;;  %v10321_v8 = vld [vmem:[#allocation3 + $0x64] ss:$16 sps:$4 sm:$0xff]  }
 0x130   :  { %766 = vmatmul.mubr.bf16.vlgmr.msra.gmra.mxu0 %v9965_v6  ;;  %807 = vmatmul.mubr.bf16.vlgmr.msra.gmra.mxu1 %v9965_v6  ;;  %11805 = vst [vmem:[#allocation37_spill] sm:$0xff] %v10319_v9  ;;  %11806 = vst [vmem:[#allocation38_spill] sm:$0xff] %v10321_v8 }
 0x131   :  { %1035 = vmatpush1.bf16.msra.mxu0 %v9817_v10  ;;  %1076 = vmatpush1.bf16.msra.mxu1 %v9819_v11 }
 0x132   :  { %1036 = vmatprep.subr.bf16.mxu0 %v9825_v12  ;;  %1077 = vmatprep.subr.bf16.mxu1 %v9827_v13 }
 0x133   :  { %1066 = vmatprep.mubr.bf16.mxu0 %v11772_v62  ;;  %1107 = vmatprep.mubr.bf16.mxu1 %v11772_v62 }
 0x135   :  { %1037 = vmatpush1.bf16.msra.mxu0 %v9829_v14  ;;  %1078 = vmatpush1.bf16.msra.mxu1 %v9831_v15 }
 0x136   :  { %1038 = vmatprep.subr.bf16.mxu0 %v9837_v16  ;;  %1079 = vmatprep.subr.bf16.mxu1 %v9839_v17 }
 0x139   :  { %1039 = vmatpush1.bf16.msra.mxu0 %v9841_v18  ;;  %1080 = vmatpush1.bf16.msra.mxu1 %v9843_v19 }
 0x13a   :  { %1040 = vmatprep.subr.bf16.mxu0 %v9849_v20  ;;  %1081 = vmatprep.subr.bf16.mxu1 %v9851_v21 }
 0x13d   :  { %1041 = vmatpush1.bf16.msra.mxu0 %v9853_v22  ;;  %1082 = vmatpush1.bf16.msra.mxu1 %v9856_v23 }
 0x13e   :  { %1042 = vmatprep.subr.bf16.mxu0 %v9858_v24  ;;  %1083 = vmatprep.subr.bf16.mxu1 %v9864_v26 }
 0x141   :  { %1043 = vmatpush1.bf16.msra.mxu0 %v9862_v25  ;;  %1084 = vmatpush1.bf16.msra.mxu1 %v9868_v27 }
 0x142   :  { %1044 = vmatprep.subr.bf16.mxu0 %v9870_v28  ;;  %1085 = vmatprep.subr.bf16.mxu1 %v9873_v29 }
 0x145   :  { %1045 = vmatpush1.bf16.msra.mxu0 %v9876_v30  ;;  %1086 = vmatpush1.bf16.msra.mxu1 %v9880_v31 }
 0x146   :  { %1046 = vmatprep.subr.bf16.mxu0 %v9882_v32  ;;  %1087 = vmatprep.subr.bf16.mxu1 %v9884_v33 }
 0x149   :  { %1047 = vmatpush1.bf16.msra.mxu0 %v9887_v34  ;;  %1088 = vmatpush1.bf16.msra.mxu1 %v9889_v35  ;;  %v534_v35 = vrot.slane %v9958_v57, 6 }
 0x14a   :  { %1048 = vmatprep.subr.bf16.mxu0 %v9891_v36  ;;  %1089 = vmatprep.subr.bf16.mxu1 %v9894_v37  ;;  %v7865_v37 = vld [vmem:[%s11599_s4 + $0x1] ss:$8 sm:$0xf] }
 0x14b   :  { %v10113_v6 = vrot.slane %v7865_v37, %v9925_v46  ;;  %v10311_v46 = vld [vmem:[#allocation3 + $0x8c] ss:$16 sps:$4 sm:$0xff]  }
 0x14c   :  { %11803 = vst [vmem:[#allocation35_spill] sm:$0xff] %v10311_v46 }
 0x14d   :  { %1049 = vmatpush1.bf16.msra.mxu0 %v9899_v38  ;;  %1090 = vmatpush1.bf16.msra.mxu1 %v9901_v39  ;;  %11776 = vst [vmem:[#allocation31_spill] sm:$0xff] %v10113_v6 }
 0x14e   :  { %1544 = vmatprep.subr.bf16.mxu0 %v9903_v40  ;;  %1585 = vmatprep.subr.bf16.mxu1 %v9906_v41  ;;  %v10108_v40 = vrot.slane %v7865_v37, %v9919_v44  ;;  %v10315_v44 = vld [vmem:[#allocation3 + $0x80] ss:$16 sps:$4 sm:$0xff]  }
 0x14f   :  { %11804 = vst [vmem:[#allocation36_spill] sm:$0xff] %v10315_v44 }
 0x150   :  { %11775 = vst [vmem:[#allocation30_spill] sm:$0xff] %v10108_v40 }
 0x1d0   :  { %v456_v10 = vpop.f32.mrf.mxu0  ;;  %v497_v11 = vpop.f32.mrf.mxu1 }
 0x1d1   :  { %v508_v12 = vrot.slane %v456_v10, 6  ;;  %v510_v20 = vrot.slane %v497_v11, 6 }
 0x1d2   :  { %v458_v13 = vpop.f32.mrf.mxu0  ;;  %v499_v14 = vpop.f32.mrf.mxu1 }
 0x1d3   :  { %v516_v15 = vadd.f32 %v508_v12, %v9934_v51  ;;  %v509_v16 = vrot.slane %v458_v13, 6  ;;  %v518_v25 = vadd.f32 %v510_v20, %v9943_v61  ;;  %v511_v26 = vrot.slane %v499_v14, 6 }
 0x1d4   :  { %v460_v17 = vpop.f32.mrf.mxu0  ;;  %v501_v18 = vpop.f32.mrf.mxu1  ;;  %v10118_v14 = vrot.slane %v7865_v37, %v9929_v48  ;;  %v10308_v48 = vld [vmem:[#allocation3 + $0x84] ss:$16 sps:$4 sm:$0xff]  }
 0x1d5   :  { %v520_v19 = vmul.f32 0.5, %v516_v15  ;;  %v517_v21 = vadd.f32 %v509_v16, %v9939_v56  ;;  %v519_v27 = vadd.f32 %v511_v26, %v9955_v3  ;;  %11802 = vst [vmem:[#allocation34_spill] sm:$0xff] %v10308_v48 }
 0x1d6   :  { %v461_v22 = vpop.f32.mrf.mxu0  ;;  %v502_v23 = vpop.f32.mrf.mxu1 }
 0x1d7   :  { %9522 = vtanh.f32 %v520_v19  ;;  %v524_v24 = vmul.f32 0.5, %v517_v21  ;;  %v529_v28 = vmul.f32 0.5, %v519_v27 }
 0x1d9   :  { %9524 = vtanh.f32 %v524_v24 }
 0x1da   :  { %9526 = vtanh.f32 %v518_v25  ;;  %v11777_v25 = vsub.s32 3, %v9916_v43  ;;  %v10306_v43 = vld [vmem:[#allocation3 + $0xac] ss:$16 sps:$4 sm:$0xff]  }
 0x1db   :  { %9528 = vtanh.f32 %v529_v28  ;;  %11801 = vst [vmem:[#allocation33_spill] sm:$0xff] %v10306_v43 }
 0x1dc   :  { %v10124_v26 = vrot.slane %v7865_v37, %v11777_v25  ;;  %v10194_v25 = vld [vmem:[#allocation3 + $0x2c8] ss:$16 sps:$4 sm:$0xff]  }
 0x1de   :  { %11778 = vst [vmem:[#allocation32_spill] sm:$0xff] %v10124_v26 }
 0x1e4   :  { %v9523_v29 = vpop.eup %9522 }
 0x1e5   :  { %v522_v30 = vadd.f32 1.0, %v9523_v29 }
 0x1e6   :  { %v9525_v31 = vpop.eup %9524 }
 0x1e7   :  { %v523_v32 = vmul.f32 0.5, %v522_v30  ;;  %v526_v33 = vadd.f32 1.0, %v9525_v31  ;;  %v9527_v36 = vpop.eup %9526 }
 0x1e8   :  { %v9529_v17 = vpop.eup %9528 }
 0x1e9   :  { %v527_v34 = vmul.f32 0.5, %v526_v33  ;;  %v537_v39 = vmul.f32 %v9527_v36, %v523_v32  ;;  %v531_v23 = vadd.f32 1.0, %v9529_v17 }
 0x1eb   :  { %v536_v38 = vmul.f32 %v534_v35, %v527_v34  ;;  %v532_v27 = vmul.f32 0.5, %v531_v23  ;;  %v10188_v23 = vld [vmem:[#allocation3 + $0x2cc] ss:$16 sps:$4 sm:$0xff]  }
 0x1ed   :  { %v10110_v41 = vadd.f32 %v537_v39, %v536_v38 }
 0x1ef   :  { %9530 = vtanh.f32 %v10110_v41 }
 0x1f0   :  { %v767_v10 = vpop.f32.mrf.mxu0  ;;  %v808_v11 = vpop.f32.mrf.mxu1 }
 0x1f1   :  { %v815_v57 = vadd.f32 %v767_v10, %v10108_v40  ;;  %v817_v24 = vadd.f32 %v808_v11, %v10118_v14 }
 0x1f2   :  { %v769_v12 = vpop.f32.mrf.mxu0  ;;  %v810_v13 = vpop.f32.mrf.mxu1 }
 0x1f3   :  { %v819_v15 = vmul.f32 0.5, %v815_v57  ;;  %v816_v16 = vadd.f32 %v769_v12, %v10113_v6  ;;  %v818_v29 = vadd.f32 %v810_v13, %v10124_v26  ;;  %v11786_v12 = vld [vmem:[#allocation24_spill] sm:$0xff]  ;;  %v11787_v13 = vld [vmem:[#allocation25_spill] sm:$0xff] }
 0x1f4   :  { %v771_v18 = vpop.f32.mrf.mxu0  ;;  %v812_v19 = vpop.f32.mrf.mxu1 }
 0x1f5   :  { %9532 = vtanh.f32 %v819_v15  ;;  %v823_v20 = vmul.f32 0.5, %v816_v16  ;;  %v828_v32 = vmul.f32 0.5, %v818_v29  ;;  %v11789_v18 = vld [vmem:[#allocation27_spill] sm:$0xff] }
 0x1f6   :  { %v772_v21 = vpop.f32.mrf.mxu0  ;;  %v813_v22 = vpop.f32.mrf.mxu1  ;;  %v10162_v19 = vld [vmem:[#allocation3 + $0x304] ss:$16 sps:$4 sm:$0xff]   ;;  %v10204_v29 = vld [vmem:[#allocation3 + $0x2a0] ss:$16 sps:$4 sm:$0xff]  }
 0x1f7   :  { %9534 = vtanh.f32 %v823_v20  ;;  %v10186_v22 = vld [vmem:[#allocation3 + $0x2c4] ss:$16 sps:$4 sm:$0xff]  }
 0x1f8   :  { %9536 = vtanh.f32 %v817_v24  ;;  %v10192_v24 = vld [vmem:[#allocation3 + $0x2c0] ss:$16 sps:$4 sm:$0xff]  }
 0x1f9   :  { %9538 = vtanh.f32 %v828_v32  ;;  %v10212_v32 = vld [vmem:[#allocation3 + $0x28c] ss:$16 sps:$4 sm:$0xff]  }
 0x1fc   :  { %v9531_v28 = vpop.eup %9530 }
 0x1fd   :  { %v540_v30 = vmul.f32 %v9531_v28, %v532_v27  ;;  %v10198_v27 = vld [vmem:[#allocation3 + $0x2a4] ss:$16 sps:$4 sm:$0xff]   ;;  %v10200_v28 = vld [vmem:[#allocation3 + $0x2ac] ss:$16 sps:$4 sm:$0xff]  }
 0x1ff   :  { %v838_v31 = vpack.c.bf16 %v540_v30, %v540_v30  ;;  %v10206_v30 = vld [vmem:[#allocation3 + $0x2a8] ss:$16 sps:$4 sm:$0xff]  }
 0x201   :  { %v10127_v33 = vrot.slane %v838_v31, 1  ;;  %v10210_v31 = vld [vmem:[#allocation3 + $0x284] ss:$16 sps:$4 sm:$0xff]  }
 0x202   :  { %v9533_v34 = vpop.eup %9532 }
 0x203   :  { %v821_v35 = vadd.f32 1.0, %v9533_v34  ;;  %1067 = vmatmul.mubr.bf16.vlgmr.msra.gmra.mxu0 %v10127_v33  ;;  %1108 = vmatmul.mubr.bf16.vlgmr.msra.gmra.mxu1 %v10127_v33  ;;  %v10216_v34 = vld [vmem:[#allocation3 + $0x280] ss:$16 sps:$4 sm:$0xff]  }
 0x204   :  { %v9535_v36 = vpop.eup %9534  ;;  %1545 = vmatpush1.bf16.msra.mxu0 %v9961_v58  ;;  %1586 = vmatpush1.bf16.msra.mxu1 %v9963_v5  ;;  %v11779_v5 = vld [vmem:[#allocation17_spill] sm:$0xff] }
 0x205   :  { %v822_v37 = vmul.f32 0.5, %v821_v35  ;;  %v825_v38 = vadd.f32 1.0, %v9535_v36  ;;  %1546 = vmatprep.subr.bf16.mxu0 %v9967_v4  ;;  %1587 = vmatprep.subr.bf16.mxu1 %v9969_v7  ;;  %v9537_v10 = vpop.eup %9536  ;;  %v11780_v4 = vld [vmem:[#allocation18_spill] sm:$0xff]  ;;  %v11781_v7 = vld [vmem:[#allocation19_spill] sm:$0xff] }
 0x206   :  { %v10218_v35 = vld [vmem:[#allocation3 + $0x288] ss:$16 sps:$4 sm:$0xff]   ;;  %v10222_v36 = vld [vmem:[#allocation3 + $0x264] ss:$16 sps:$4 sm:$0xff]  }
 0x207   :  { %v826_v39 = vmul.f32 0.5, %v825_v38  ;;  %v833_v57 = vmul.f32 %v9537_v10, %v822_v37  ;;  %v10224_v37 = vld [vmem:[#allocation3 + $0x26c] ss:$16 sps:$4 sm:$0xff]   ;;  %v10228_v38 = vld [vmem:[#allocation3 + $0x260] ss:$16 sps:$4 sm:$0xff]  }
 0x208   :  { %1547 = vmatpush1.bf16.msra.mxu0 %v9975_v47  ;;  %1588 = vmatpush1.bf16.msra.mxu1 %v9977_v50  ;;  %v11782_v47 = vld [vmem:[#allocation20_spill] sm:$0xff]  ;;  %v11783_v50 = vld [vmem:[#allocation21_spill] sm:$0xff] }
 0x209   :  { %v832_v11 = vmul.f32 0.0, %v826_v39  ;;  %1548 = vmatprep.subr.bf16.mxu0 %v9981_v42  ;;  %1589 = vmatprep.subr.bf16.mxu1 %v9983_v53  ;;  %v9539_v42 = vpop.eup %9538  ;;  %v11784_v53 = vld [vmem:[#allocation22_spill] sm:$0xff]  ;;  %v10234_v10 = vld [vmem:[#allocation3 + $0x244] ss:$16 sps:$4 sm:$0xff]  }
 0x20a   :  { %v10230_v39 = vld [vmem:[#allocation3 + $0x268] ss:$16 sps:$4 sm:$0xff]  }
 0x20b   :  { %v10139_v58 = vadd.f32 %v833_v57, %v832_v11  ;;  %v10236_v11 = vld [vmem:[#allocation3 + $0x24c] ss:$16 sps:$4 sm:$0xff]   ;;  %v10240_v57 = vld [vmem:[#allocation3 + $0x240] ss:$16 sps:$4 sm:$0xff]  }
 0x20c   :  { %1549 = vmatpush1.bf16.msra.mxu0 %v9989_v52  ;;  %1590 = vmatpush1.bf16.msra.mxu1 %v9991_v54  ;;  %v11785_v52 = vld [vmem:[#allocation23_spill] sm:$0xff]  ;;  %v830_v54 = vadd.f32 1.0, %v9539_v42 }
 0x20d   :  { %9540 = vtanh.f32 %v10139_v58  ;;  %1550 = vmatprep.subr.bf16.mxu0 %v9995_v55  ;;  %1591 = vmatprep.subr.bf16.mxu1 %v11779_v5  ;;  %v11788_v55 = vld [vmem:[#allocation26_spill] sm:$0xff]  ;;  %v10264_v42 = vld [vmem:[#allocation3 + $0x104] ss:$16 sps:$4 sm:$0xff]  }
 0x20e   :  { %v831_v15 = vmul.f32 0.5, %v830_v54  ;;  %v10242_v5 = vld [vmem:[#allocation3 + $0x248] ss:$16 sps:$4 sm:$0xff]  }
 0x20f   :  { %v10270_v54 = vld [vmem:[#allocation3 + $0x108] ss:$16 sps:$4 sm:$0xff]  }
 0x210   :  { %1551 = vmatpush1.bf16.msra.mxu0 %v11780_v4  ;;  %1592 = vmatpush1.bf16.msra.mxu1 %v11781_v7  ;;  %v10246_v4 = vld [vmem:[#allocation3 + $0x224] ss:$16 sps:$4 sm:$0xff]   ;;  %v10248_v7 = vld [vmem:[#allocation3 + $0x22c] ss:$16 sps:$4 sm:$0xff]  }
 0x211   :  { %1552 = vmatprep.subr.bf16.mxu0 %v11782_v47  ;;  %1593 = vmatprep.subr.bf16.mxu1 %v11783_v50  ;;  %v10252_v47 = vld [vmem:[#allocation3 + $0x220] ss:$16 sps:$4 sm:$0xff]   ;;  %v10254_v50 = vld [vmem:[#allocation3 + $0x228] ss:$16 sps:$4 sm:$0xff]  }
 0x214   :  { %1553 = vmatpush1.bf16.msra.mxu0 %v11784_v53  ;;  %1594 = vmatpush1.bf16.msra.mxu1 %v11785_v52  ;;  %v10266_v53 = vld [vmem:[#allocation3 + $0x10c] ss:$16 sps:$4 sm:$0xff]   ;;  %v10268_v52 = vld [vmem:[#allocation3 + $0x100] ss:$16 sps:$4 sm:$0xff]  }
 0x215   :  { %1554 = vmatprep.subr.bf16.mxu0 %v11786_v12  ;;  %1595 = vmatprep.subr.bf16.mxu1 %v11787_v13  ;;  %v10278_v12 = vld [vmem:[#allocation3 + $0xec] ss:$16 sps:$4 sm:$0xff]   ;;  %v10280_v13 = vld [vmem:[#allocation3 + $0xe0] ss:$16 sps:$4 sm:$0xff]  }
 0x216   :  { %11791 = vst [vmem:[#allocation18_spill] sm:$0xff] %v10278_v12  ;;  %11792 = vst [vmem:[#allocation19_spill] sm:$0xff] %v10280_v13 }
 0x218   :  { %1555 = vmatpush1.bf16.msra.mxu0 %v11788_v55  ;;  %1596 = vmatpush1.bf16.msra.mxu1 %v10027_v60  ;;  %v10164_v60 = vld [vmem:[#allocation3 + $0x30c] ss:$16 sps:$4 sm:$0xff]   ;;  %v10282_v55 = vld [vmem:[#allocation3 + $0xe8] ss:$16 sps:$4 sm:$0xff]  }
 0x219   :  { %1556 = vmatprep.subr.bf16.mxu0 %v10031_v59  ;;  %1597 = vmatprep.subr.bf16.mxu1 %v10033_v63  ;;  %v10168_v59 = vld [vmem:[#allocation3 + $0x300] ss:$16 sps:$4 sm:$0xff]   ;;  %v10176_v63 = vld [vmem:[#allocation3 + $0x2ec] ss:$16 sps:$4 sm:$0xff]   ;;  %11793 = vst [vmem:[#allocation20_spill] sm:$0xff] %v10282_v55 }
 0x21a   :  { %v9541_v16 = vpop.eup %9540 }
 0x21b   :  { %v836_v17 = vmul.f32 %v9541_v16, %v831_v15  ;;  %v10288_v15 = vld [vmem:[#allocation3 + $0xc4] ss:$16 sps:$4 sm:$0xff]   ;;  %v10290_v16 = vld [vmem:[#allocation3 + $0xcc] ss:$16 sps:$4 sm:$0xff]  }
 0x21c   :  { %1557 = vmatpush1.bf16.msra.mxu0 %v10037_v0  ;;  %1598 = vmatpush1.bf16.msra.mxu1 %v10039_v2  ;;  %v10170_v0 = vld [vmem:[#allocation3 + $0x308] ss:$16 sps:$4 sm:$0xff]   ;;  %v10174_v2 = vld [vmem:[#allocation3 + $0x2e4] ss:$16 sps:$4 sm:$0xff]   ;;  %11794 = vst [vmem:[#allocation21_spill] sm:$0xff] %v10288_v15  ;;  %11795 = vst [vmem:[#allocation22_spill] sm:$0xff] %v10290_v16 }
 0x21d   :  { %1558 = vmatprep.subr.bf16.mxu0 %v10043_v1  ;;  %1599 = vmatprep.subr.bf16.mxu1 %v11789_v18  ;;  %837 = vst [vmem:[#allocation2] sm:$0x3] %v836_v17  ;;  %v1154_v20 = vrot.slane %v836_v17, 6  ;;  %v10292_v17 = vld [vmem:[#allocation3 + $0xc0] ss:$16 sps:$4 sm:$0xff]  }
 0x21e   :  { %11796 = vst [vmem:[#allocation23_spill] sm:$0xff] %v10292_v17  ;;  %v10294_v18 = vld [vmem:[#allocation3 + $0xc8] ss:$16 sps:$4 sm:$0xff]  }
 0x21f   :  { %v1156_v21 = vpack.c.bf16 %v1154_v20, %v1154_v20  ;;  %11797 = vst [vmem:[#allocation24_spill] sm:$0xff] %v10294_v18  ;;  %v10300_v20 = vld [vmem:[#allocation3 + $0xa0] ss:$16 sps:$4 sm:$0xff]  }
 0x220   :  { %1559 = vmatpush1.bf16.msra.mxu0 %v10049_v49  ;;  %1600 = vmatpush1.bf16.msra.mxu1 %v10051_v45  ;;  %v10180_v49 = vld [vmem:[#allocation3 + $0x2e0] ss:$16 sps:$4 sm:$0xff]   ;;  %v10182_v45 = vld [vmem:[#allocation3 + $0x2e8] ss:$16 sps:$4 sm:$0xff]   ;;  %11798 = vst [vmem:[#allocation25_spill] sm:$0xff] %v10300_v20 }
 0x221   :  { %1560 = vmatprep.subr.bf16.mxu0 %v10162_v19  ;;  %v1222_v1 = vrot.slane %v1156_v21, 1  ;;  %1601 = vmatprep.subr.bf16.mxu1 %v10164_v60  ;;  %v10302_v21 = vld [vmem:[#allocation3 + $0xa4] ss:$16 sps:$4 sm:$0xff]  }
 0x222   :  { %11799 = vst [vmem:[#allocation26_spill] sm:$0xff] %v10302_v21 }
 0x223   :  { %1576 = vmatprep.mubr.bf16.mxu0 %v1222_v1  ;;  %1617 = vmatprep.mubr.bf16.mxu1 %v1222_v1  ;;  %v10304_v1 = vld [vmem:[#allocation3 + $0xa8] ss:$16 sps:$4 sm:$0xff]  }
 0x224   :  { %1561 = vmatpush2.bf16.msra.mxu0 %v10168_v59  ;;  %1602 = vmatpush2.bf16.msra.mxu1 %v10170_v0  ;;  %11800 = vst [vmem:[#allocation27_spill] sm:$0xff] %v10304_v1 }
 0x225   :  { %1562 = vmatprep.subr.bf16.mxu0 %v10174_v2  ;;  %1603 = vmatprep.subr.bf16.mxu1 %v10176_v63 }
 0x228   :  { %1563 = vmatpush2.bf16.msra.mxu0 %v10180_v49  ;;  %1604 = vmatpush2.bf16.msra.mxu1 %v10182_v45 }
 0x229   :  { %1564 = vmatprep.subr.bf16.mxu0 %v10186_v22  ;;  %1605 = vmatprep.subr.bf16.mxu1 %v10188_v23 }
 0x22c   :  { %1565 = vmatpush2.bf16.msra.mxu0 %v10192_v24  ;;  %1606 = vmatpush2.bf16.msra.mxu1 %v10194_v25 }
 0x22d   :  { %1566 = vmatprep.subr.bf16.mxu0 %v10198_v27  ;;  %1607 = vmatprep.subr.bf16.mxu1 %v10200_v28 }
 0x230   :  { %1567 = vmatpush2.bf16.msra.mxu0 %v10204_v29  ;;  %1608 = vmatpush2.bf16.msra.mxu1 %v10206_v30 }
 0x231   :  { %1568 = vmatprep.subr.bf16.mxu0 %v10210_v31  ;;  %1609 = vmatprep.subr.bf16.mxu1 %v10212_v32 }
 0x234   :  { %1569 = vmatpush2.bf16.msra.mxu0 %v10216_v34  ;;  %1610 = vmatpush2.bf16.msra.mxu1 %v10218_v35 }
 0x235   :  { %1570 = vmatprep.subr.bf16.mxu0 %v10222_v36  ;;  %1611 = vmatprep.subr.bf16.mxu1 %v10224_v37 }
 0x238   :  { %1571 = vmatpush2.bf16.msra.mxu0 %v10228_v38  ;;  %1612 = vmatpush2.bf16.msra.mxu1 %v10230_v39 }
 0x239   :  { %1572 = vmatprep.subr.bf16.mxu0 %v10234_v10  ;;  %1613 = vmatprep.subr.bf16.mxu1 %v10236_v11 }
 0x23c   :  { %1573 = vmatpush2.bf16.msra.mxu0 %v10240_v57  ;;  %1614 = vmatpush2.bf16.msra.mxu1 %v10242_v5 }
 0x23d   :  { %1574 = vmatprep.subr.bf16.mxu0 %v10246_v4  ;;  %1615 = vmatprep.subr.bf16.mxu1 %v10248_v7 }
 0x240   :  { %1575 = vmatpush2.bf16.msra.mxu0 %v10252_v47  ;;  %1616 = vmatpush2.bf16.msra.mxu1 %v10254_v50 }
 0x241   :  { %1845 = vmatprep.subr.bf16.mxu0 %v10264_v42  ;;  %1886 = vmatprep.subr.bf16.mxu1 %v10266_v53 }
 0x243   :  { %1577 = vmatmul.mubr.bf16.vlgmr.msra.gmra.mxu0 %v10127_v33  ;;  %1618 = vmatmul.mubr.bf16.vlgmr.msra.gmra.mxu1 %v10127_v33  ;;  %v10276_v33 = vld [vmem:[#allocation3 + $0xe4] ss:$16 sps:$4 sm:$0xff]  }
 0x244   :  { %1877 = vmatprep.mubr.bf16.mxu0 %v11772_v62  ;;  %1918 = vmatprep.mubr.bf16.mxu1 %v11772_v62  ;;  %11790 = vst [vmem:[#allocation17_spill] sm:$0xff] %v10276_v33 }
 0x245   :  { %1846 = vmatpush1.bf16.msra.mxu0 %v10268_v52  ;;  %1887 = vmatpush1.bf16.msra.mxu1 %v10270_v54 }
 0x246   :  { %1847 = vmatprep.subr.bf16.mxu0 %v10276_v33  ;;  %1888 = vmatprep.subr.bf16.mxu1 %v10278_v12 }
 0x249   :  { %1848 = vmatpush1.bf16.msra.mxu0 %v10280_v13  ;;  %1889 = vmatpush1.bf16.msra.mxu1 %v10282_v55 }
 0x24a   :  { %1849 = vmatprep.subr.bf16.mxu0 %v10288_v15  ;;  %1890 = vmatprep.subr.bf16.mxu1 %v10290_v16 }
 0x24d   :  { %1850 = vmatpush1.bf16.msra.mxu0 %v10292_v17  ;;  %1891 = vmatpush1.bf16.msra.mxu1 %v10294_v18  ;;  %v10324_v18 = vld [vmem:[#allocation3 + $0x6c] ss:$16 sps:$4 sm:$0xff]  }
 0x24e   :  { %1851 = vmatprep.subr.bf16.mxu0 %v10302_v21  ;;  %1892 = vmatprep.subr.bf16.mxu1 %v10306_v43  ;;  %11807 = vst [vmem:[#allocation39_spill] sm:$0xff] %v10324_v18  ;;  %v10327_v21 = vld [vmem:[#allocation3 + $0x60] ss:$16 sps:$4 sm:$0xff]  }
 0x24f   :  { %11808 = vst [vmem:[#allocation40_spill] sm:$0xff] %v10327_v21 }
 0x251   :  { %1852 = vmatpush1.bf16.msra.mxu0 %v10300_v20  ;;  %1893 = vmatpush1.bf16.msra.mxu1 %v10304_v1  ;;  %v10331_v20 = vld [vmem:[#allocation3 + $0x68] ss:$16 sps:$4 sm:$0xff]   ;;  %v10333_v1 = vld [vmem:[#allocation3 + $0x44] ss:$16 sps:$4 sm:$0xff]  }
 0x252   :  { %1853 = vmatprep.subr.bf16.mxu0 %v10308_v48  ;;  %1894 = vmatprep.subr.bf16.mxu1 %v10311_v46  ;;  %11809 = vst [vmem:[#allocation41_spill] sm:$0xff] %v10331_v20  ;;  %11810 = vst [vmem:[#allocation42_spill] sm:$0xff] %v10333_v1  ;;  %v10336_v48 = vld [vmem:[#allocation3 + $0x4c] ss:$16 sps:$4 sm:$0xff]   ;;  %v10339_v46 = vld [vmem:[#allocation3 + $0x40] ss:$16 sps:$4 sm:$0xff]  }
 0x253   :  { %11811 = vst [vmem:[#allocation43_spill] sm:$0xff] %v10336_v48  ;;  %11812 = vst [vmem:[#allocation44_spill] sm:$0xff] %v10339_v46 }
 0x255   :  { %1854 = vmatpush1.bf16.msra.mxu0 %v10315_v44  ;;  %1895 = vmatpush1.bf16.msra.mxu1 %v10319_v9  ;;  %v10343_v44 = vld [vmem:[#allocation3 + $0x48] ss:$16 sps:$4 sm:$0xff]   ;;  %v10345_v9 = vld [vmem:[#allocation3 + $0x24] ss:$16 sps:$4 sm:$0xff]  }
 0x256   :  { %1855 = vmatprep.subr.bf16.mxu0 %v10321_v8  ;;  %1896 = vmatprep.subr.bf16.mxu1 %v10324_v18  ;;  %11813 = vst [vmem:[#allocation45_spill] sm:$0xff] %v10343_v44  ;;  %11814 = vst [vmem:[#allocation46_spill] sm:$0xff] %v10345_v9  ;;  %v10348_v8 = vld [vmem:[#allocation3 + $0x2c] ss:$16 sps:$4 sm:$0xff]   ;;  %v10351_v18 = vld [vmem:[#allocation3 + $0x20] ss:$16 sps:$4 sm:$0xff]  }
 0x257   :  { %11815 = vst [vmem:[#allocation47_spill] sm:$0xff] %v10348_v8  ;;  %11816 = vst [vmem:[#allocation48_spill] sm:$0xff] %v10351_v18 }
 0x259   :  { %1856 = vmatpush1.bf16.msra.mxu0 %v10327_v21  ;;  %1897 = vmatpush1.bf16.msra.mxu1 %v10331_v20  ;;  %v10355_v21 = vld [vmem:[#allocation3 + $0x28] ss:$16 sps:$4 sm:$0xff]  }
 0x25a   :  { %1857 = vmatprep.subr.bf16.mxu0 %v10333_v1  ;;  %1898 = vmatprep.subr.bf16.mxu1 %v10336_v48  ;;  %11817 = vst [vmem:[#allocation49_spill] sm:$0xff] %v10355_v21  ;;  %v10360_v1 = vld [vmem:[#allocation3 + $0x204] ss:$16 sps:$4 sm:$0xff]   ;;  %v10362_v48 = vld [vmem:[#allocation3 + $0x20c] ss:$16 sps:$4 sm:$0xff]  }
 0x25b   :  { %11818 = vst [vmem:[#allocation50_spill] sm:$0xff] %v10360_v1  ;;  %11819 = vst [vmem:[#allocation51_spill] sm:$0xff] %v10362_v48 }
 0x25d   :  { %1858 = vmatpush1.bf16.msra.mxu0 %v10339_v46  ;;  %1899 = vmatpush1.bf16.msra.mxu1 %v10343_v44 }
 0x25e   :  { %1859 = vmatprep.subr.bf16.mxu0 %v10345_v9  ;;  %1900 = vmatprep.subr.bf16.mxu1 %v10348_v8 }
 0x261   :  { %1860 = vmatpush1.bf16.msra.mxu0 %v10351_v18  ;;  %1901 = vmatpush1.bf16.msra.mxu1 %v10355_v21 }
 0x262   :  { %2355 = vmatprep.subr.bf16.mxu0 %v10360_v1  ;;  %2396 = vmatprep.subr.bf16.mxu1 %v10362_v48 }
 0x2c3   :  { %v1068_v46 = vpop.f32.mrf.mxu0  ;;  %v1109_v44 = vpop.f32.mrf.mxu1 }
 0x2c4   :  { %v1120_v20 = vrot.slane %v1068_v46, 4  ;;  %v1122_v21 = vrot.slane %v1109_v44, 4 }
 0x2c5   :  { %v1070_v9 = vpop.f32.mrf.mxu0  ;;  %v1111_v43 = vpop.f32.mrf.mxu1 }
 0x2c6   :  { %v1128_v17 = vadd.f32 %v1120_v20, %v9934_v51  ;;  %v1121_v8 = vrot.slane %v1070_v9, 4  ;;  %v1130_v48 = vadd.f32 %v1122_v21, %v9943_v61  ;;  %v1123_v12 = vrot.slane %v1111_v43, 4 }
 0x2c7   :  { %v1072_v16 = vpop.f32.mrf.mxu0  ;;  %v1113_v18 = vpop.f32.mrf.mxu1 }
 0x2c8   :  { %v1132_v15 = vmul.f32 0.5, %v1128_v17  ;;  %v1129_v55 = vadd.f32 %v1121_v8, %v9939_v56  ;;  %v1131_v46 = vadd.f32 %v1123_v12, %v9955_v3  ;;  %v1146_v8 = vrot.slane %v10110_v41, 6  ;;  %v10380_v41 = vld [vmem:[#allocation3 + $0x1e4] ss:$16 sps:$4 sm:$0xff]  }
 0x2c9   :  { %v1073_v13 = vpop.f32.mrf.mxu0  ;;  %v1114_v62 = vpop.f32.mrf.mxu1  ;;  %11820 = vst [vmem:[#allocation52_spill] sm:$0xff] %v10380_v41 }
 0x2ca   :  { %9542 = vtanh.f32 %v1132_v15  ;;  %v1136_v1 = vmul.f32 0.5, %v1129_v55  ;;  %v1141_v33 = vmul.f32 0.5, %v1131_v46 }
 0x2cc   :  { %9544 = vtanh.f32 %v1136_v1 }
 0x2cd   :  { %9546 = vtanh.f32 %v1130_v48 }
 0x2ce   :  { %9548 = vtanh.f32 %v1141_v33 }
 0x2d7   :  { %v9543_v20 = vpop.eup %9542 }
 0x2d8   :  { %v1134_v9 = vadd.f32 1.0, %v9543_v20  ;;  %v10374_v20 = vld [vmem:[#allocation3 + $0x200] ss:$16 sps:$4 sm:$0xff]  }
 0x2d9   :  { %v9545_v16 = vpop.eup %9544 }
 0x2da   :  { %v1135_v18 = vmul.f32 0.5, %v1134_v9  ;;  %v1138_v17 = vadd.f32 1.0, %v9545_v16  ;;  %v9547_v62 = vpop.eup %9546  ;;  %v10376_v9 = vld [vmem:[#allocation3 + $0x208] ss:$16 sps:$4 sm:$0xff]   ;;  %v10382_v16 = vld [vmem:[#allocation3 + $0x1ec] ss:$16 sps:$4 sm:$0xff]  }
 0x2db   :  { %v9549_v43 = vpop.eup %9548  ;;  %11821 = vst [vmem:[#allocation53_spill] sm:$0xff] %v10382_v16 }
 0x2dc   :  { %v1139_v44 = vmul.f32 0.5, %v1138_v17  ;;  %v1149_v55 = vmul.f32 %v9547_v62, %v1135_v18  ;;  %v1143_v48 = vadd.f32 1.0, %v9549_v43  ;;  %v10388_v18 = vld [vmem:[#allocation3 + $0x1e0] ss:$16 sps:$4 sm:$0xff]   ;;  %v10390_v17 = vld [vmem:[#allocation3 + $0x1e8] ss:$16 sps:$4 sm:$0xff]  }
 0x2dd   :  { %11822 = vst [vmem:[#allocation54_spill] sm:$0xff] %v10388_v18  ;;  %11823 = vst [vmem:[#allocation55_spill] sm:$0xff] %v10390_v17  ;;  %v10400_v62 = vld [vmem:[#allocation3 + $0x1c0] ss:$16 sps:$4 sm:$0xff]   ;;  %v10408_v43 = vld [vmem:[#allocation3 + $0x1ac] ss:$16 sps:$4 sm:$0xff]  }
 0x2de   :  { %v1148_v13 = vmul.f32 %v1146_v8, %v1139_v44  ;;  %v1144_v12 = vmul.f32 0.5, %v1143_v48  ;;  %v10394_v44 = vld [vmem:[#allocation3 + $0x1c4] ss:$16 sps:$4 sm:$0xff]   ;;  %v10396_v8 = vld [vmem:[#allocation3 + $0x1cc] ss:$16 sps:$4 sm:$0xff]   ;;  %11826 = vst [vmem:[#allocation58_spill] sm:$0xff] %v10400_v62 }
 0x2df   :  { %11824 = vst [vmem:[#allocation56_spill] sm:$0xff] %v10394_v44  ;;  %11825 = vst [vmem:[#allocation57_spill] sm:$0xff] %v10396_v8  ;;  %v10412_v48 = vld [vmem:[#allocation3 + $0x1a0] ss:$16 sps:$4 sm:$0xff]  }
 0x2e0   :  { %v10371_v15 = vadd.f32 %v1149_v55, %v1148_v13  ;;  %v10402_v13 = vld [vmem:[#allocation3 + $0x1c8] ss:$16 sps:$4 sm:$0xff]   ;;  %v10406_v55 = vld [vmem:[#allocation3 + $0x1a4] ss:$16 sps:$4 sm:$0xff]   ;;  %11829 = vst [vmem:[#allocation61_spill] sm:$0xff] %v10408_v43  ;;  %11830 = vst [vmem:[#allocation62_spill] sm:$0xff] %v10412_v48 }
 0x2e1   :  { %11827 = vst [vmem:[#allocation59_spill] sm:$0xff] %v10402_v13  ;;  %11828 = vst [vmem:[#allocation60_spill] sm:$0xff] %v10406_v55 }
 0x2e2   :  { %9550 = vtanh.f32 %v10371_v15 }
 0x2ef   :  { %v9551_v21 = vpop.eup %9550 }
 0x2f0   :  { %v1152_v1 = vmul.f32 %v9551_v21, %v1144_v12  ;;  %v10414_v12 = vld [vmem:[#allocation3 + $0x1a8] ss:$16 sps:$4 sm:$0xff]   ;;  %v10418_v21 = vld [vmem:[#allocation3 + $0x184] ss:$16 sps:$4 sm:$0xff]  }
 0x2f1   :  { %11831 = vst [vmem:[#allocation63_spill] sm:$0xff] %v10414_v12  ;;  %11832 = vst [vmem:[#allocation64_spill] sm:$0xff] %v10418_v21 }
 0x2f2   :  { %v1649_v46 = vpack.c.bf16 %v1152_v1, %v1152_v1  ;;  %v10420_v1 = vld [vmem:[#allocation3 + $0x18c] ss:$16 sps:$4 sm:$0xff]  }
 0x2f3   :  { %11833 = vst [vmem:[#allocation65_spill] sm:$0xff] %v10420_v1 }
 0x2f4   :  { %v10378_v33 = vrot.slane %v1649_v46, 2 }
 0x2f6   :  { %1878 = vmatmul.mubr.bf16.vlgmr.msra.gmra.mxu0 %v10378_v33  ;;  %1919 = vmatmul.mubr.bf16.vlgmr.msra.gmra.mxu1 %v10378_v33 }
 0x2f7   :  { %2356 = vmatpush1.bf16.msra.mxu0 %v10374_v20  ;;  %2397 = vmatpush1.bf16.msra.mxu1 %v10376_v9 }
 0x2f8   :  { %2357 = vmatprep.subr.bf16.mxu0 %v10380_v41  ;;  %2398 = vmatprep.subr.bf16.mxu1 %v10382_v16 }
 0x2fb   :  { %2358 = vmatpush1.bf16.msra.mxu0 %v10388_v18  ;;  %2399 = vmatpush1.bf16.msra.mxu1 %v10390_v17 }
 0x2fc   :  { %2359 = vmatprep.subr.bf16.mxu0 %v10394_v44  ;;  %2400 = vmatprep.subr.bf16.mxu1 %v10396_v8 }
 0x2ff   :  { %2360 = vmatpush1.bf16.msra.mxu0 %v10400_v62  ;;  %2401 = vmatpush1.bf16.msra.mxu1 %v10402_v13  ;;  %v10424_v62 = vld [vmem:[#allocation3 + $0x180] ss:$16 sps:$4 sm:$0xff]   ;;  %v10426_v13 = vld [vmem:[#allocation3 + $0x188] ss:$16 sps:$4 sm:$0xff]  }
 0x300   :  { %2361 = vmatprep.subr.bf16.mxu0 %v10406_v55  ;;  %2402 = vmatprep.subr.bf16.mxu1 %v10408_v43  ;;  %11834 = vst [vmem:[#allocation66_spill] sm:$0xff] %v10426_v13  ;;  %v10431_v43 = vld [vmem:[#allocation3 + $0x164] ss:$16 sps:$4 sm:$0xff]   ;;  %v10433_v55 = vld [vmem:[#allocation3 + $0x16c] ss:$16 sps:$4 sm:$0xff]  }
 0x301   :  { %11835 = vst [vmem:[#allocation67_spill] sm:$0xff] %v10433_v55 }
 0x303   :  { %v1578_v46 = vpop.f32.mrf.mxu0  ;;  %v1619_v8 = vpop.f32.mrf.mxu1  ;;  %2362 = vmatpush1.bf16.msra.mxu0 %v10412_v48  ;;  %2403 = vmatpush1.bf16.msra.mxu1 %v10414_v12 }
 0x304   :  { %v1626_v44 = vadd.f32 %v1578_v46, %v10108_v40  ;;  %2363 = vmatprep.subr.bf16.mxu0 %v10418_v21  ;;  %2404 = vmatprep.subr.bf16.mxu1 %v10420_v1  ;;  %v10438_v46 = vld [vmem:[#allocation3 + $0x160] ss:$16 sps:$4 sm:$0xff]   ;;  %v10440_v40 = vld [vmem:[#allocation3 + $0x168] ss:$16 sps:$4 sm:$0xff]   ;;  %v10444_v21 = vld [vmem:[#allocation3 + $0x144] ss:$16 sps:$4 sm:$0xff]  }
 0x305   :  { %v1580_v17 = vpop.f32.mrf.mxu0  ;;  %v1621_v18 = vpop.f32.mrf.mxu1 }
 0x306   :  { %v1630_v16 = vmul.f32 0.5, %v1626_v44  ;;  %v1627_v48 = vadd.f32 %v1580_v17, %v10113_v6  ;;  %v10446_v44 = vld [vmem:[#allocation3 + $0x14c] ss:$16 sps:$4 sm:$0xff]  }
 0x307   :  { %v1582_v12 = vpop.f32.mrf.mxu0  ;;  %v1623_v41 = vpop.f32.mrf.mxu1  ;;  %2364 = vmatpush1.bf16.msra.mxu0 %v10424_v62  ;;  %2405 = vmatpush1.bf16.msra.mxu1 %v10426_v13  ;;  %v10451_v13 = vld [vmem:[#allocation3 + $0x140] ss:$16 sps:$4 sm:$0xff]  }
 0x308   :  { %9552 = vtanh.f32 %v1630_v16  ;;  %v1634_v1 = vmul.f32 0.5, %v1627_v48  ;;  %2365 = vmatprep.subr.bf16.mxu0 %v10431_v43  ;;  %2406 = vmatprep.subr.bf16.mxu1 %v10433_v55  ;;  %v1628_v12 = vadd.f32 %v1619_v8, %v10118_v14  ;;  %11836 = vst [vmem:[#allocation68_spill] sm:$0xff] %v10451_v13  ;;  %v10453_v16 = vld [vmem:[#allocation3 + $0x148] ss:$16 sps:$4 sm:$0xff]   ;;  %v10457_v48 = vld [vmem:[#allocation3 + $0x124] ss:$16 sps:$4 sm:$0xff]  }
 0x309   :  { %v1583_v17 = vpop.f32.mrf.mxu0  ;;  %v1624_v41 = vpop.f32.mrf.mxu1  ;;  %11837 = vst [vmem:[#allocation69_spill] sm:$0xff] %v10453_v16  ;;  %v10459_v55 = vld [vmem:[#allocation3 + $0x12c] ss:$16 sps:$4 sm:$0xff]   ;;  %v10463_v8 = vld [vmem:[#allocation3 + $0x120] ss:$16 sps:$4 sm:$0xff]  }
 0x30a   :  { %9554 = vtanh.f32 %v1634_v1  ;;  %v10465_v1 = vld [vmem:[#allocation3 + $0x128] ss:$16 sps:$4 sm:$0xff]   ;;  %v1629_v17 = vadd.f32 %v1621_v18, %v10124_v26 }
 0x30b   :  { %2366 = vmatpush1.bf16.msra.mxu0 %v10438_v46  ;;  %2407 = vmatpush1.bf16.msra.mxu1 %v10440_v40  ;;  %9556 = vtanh.f32 %v1628_v12  ;;  %11838 = vst [vmem:[#allocation70_spill] sm:$0xff] %v10465_v1 }
 0x30c   :  { %2367 = vmatprep.subr.bf16.mxu0 %v10444_v21  ;;  %2408 = vmatprep.subr.bf16.mxu1 %v10446_v44  ;;  %v1639_v41 = vmul.f32 0.5, %v1629_v17 }
 0x30e   :  { %9558 = vtanh.f32 %v1639_v41 }
 0x30f   :  { %2368 = vmatpush1.bf16.msra.mxu0 %v10451_v13  ;;  %2409 = vmatpush1.bf16.msra.mxu1 %v10453_v16 }
 0x310   :  { %2369 = vmatprep.subr.bf16.mxu0 %v10457_v48  ;;  %2410 = vmatprep.subr.bf16.mxu1 %v10459_v55 }
 0x313   :  { %2370 = vmatpush1.bf16.msra.mxu0 %v10463_v8  ;;  %2411 = vmatpush1.bf16.msra.mxu1 %v10465_v1 }
 0x314   :  { %2371 = vmatprep.subr.bf16.mxu0 %v10162_v19  ;;  %2412 = vmatprep.subr.bf16.mxu1 %v10164_v60 }
 0x315   :  { %v9553_v12 = vpop.eup %9552 }
 0x316   :  { %v1632_v16 = vadd.f32 1.0, %v9553_v12 }
 0x317   :  { %v9555_v13 = vpop.eup %9554  ;;  %2372 = vmatpush2.bf16.msra.mxu0 %v10168_v59  ;;  %2413 = vmatpush2.bf16.msra.mxu1 %v10170_v0 }
 0x318   :  { %v1633_v18 = vmul.f32 0.5, %v1632_v16  ;;  %v1636_v26 = vadd.f32 1.0, %v9555_v13  ;;  %2373 = vmatprep.subr.bf16.mxu0 %v10174_v2  ;;  %2414 = vmatprep.subr.bf16.mxu1 %v10176_v63  ;;  %v9557_v17 = vpop.eup %9556  ;;  %v11867_v13 = vld [vmem:[#allocation49_spill] sm:$0xff]  ;;  %v11868_v16 = vld [vmem:[#allocation50_spill] sm:$0xff] }
 0x31a   :  { %v1637_v1 = vmul.f32 0.5, %v1636_v26  ;;  %v1644_v60 = vmul.f32 %v9557_v17, %v1633_v18 }
 0x31b   :  { %2374 = vmatpush2.bf16.msra.mxu0 %v10180_v49  ;;  %2415 = vmatpush2.bf16.msra.mxu1 %v10182_v45  ;;  %v9559_v26 = vpop.eup %9558 }
 0x31c   :  { %v1643_v19 = vmul.f32 %v1637_v1, %v10139_v58  ;;  %2375 = vmatprep.subr.bf16.mxu0 %v10186_v22  ;;  %2416 = vmatprep.subr.bf16.mxu1 %v10188_v23  ;;  %v1641_v58 = vadd.f32 1.0, %v9559_v26  ;;  %v11839_v23 = vld [vmem:[#allocation17_spill] sm:$0xff]  ;;  %v11869_v1 = vld [vmem:[#allocation51_spill] sm:$0xff] }
 0x31e   :  { %v10483_v59 = vadd.f32 %v1644_v60, %v1643_v19  ;;  %v1642_v0 = vmul.f32 0.5, %v1641_v58 }
 0x31f   :  { %2376 = vmatpush2.bf16.msra.mxu0 %v10192_v24  ;;  %2417 = vmatpush2.bf16.msra.mxu1 %v10194_v25  ;;  %v11840_v24 = vld [vmem:[#allocation18_spill] sm:$0xff]  ;;  %v11841_v25 = vmov 0  }
 0x320   :  { %9560 = vtanh.f32 %v10483_v59  ;;  %2377 = vmatprep.subr.bf16.mxu0 %v10198_v27  ;;  %2418 = vmatprep.subr.bf16.mxu1 %v10200_v28  ;;  %v11842_v27 = vld [vmem:[#allocation19_spill] sm:$0xff]  ;;  %v11843_v28 = vld [vmem:[#allocation20_spill] sm:$0xff] }
 0x323   :  { %2378 = vmatpush2.bf16.msra.mxu0 %v10204_v29  ;;  %2419 = vmatpush2.bf16.msra.mxu1 %v10206_v30  ;;  %v11844_v29 = vld [vmem:[#allocation21_spill] sm:$0xff]  ;;  %v11845_v30 = vld [vmem:[#allocation22_spill] sm:$0xff] }
 0x324   :  { %2379 = vmatprep.subr.bf16.mxu0 %v10210_v31  ;;  %2420 = vmatprep.subr.bf16.mxu1 %v10212_v32  ;;  %v11846_v31 = vld [vmem:[#allocation23_spill] sm:$0xff]  ;;  %v11847_v32 = vld [vmem:[#allocation24_spill] sm:$0xff] }
 0x327   :  { %2380 = vmatpush2.bf16.msra.mxu0 %v10216_v34  ;;  %2421 = vmatpush2.bf16.msra.mxu1 %v10218_v35  ;;  %v11848_v34 = vld [vmem:[#allocation26_spill] sm:$0xff]  ;;  %v11849_v35 = vld [vmem:[#allocation33_spill] sm:$0xff] }
 0x328   :  { %2381 = vmatprep.subr.bf16.mxu0 %v10222_v36  ;;  %2422 = vmatprep.subr.bf16.mxu1 %v10224_v37  ;;  %v11850_v36 = vld [vmem:[#allocation25_spill] sm:$0xff]  ;;  %v11851_v37 = vld [vmem:[#allocation27_spill] sm:$0xff] }
 0x32b   :  { %2382 = vmatpush2.bf16.msra.mxu0 %v10228_v38  ;;  %2423 = vmatpush2.bf16.msra.mxu1 %v10230_v39  ;;  %v11852_v38 = vld [vmem:[#allocation34_spill] sm:$0xff]  ;;  %v11853_v39 = vld [vmem:[#allocation35_spill] sm:$0xff] }
 0x32c   :  { %2383 = vmatprep.subr.bf16.mxu0 %v10234_v10  ;;  %2424 = vmatprep.subr.bf16.mxu1 %v10236_v11  ;;  %v11854_v10 = vld [vmem:[#allocation36_spill] sm:$0xff]  ;;  %v11855_v11 = vld [vmem:[#allocation37_spill] sm:$0xff] }
 0x32d   :  { %v9561_v2 = vpop.eup %9560 }
 0x32e   :  { %v1647_v63 = vmul.f32 %v9561_v2, %v1642_v0 }
 0x32f   :  { %2384 = vmatpush2.bf16.msra.mxu0 %v10240_v57  ;;  %2425 = vmatpush2.bf16.msra.mxu1 %v10242_v5  ;;  %v11856_v57 = vld [vmem:[#allocation38_spill] sm:$0xff]  ;;  %v11857_v5 = vld [vmem:[#allocation39_spill] sm:$0xff] }
 0x330   :  { %2385 = vmatprep.subr.bf16.mxu0 %v10246_v4  ;;  %2426 = vmatprep.subr.bf16.mxu1 %v10248_v7  ;;  %1648 = vst [vmem:[#allocation2 + $0x2] sm:$0x3] %v1647_v63  ;;  %v1965_v49 = vrot.slane %v1647_v63, 4  ;;  %v11858_v4 = vld [vmem:[#allocation40_spill] sm:$0xff]  ;;  %v11859_v7 = vld [vmem:[#allocation41_spill] sm:$0xff] }
 0x332   :  { %v1967_v45 = vpack.c.bf16 %v1965_v49, %v1965_v49 }
 0x333   :  { %2386 = vmatpush2.bf16.msra.mxu0 %v10252_v47  ;;  %2427 = vmatpush2.bf16.msra.mxu1 %v10254_v50  ;;  %v11860_v47 = vld [vmem:[#allocation42_spill] sm:$0xff]  ;;  %v11861_v50 = vld [vmem:[#allocation43_spill] sm:$0xff] }
 0x334   :  { %v2033_v22 = vrot.slane %v1967_v45, 2  ;;  %2656 = vmatprep.subr.bf16.mxu0 %v10264_v42  ;;  %2697 = vmatprep.subr.bf16.mxu1 %v10266_v53  ;;  %v11862_v42 = vld [vmem:[#allocation44_spill] sm:$0xff]  ;;  %v11863_v53 = vld [vmem:[#allocation45_spill] sm:$0xff] }
 0x336   :  { %2387 = vmatprep.mubr.bf16.mxu0 %v2033_v22  ;;  %2428 = vmatprep.mubr.bf16.mxu1 %v2033_v22 }
 0x337   :  { %2388 = vmatmul.mubr.bf16.vlgmr.msra.gmra.mxu0 %v10378_v33  ;;  %2429 = vmatmul.mubr.bf16.vlgmr.msra.gmra.mxu1 %v10378_v33  ;;  %v11866_v33 = vld [vmem:[#allocation48_spill] sm:$0xff] }
 0x338   :  { %2657 = vmatpush1.bf16.msra.mxu0 %v10268_v52  ;;  %2698 = vmatpush1.bf16.msra.mxu1 %v10270_v54  ;;  %v11864_v52 = vld [vmem:[#allocation46_spill] sm:$0xff]  ;;  %v11865_v54 = vld [vmem:[#allocation47_spill] sm:$0xff] }
 0x339   :  { %2658 = vmatprep.subr.bf16.mxu0 %v11839_v23  ;;  %2699 = vmatprep.subr.bf16.mxu1 %v11840_v24 }
 0x33a   :  { %2688 = vmatprep.mubr.bf16.mxu0 %v11841_v25  ;;  %2729 = vmatprep.mubr.bf16.mxu1 %v11841_v25 }
 0x33c   :  { %2659 = vmatpush1.bf16.msra.mxu0 %v11842_v27  ;;  %2700 = vmatpush1.bf16.msra.mxu1 %v11843_v28 }
 0x33d   :  { %2660 = vmatprep.subr.bf16.mxu0 %v11844_v29  ;;  %2701 = vmatprep.subr.bf16.mxu1 %v11845_v30 }
 0x340   :  { %2661 = vmatpush1.bf16.msra.mxu0 %v11846_v31  ;;  %2702 = vmatpush1.bf16.msra.mxu1 %v11847_v32 }
 0x341   :  { %2662 = vmatprep.subr.bf16.mxu0 %v11848_v34  ;;  %2703 = vmatprep.subr.bf16.mxu1 %v11849_v35 }
 0x344   :  { %2663 = vmatpush1.bf16.msra.mxu0 %v11850_v36  ;;  %2704 = vmatpush1.bf16.msra.mxu1 %v11851_v37 }
 0x345   :  { %2664 = vmatprep.subr.bf16.mxu0 %v11852_v38  ;;  %2705 = vmatprep.subr.bf16.mxu1 %v11853_v39 }
 0x348   :  { %2665 = vmatpush1.bf16.msra.mxu0 %v11854_v10  ;;  %2706 = vmatpush1.bf16.msra.mxu1 %v11855_v11 }
 0x349   :  { %2666 = vmatprep.subr.bf16.mxu0 %v11856_v57  ;;  %2707 = vmatprep.subr.bf16.mxu1 %v11857_v5 }
 0x34c   :  { %2667 = vmatpush1.bf16.msra.mxu0 %v11858_v4  ;;  %2708 = vmatpush1.bf16.msra.mxu1 %v11859_v7  ;;  %v11871_v7 = vld [vmem:[#allocation53_spill] sm:$0xff] }
 0x34d   :  { %2668 = vmatprep.subr.bf16.mxu0 %v11860_v47  ;;  %2709 = vmatprep.subr.bf16.mxu1 %v11861_v50  ;;  %v11872_v47 = vld [vmem:[#allocation54_spill] sm:$0xff]  ;;  %v11873_v50 = vld [vmem:[#allocation55_spill] sm:$0xff] }
 0x350   :  { %2669 = vmatpush1.bf16.msra.mxu0 %v11862_v42  ;;  %2710 = vmatpush1.bf16.msra.mxu1 %v11863_v53  ;;  %v11874_v42 = vld [vmem:[#allocation56_spill] sm:$0xff]  ;;  %v11875_v53 = vld [vmem:[#allocation57_spill] sm:$0xff] }
 0x351   :  { %2670 = vmatprep.subr.bf16.mxu0 %v11864_v52  ;;  %2711 = vmatprep.subr.bf16.mxu1 %v11865_v54  ;;  %v11876_v52 = vld [vmem:[#allocation58_spill] sm:$0xff]  ;;  %v11877_v54 = vld [vmem:[#allocation59_spill] sm:$0xff] }
 0x354   :  { %2671 = vmatpush1.bf16.msra.mxu0 %v11866_v33  ;;  %2712 = vmatpush1.bf16.msra.mxu1 %v11867_v13  ;;  %v11878_v33 = vld [vmem:[#allocation60_spill] sm:$0xff]  ;;  %v11881_v13 = vld [vmem:[#allocation63_spill] sm:$0xff] }
 0x355   :  { %3154 = vmatprep.subr.bf16.mxu0 %v11868_v16  ;;  %3195 = vmatprep.subr.bf16.mxu1 %v11869_v1 }
 0x3b6   :  { %v1879_v41 = vpop.f32.mrf.mxu0  ;;  %v1920_v12 = vpop.f32.mrf.mxu1 }
 0x3b7   :  { %v1931_v18 = vrot.slane %v1879_v41, 2  ;;  %v1933_v63 = vrot.slane %v1920_v12, 2  ;;  %v11882_v41 = vld [vmem:[#allocation64_spill] sm:$0xff]  ;;  %v11883_v12 = vld [vmem:[#allocation65_spill] sm:$0xff] }
 0x3b8   :  { %v1881_v17 = vpop.f32.mrf.mxu0  ;;  %v1922_v19 = vpop.f32.mrf.mxu1 }
 0x3b9   :  { %v1939_v60 = vadd.f32 %v1931_v18, %v9934_v51  ;;  %v1932_v26 = vrot.slane %v1881_v17, 2  ;;  %v1941_v24 = vadd.f32 %v1933_v63, %v9943_v61  ;;  %v1934_v27 = vrot.slane %v1922_v19, 2  ;;  %v11884_v18 = vld [vmem:[#allocation30_spill] sm:$0xff] }
 0x3ba   :  { %v1883_v58 = vpop.f32.mrf.mxu0  ;;  %v1924_v0 = vpop.f32.mrf.mxu1 }
 0x3bb   :  { %v1943_v2 = vmul.f32 0.5, %v1939_v60  ;;  %v1940_v49 = vadd.f32 %v1932_v26, %v9939_v56  ;;  %v1942_v28 = vadd.f32 %v1934_v27, %v9955_v3  ;;  %v1957_v56 = vrot.slane %v10371_v15, 6  ;;  %v11870_v15 = vld [vmem:[#allocation52_spill] sm:$0xff]  ;;  %v11885_v0 = vld [vmem:[#allocation66_spill] sm:$0xff]  ;;  %v10589_v27 = vld [vmem:[#allocation3 + $0x304] ss:$16 sps:$4 sm:$0xff]  }
 0x3bc   :  { %v1884_v45 = vpop.f32.mrf.mxu0  ;;  %v1925_v22 = vpop.f32.mrf.mxu1 }
 0x3bd   :  { %9562 = vtanh.f32 %v1943_v2  ;;  %v1947_v23 = vmul.f32 0.5, %v1940_v49  ;;  %v1952_v29 = vmul.f32 0.5, %v1942_v28  ;;  %v11886_v49 = vld [vmem:[#allocation67_spill] sm:$0xff]  ;;  %v10591_v28 = vld [vmem:[#allocation3 + $0x30c] ss:$16 sps:$4 sm:$0xff]  }
 0x3bf   :  { %9564 = vtanh.f32 %v1947_v23 }
 0x3c0   :  { %9566 = vtanh.f32 %v1941_v24 }
 0x3c1   :  { %9568 = vtanh.f32 %v1952_v29 }
 0x3ca   :  { %v9563_v51 = vpop.eup %9562 }
 0x3cb   :  { %v1945_v30 = vadd.f32 1.0, %v9563_v51 }
 0x3cc   :  { %v9565_v31 = vpop.eup %9564 }
 0x3cd   :  { %v1946_v32 = vmul.f32 0.5, %v1945_v30  ;;  %v1949_v34 = vadd.f32 1.0, %v9565_v31  ;;  %v9567_v36 = vpop.eup %9566 }
 0x3ce   :  { %v9569_v61 = vpop.eup %9568 }
 0x3cf   :  { %v1950_v35 = vmul.f32 0.5, %v1949_v34  ;;  %v1960_v38 = vmul.f32 %v9567_v36, %v1946_v32  ;;  %v1954_v10 = vadd.f32 1.0, %v9569_v61  ;;  %v10610_v32 = vld [vmem:[#allocation3 + $0x2e8] ss:$16 sps:$4 sm:$0xff]   ;;  %v10620_v61 = vld [vmem:[#allocation3 + $0x2c0] ss:$16 sps:$4 sm:$0xff]  }
 0x3d1   :  { %v1959_v37 = vmul.f32 %v1957_v56, %v1950_v35  ;;  %v1955_v3 = vmul.f32 0.5, %v1954_v10  ;;  %v10614_v35 = vld [vmem:[#allocation3 + $0x2c4] ss:$16 sps:$4 sm:$0xff]   ;;  %v10616_v56 = vld [vmem:[#allocation3 + $0x2cc] ss:$16 sps:$4 sm:$0xff]  }
 0x3d2   :  { %v10622_v10 = vld [vmem:[#allocation3 + $0x2c8] ss:$16 sps:$4 sm:$0xff]  }
 0x3d3   :  { %v10551_v39 = vadd.f32 %v1960_v38, %v1959_v37 }
 0x3d5   :  { %9570 = vtanh.f32 %v10551_v39 }
 0x3e2   :  { %v9571_v11 = vpop.eup %9570 }
 0x3e3   :  { %v1963_v57 = vmul.f32 %v9571_v11, %v1955_v3  ;;  %v10626_v11 = vld [vmem:[#allocation3 + $0x2a4] ss:$16 sps:$4 sm:$0xff]  }
 0x3e5   :  { %v2460_v5 = vpack.c.bf16 %v1963_v57, %v1963_v57  ;;  %v10628_v57 = vld [vmem:[#allocation3 + $0x2ac] ss:$16 sps:$4 sm:$0xff]  }
 0x3e7   :  { %v10554_v4 = vrot.slane %v2460_v5, 3 }
 0x3e9   :  { %2689 = vmatmul.mubr.bf16.vlgmr.msra.gmra.mxu0 %v10554_v4  ;;  %2730 = vmatmul.mubr.bf16.vlgmr.msra.gmra.mxu1 %v10554_v4 }
 0x3ea   :  { %3155 = vmatpush1.bf16.msra.mxu0 %v10374_v20  ;;  %3196 = vmatpush1.bf16.msra.mxu1 %v10376_v9  ;;  %v11879_v20 = vld [vmem:[#allocation61_spill] sm:$0xff]  ;;  %v11880_v9 = vld [vmem:[#allocation62_spill] sm:$0xff] }
 0x3eb   :  { %3156 = vmatprep.subr.bf16.mxu0 %v11870_v15  ;;  %3197 = vmatprep.subr.bf16.mxu1 %v11871_v7 }
 0x3ee   :  { %3157 = vmatpush1.bf16.msra.mxu0 %v11872_v47  ;;  %3198 = vmatpush1.bf16.msra.mxu1 %v11873_v50  ;;  %v10635_v47 = vld [vmem:[#allocation3 + $0x2a0] ss:$16 sps:$4 sm:$0xff]   ;;  %v10637_v50 = vld [vmem:[#allocation3 + $0x2a8] ss:$16 sps:$4 sm:$0xff]  }
 0x3ef   :  { %3158 = vmatprep.subr.bf16.mxu0 %v11874_v42  ;;  %3199 = vmatprep.subr.bf16.mxu1 %v11875_v53  ;;  %v10641_v42 = vld [vmem:[#allocation3 + $0x284] ss:$16 sps:$4 sm:$0xff]   ;;  %v10643_v53 = vld [vmem:[#allocation3 + $0x28c] ss:$16 sps:$4 sm:$0xff]  }
 0x3f2   :  { %3159 = vmatpush1.bf16.msra.mxu0 %v11876_v52  ;;  %3200 = vmatpush1.bf16.msra.mxu1 %v11877_v54  ;;  %v10650_v52 = vld [vmem:[#allocation3 + $0x288] ss:$16 sps:$4 sm:$0xff]   ;;  %v10654_v54 = vld [vmem:[#allocation3 + $0x264] ss:$16 sps:$4 sm:$0xff]  }
 0x3f3   :  { %3160 = vmatprep.subr.bf16.mxu0 %v11878_v33  ;;  %3201 = vmatprep.subr.bf16.mxu1 %v11879_v20  ;;  %v10656_v33 = vld [vmem:[#allocation3 + $0x26c] ss:$16 sps:$4 sm:$0xff]  }
 0x3f6   :  { %3161 = vmatpush1.bf16.msra.mxu0 %v11880_v9  ;;  %3202 = vmatpush1.bf16.msra.mxu1 %v11881_v13  ;;  %v10660_v9 = vld [vmem:[#allocation3 + $0x260] ss:$16 sps:$4 sm:$0xff]   ;;  %v10662_v13 = vld [vmem:[#allocation3 + $0x268] ss:$16 sps:$4 sm:$0xff]  }
 0x3f7   :  { %v2389_v16 = vpop.f32.mrf.mxu0  ;;  %v2430_v1 = vpop.f32.mrf.mxu1  ;;  %3162 = vmatprep.subr.bf16.mxu0 %v11882_v41  ;;  %3203 = vmatprep.subr.bf16.mxu1 %v11883_v12  ;;  %v10672_v12 = vld [vmem:[#allocation3 + $0x240] ss:$16 sps:$4 sm:$0xff]  }
 0x3f8   :  { %v2437_v17 = vadd.f32 %v2389_v16, %v11884_v18  ;;  %v2439_v24 = vadd.f32 %v2430_v1, %v10118_v14  ;;  %v10666_v16 = vld [vmem:[#allocation3 + $0x244] ss:$16 sps:$4 sm:$0xff]   ;;  %v10668_v1 = vld [vmem:[#allocation3 + $0x24c] ss:$16 sps:$4 sm:$0xff]  }
 0x3f9   :  { %v2391_v19 = vpop.f32.mrf.mxu0  ;;  %v2432_v60 = vpop.f32.mrf.mxu1 }
 0x3fa   :  { %v2441_v26 = vmul.f32 0.5, %v2437_v17  ;;  %v2438_v58 = vadd.f32 %v2391_v19, %v10113_v6  ;;  %3163 = vmatpush1.bf16.msra.mxu0 %v10424_v62  ;;  %3204 = vmatpush1.bf16.msra.mxu1 %v11885_v0  ;;  %v11887_v62 = vld [vmem:[#allocation68_spill] sm:$0xff]  ;;  %v10678_v19 = vld [vmem:[#allocation3 + $0x224] ss:$16 sps:$4 sm:$0xff]   ;;  %v10684_v0 = vld [vmem:[#allocation3 + $0x220] ss:$16 sps:$4 sm:$0xff]  }
 0x3fb   :  { %v2393_v2 = vpop.f32.mrf.mxu0  ;;  %v2434_v63 = vpop.f32.mrf.mxu1  ;;  %3164 = vmatprep.subr.bf16.mxu0 %v10431_v43  ;;  %3205 = vmatprep.subr.bf16.mxu1 %v11886_v49  ;;  %v11888_v43 = vld [vmem:[#allocation69_spill] sm:$0xff]  ;;  %v10674_v17 = vld [vmem:[#allocation3 + $0x248] ss:$16 sps:$4 sm:$0xff]  }
 0x3fc   :  { %9572 = vtanh.f32 %v2441_v26  ;;  %v2445_v45 = vmul.f32 0.5, %v2438_v58  ;;  %v10686_v2 = vld [vmem:[#allocation3 + $0x228] ss:$16 sps:$4 sm:$0xff]  }
 0x3fd   :  { %v2394_v22 = vpop.f32.mrf.mxu0  ;;  %v2435_v23 = vpop.f32.mrf.mxu1 }
 0x3fe   :  { %9574 = vtanh.f32 %v2445_v45  ;;  %3165 = vmatpush1.bf16.msra.mxu0 %v10438_v46  ;;  %3206 = vmatpush1.bf16.msra.mxu1 %v10440_v40  ;;  %v11889_v46 = vld [vmem:[#allocation32_spill] sm:$0xff]  ;;  %v11890_v40 = vld [vmem:[#allocation70_spill] sm:$0xff]  ;;  %v10696_v23 = vld [vmem:[#allocation3 + $0x104] ss:$16 sps:$4 sm:$0xff]  }
 0x3ff   :  { %3166 = vmatprep.subr.bf16.mxu0 %v10444_v21  ;;  %3207 = vmatprep.subr.bf16.mxu1 %v10446_v44  ;;  %9576 = vtanh.f32 %v2439_v24  ;;  %v2440_v29 = vadd.f32 %v2432_v60, %v11889_v46  ;;  %v10596_v21 = vld [vmem:[#allocation3 + $0x300] ss:$16 sps:$4 sm:$0xff]   ;;  %v10598_v44 = vld [vmem:[#allocation3 + $0x308] ss:$16 sps:$4 sm:$0xff]   ;;  %v10680_v60 = vld [vmem:[#allocation3 + $0x22c] ss:$16 sps:$4 sm:$0xff]  }
 0x400   :  { %v10698_v24 = vld [vmem:[#allocation3 + $0x10c] ss:$16 sps:$4 sm:$0xff]  }
 0x401   :  { %v2450_v51 = vmul.f32 0.5, %v2440_v29  ;;  %v10710_v29 = vld [vmem:[#allocation3 + $0xec] ss:$16 sps:$4 sm:$0xff]  }
 0x402   :  { %3167 = vmatpush1.bf16.msra.mxu0 %v11887_v62  ;;  %3208 = vmatpush1.bf16.msra.mxu1 %v11888_v43  ;;  %v10700_v62 = vld [vmem:[#allocation3 + $0x100] ss:$16 sps:$4 sm:$0xff]   ;;  %v10702_v43 = vld [vmem:[#allocation3 + $0x108] ss:$16 sps:$4 sm:$0xff]  }
 0x403   :  { %3168 = vmatprep.subr.bf16.mxu0 %v10457_v48  ;;  %3209 = vmatprep.subr.bf16.mxu1 %v10459_v55  ;;  %v10602_v48 = vld [vmem:[#allocation3 + $0x2e4] ss:$16 sps:$4 sm:$0xff]   ;;  %v10604_v55 = vld [vmem:[#allocation3 + $0x2ec] ss:$16 sps:$4 sm:$0xff]   ;;  %9578 = vtanh.f32 %v2450_v51  ;;  %v10714_v51 = vld [vmem:[#allocation3 + $0xe8] ss:$16 sps:$4 sm:$0xff]  }
 0x404   :  { %11892 = vst [vmem:[#allocation18_spill] sm:$0xff] %v10714_v51 }
 0x406   :  { %3169 = vmatpush1.bf16.msra.mxu0 %v10463_v8  ;;  %3210 = vmatpush1.bf16.msra.mxu1 %v11890_v40  ;;  %v10608_v8 = vld [vmem:[#allocation3 + $0x2e0] ss:$16 sps:$4 sm:$0xff]  }
 0x407   :  { %3170 = vmatprep.subr.bf16.mxu0 %v10589_v27  ;;  %3211 = vmatprep.subr.bf16.mxu1 %v10591_v28  ;;  %v10712_v40 = vld [vmem:[#allocation3 + $0xe0] ss:$16 sps:$4 sm:$0xff]  }
 0x408   :  { %11891 = vst [vmem:[#allocation17_spill] sm:$0xff] %v10712_v40 }
 0x409   :  { %v9573_v30 = vpop.eup %9572 }
 0x40a   :  { %v2443_v31 = vadd.f32 1.0, %v9573_v30  ;;  %3171 = vmatpush2.bf16.msra.mxu0 %v10596_v21  ;;  %3212 = vmatpush2.bf16.msra.mxu1 %v10598_v44  ;;  %v10720_v30 = vld [vmem:[#allocation3 + $0xc4] ss:$16 sps:$4 sm:$0xff]  }
 0x40b   :  { %v9575_v34 = vpop.eup %9574  ;;  %3172 = vmatprep.subr.bf16.mxu0 %v10602_v48  ;;  %3213 = vmatprep.subr.bf16.mxu1 %v10604_v55  ;;  %11893 = vst [vmem:[#allocation19_spill] sm:$0xff] %v10720_v30 }
 0x40c   :  { %v2444_v36 = vmul.f32 0.5, %v2443_v31  ;;  %v2447_v37 = vadd.f32 1.0, %v9575_v34  ;;  %v9577_v3 = vpop.eup %9576  ;;  %v10722_v31 = vld [vmem:[#allocation3 + $0xcc] ss:$16 sps:$4 sm:$0xff]   ;;  %v10724_v34 = vld [vmem:[#allocation3 + $0xc0] ss:$16 sps:$4 sm:$0xff]  }
 0x40d   :  { %11894 = vst [vmem:[#allocation20_spill] sm:$0xff] %v10722_v31  ;;  %11895 = vst [vmem:[#allocation21_spill] sm:$0xff] %v10724_v34 }
 0x40e   :  { %v2448_v38 = vmul.f32 0.5, %v2447_v37  ;;  %3173 = vmatpush2.bf16.msra.mxu0 %v10608_v8  ;;  %3214 = vmatpush2.bf16.msra.mxu1 %v10610_v32  ;;  %v2455_v15 = vmul.f32 %v9577_v3, %v2444_v36  ;;  %v10726_v36 = vld [vmem:[#allocation3 + $0xc8] ss:$16 sps:$4 sm:$0xff]   ;;  %v10732_v37 = vld [vmem:[#allocation3 + $0xa4] ss:$16 sps:$4 sm:$0xff]  }
 0x40f   :  { %3174 = vmatprep.subr.bf16.mxu0 %v10614_v35  ;;  %3215 = vmatprep.subr.bf16.mxu1 %v10616_v56  ;;  %11896 = vst [vmem:[#allocation22_spill] sm:$0xff] %v10726_v36  ;;  %11897 = vst [vmem:[#allocation23_spill] sm:$0xff] %v10732_v37  ;;  %v10736_v3 = vld [vmem:[#allocation3 + $0xa0] ss:$16 sps:$4 sm:$0xff]  }
 0x410   :  { %v2454_v5 = vmul.f32 %v2448_v38, %v10483_v59  ;;  %v10648_v59 = vld [vmem:[#allocation3 + $0x280] ss:$16 sps:$4 sm:$0xff]   ;;  %v9579_v20 = vpop.eup %9578  ;;  %v10734_v38 = vld [vmem:[#allocation3 + $0xac] ss:$16 sps:$4 sm:$0xff]   ;;  %11899 = vst [vmem:[#allocation26_spill] sm:$0xff] %v10736_v3 }
 0x411   :  { %v2452_v41 = vadd.f32 1.0, %v9579_v20  ;;  %11898 = vst [vmem:[#allocation24_spill] sm:$0xff] %v10734_v38  ;;  %v10746_v20 = vld [vmem:[#allocation3 + $0x8c] ss:$16 sps:$4 sm:$0xff]  }
 0x412   :  { %v10631_v7 = vadd.f32 %v2455_v15, %v2454_v5  ;;  %3175 = vmatpush2.bf16.msra.mxu0 %v10620_v61  ;;  %3216 = vmatpush2.bf16.msra.mxu1 %v10622_v10  ;;  %v10738_v5 = vld [vmem:[#allocation3 + $0xa8] ss:$16 sps:$4 sm:$0xff]   ;;  %v10744_v15 = vld [vmem:[#allocation3 + $0x84] ss:$16 sps:$4 sm:$0xff]   ;;  %11902 = vst [vmem:[#allocation27_spill] sm:$0xff] %v10746_v20 }
 0x413   :  { %3176 = vmatprep.subr.bf16.mxu0 %v10626_v11  ;;  %3217 = vmatprep.subr.bf16.mxu1 %v10628_v57  ;;  %v2453_v26 = vmul.f32 0.5, %v2452_v41  ;;  %11900 = vst [vmem:[#allocation33_spill] sm:$0xff] %v10738_v5  ;;  %11901 = vst [vmem:[#allocation25_spill] sm:$0xff] %v10744_v15  ;;  %v10748_v41 = vld [vmem:[#allocation3 + $0x80] ss:$16 sps:$4 sm:$0xff]  }
 0x414   :  { %9580 = vtanh.f32 %v10631_v7  ;;  %11903 = vst [vmem:[#allocation34_spill] sm:$0xff] %v10748_v41 }
 0x416   :  { %3177 = vmatpush2.bf16.msra.mxu0 %v10635_v47  ;;  %3218 = vmatpush2.bf16.msra.mxu1 %v10637_v50 }
 0x417   :  { %3178 = vmatprep.subr.bf16.mxu0 %v10641_v42  ;;  %3219 = vmatprep.subr.bf16.mxu1 %v10643_v53 }
 0x41a   :  { %3179 = vmatpush2.bf16.msra.mxu0 %v10648_v59  ;;  %3220 = vmatpush2.bf16.msra.mxu1 %v10650_v52 }
 0x41b   :  { %3180 = vmatprep.subr.bf16.mxu0 %v10654_v54  ;;  %3221 = vmatprep.subr.bf16.mxu1 %v10656_v33 }
 0x41e   :  { %3181 = vmatpush2.bf16.msra.mxu0 %v10660_v9  ;;  %3222 = vmatpush2.bf16.msra.mxu1 %v10662_v13 }
 0x41f   :  { %3182 = vmatprep.subr.bf16.mxu0 %v10666_v16  ;;  %3223 = vmatprep.subr.bf16.mxu1 %v10668_v1 }
 0x421   :  { %v9581_v58 = vpop.eup %9580 }
 0x422   :  { %3183 = vmatpush2.bf16.msra.mxu0 %v10672_v12  ;;  %3224 = vmatpush2.bf16.msra.mxu1 %v10674_v17  ;;  %v2458_v63 = vmul.f32 %v9581_v58, %v2453_v26  ;;  %v10750_v26 = vld [vmem:[#allocation3 + $0x88] ss:$16 sps:$4 sm:$0xff]   ;;  %v10756_v58 = vld [vmem:[#allocation3 + $0x64] ss:$16 sps:$4 sm:$0xff]  }
 0x423   :  { %3184 = vmatprep.subr.bf16.mxu0 %v10678_v19  ;;  %3225 = vmatprep.subr.bf16.mxu1 %v10680_v60  ;;  %11904 = vst [vmem:[#allocation35_spill] sm:$0xff] %v10750_v26  ;;  %11905 = vst [vmem:[#allocation36_spill] sm:$0xff] %v10756_v58 }
 0x424   :  { %2459 = vst [vmem:[#allocation2 + $0x4] sm:$0x3] %v2458_v63  ;;  %v2764_v49 = vrot.slane %v2458_v63, 2  ;;  %v10758_v63 = vld [vmem:[#allocation3 + $0x6c] ss:$16 sps:$4 sm:$0xff]  }
 0x425   :  { %11906 = vst [vmem:[#allocation37_spill] sm:$0xff] %v10758_v63 }
 0x426   :  { %3185 = vmatpush2.bf16.msra.mxu0 %v10684_v0  ;;  %3226 = vmatpush2.bf16.msra.mxu1 %v10686_v2  ;;  %v2766_v45 = vpack.c.bf16 %v2764_v49, %v2764_v49  ;;  %v10760_v49 = vld [vmem:[#allocation3 + $0x60] ss:$16 sps:$4 sm:$0xff]  }
 0x427   :  { %3452 = vmatprep.subr.bf16.mxu0 %v10696_v23  ;;  %3493 = vmatprep.subr.bf16.mxu1 %v10698_v24  ;;  %11907 = vst [vmem:[#allocation38_spill] sm:$0xff] %v10760_v49 }
 0x428   :  { %v2832_v22 = vrot.slane %v2766_v45, 3  ;;  %v10762_v45 = vld [vmem:[#allocation3 + $0x68] ss:$16 sps:$4 sm:$0xff]  }
 0x429   :  { %11908 = vst [vmem:[#allocation39_spill] sm:$0xff] %v10762_v45 }
 0x42a   :  { %3186 = vmatprep.mubr.bf16.mxu0 %v2832_v22  ;;  %3227 = vmatprep.mubr.bf16.mxu1 %v2832_v22  ;;  %v10768_v22 = vld [vmem:[#allocation3 + $0x44] ss:$16 sps:$4 sm:$0xff]  }
 0x42b   :  { %3187 = vmatmul.mubr.bf16.vlgmr.msra.gmra.mxu0 %v10554_v4  ;;  %3228 = vmatmul.mubr.bf16.vlgmr.msra.gmra.mxu1 %v10554_v4  ;;  %v10708_v4 = vld [vmem:[#allocation3 + $0xe4] ss:$16 sps:$4 sm:$0xff]   ;;  %11909 = vst [vmem:[#allocation40_spill] sm:$0xff] %v10768_v22 }
 0x42c   :  { %3484 = vmatprep.mubr.bf16.mxu0 %v11841_v25  ;;  %3525 = vmatprep.mubr.bf16.mxu1 %v11841_v25  ;;  %v11925_v25 = vld [vmem:[#allocation29_spill] sm:$0xff] }
 0x42d   :  { %3453 = vmatpush1.bf16.msra.mxu0 %v10700_v62  ;;  %3494 = vmatpush1.bf16.msra.mxu1 %v10702_v43 }
 0x42e   :  { %3454 = vmatprep.subr.bf16.mxu0 %v10708_v4  ;;  %3495 = vmatprep.subr.bf16.mxu1 %v10710_v29 }
 0x431   :  { %3455 = vmatpush1.bf16.msra.mxu0 %v10712_v40  ;;  %3496 = vmatpush1.bf16.msra.mxu1 %v10714_v51  ;;  %v11924_v40 = vld [vmem:[#allocation16_spill] sm:$0xff] }
 0x432   :  { %3456 = vmatprep.subr.bf16.mxu0 %v10720_v30  ;;  %3497 = vmatprep.subr.bf16.mxu1 %v10722_v31 }
 0x435   :  { %3457 = vmatpush1.bf16.msra.mxu0 %v10724_v34  ;;  %3498 = vmatpush1.bf16.msra.mxu1 %v10726_v36 }
 0x436   :  { %3458 = vmatprep.subr.bf16.mxu0 %v10732_v37  ;;  %3499 = vmatprep.subr.bf16.mxu1 %v10734_v38 }
 0x439   :  { %3459 = vmatpush1.bf16.msra.mxu0 %v10736_v3  ;;  %3500 = vmatpush1.bf16.msra.mxu1 %v10738_v5  ;;  %v11920_v5 = vld [vmem:[#allocation28_spill] sm:$0xff] }
 0x43a   :  { %3460 = vmatprep.subr.bf16.mxu0 %v10744_v15  ;;  %3501 = vmatprep.subr.bf16.mxu1 %v10746_v20  ;;  %v10774_v20 = vld [vmem:[#allocation3 + $0x48] ss:$16 sps:$4 sm:$0xff]   ;;  %v11919_v15 = vld [vmem:[#allocation13_spill] sm:$0xff] }
 0x43b   :  { %11912 = vst [vmem:[#allocation43_spill] sm:$0xff] %v10774_v20  ;;  %v10800_v3 = vadd.f32 %v11920_v5, %v11919_v15  ;;  %v10807_v5 = vadd.f32 %v11925_v25, %v11924_v40 }
 0x43d   :  { %3461 = vmatpush1.bf16.msra.mxu0 %v10748_v41  ;;  %3502 = vmatpush1.bf16.msra.mxu1 %v10750_v26  ;;  %v10770_v41 = vld [vmem:[#allocation3 + $0x4c] ss:$16 sps:$4 sm:$0xff]   ;;  %v10772_v26 = vld [vmem:[#allocation3 + $0x40] ss:$16 sps:$4 sm:$0xff]   ;;  %11921 = vst [vmem:[#allocation50_spill] sm:$0xff] %v10800_v3  ;;  %11926 = vst [vmem:[#allocation51_spill] sm:$0xff] %v10807_v5 }
 0x43e   :  { %3462 = vmatprep.subr.bf16.mxu0 %v10756_v58  ;;  %3503 = vmatprep.subr.bf16.mxu1 %v10758_v63  ;;  %11910 = vst [vmem:[#allocation41_spill] sm:$0xff] %v10770_v41  ;;  %11911 = vst [vmem:[#allocation42_spill] sm:$0xff] %v10772_v26  ;;  %v10780_v63 = vld [vmem:[#allocation3 + $0x20] ss:$16 sps:$4 sm:$0xff]   ;;  %v10786_v58 = vld [vmem:[#allocation3 + $0x2c] ss:$16 sps:$4 sm:$0xff]  }
 0x43f   :  { %11913 = vst [vmem:[#allocation44_spill] sm:$0xff] %v10780_v63  ;;  %11916 = vst [vmem:[#allocation47_spill] sm:$0xff] %v10786_v58 }
 0x441   :  { %3463 = vmatpush1.bf16.msra.mxu0 %v10760_v49  ;;  %3504 = vmatpush1.bf16.msra.mxu1 %v10762_v45  ;;  %v10782_v49 = vld [vmem:[#allocation3 + $0x24] ss:$16 sps:$4 sm:$0xff]   ;;  %v10784_v45 = vld [vmem:[#allocation3 + $0x28] ss:$16 sps:$4 sm:$0xff]  }
 0x442   :  { %3464 = vmatprep.subr.bf16.mxu0 %v10768_v22  ;;  %3505 = vmatprep.subr.bf16.mxu1 %v10770_v41  ;;  %11914 = vst [vmem:[#allocation45_spill] sm:$0xff] %v10782_v49  ;;  %11915 = vst [vmem:[#allocation46_spill] sm:$0xff] %v10784_v45  ;;  %v10792_v41 = vld [vmem:[#allocation3 + $0x204] ss:$16 sps:$4 sm:$0xff]  }
 0x443   :  { %11917 = vst [vmem:[#allocation48_spill] sm:$0xff] %v10792_v41 }
 0x445   :  { %3465 = vmatpush1.bf16.msra.mxu0 %v10772_v26  ;;  %3506 = vmatpush1.bf16.msra.mxu1 %v10774_v20  ;;  %v10794_v26 = vld [vmem:[#allocation3 + $0x20c] ss:$16 sps:$4 sm:$0xff]  }
 0x446   :  { %3466 = vmatprep.subr.bf16.mxu0 %v10782_v49  ;;  %3507 = vmatprep.subr.bf16.mxu1 %v10786_v58  ;;  %11918 = vst [vmem:[#allocation49_spill] sm:$0xff] %v10794_v26  ;;  %v11922_v49 = vld [vmem:[#allocation14_spill] sm:$0xff] }
 0x449   :  { %3467 = vmatpush1.bf16.msra.mxu0 %v10780_v63  ;;  %3508 = vmatpush1.bf16.msra.mxu1 %v10784_v45 }
 0x44a   :  { %3956 = vmatprep.subr.bf16.mxu0 %v10792_v41  ;;  %3997 = vmatprep.subr.bf16.mxu1 %v10794_v26  ;;  %v11923_v26 = vld [vmem:[#allocation15_spill] sm:$0xff] }
 0x4a9   :  { %v2690_v20 = vpop.f32.mrf.mxu0  ;;  %v2731_v22 = vpop.f32.mrf.mxu1 }
 0x4aa   :  { %v2738_v58 = vadd.f32 %v2690_v20, %v11922_v49  ;;  %v2740_v51 = vadd.f32 %v2731_v22, %v11923_v26 }
 0x4ab   :  { %v2692_v38 = vpop.f32.mrf.mxu0  ;;  %v2733_v63 = vpop.f32.mrf.mxu1 }
 0x4ac   :  { %v2742_v37 = vmul.f32 0.5, %v2738_v58  ;;  %v2739_v45 = vadd.f32 %v2692_v38, %v10800_v3  ;;  %v2741_v15 = vadd.f32 %v2733_v63, %v10807_v5 }
 0x4ad   :  { %v2694_v36 = vpop.f32.mrf.mxu0  ;;  %v2735_v34 = vpop.f32.mrf.mxu1 }
 0x4ae   :  { %9582 = vtanh.f32 %v2742_v37  ;;  %v2746_v31 = vmul.f32 0.5, %v2739_v45  ;;  %v2751_v20 = vmul.f32 0.5, %v2741_v15 }
 0x4af   :  { %v2695_v41 = vpop.f32.mrf.mxu0  ;;  %v2736_v30 = vpop.f32.mrf.mxu1 }
 0x4b0   :  { %9584 = vtanh.f32 %v2746_v31  ;;  %v2756_v30 = vrot.slane %v10551_v39, 6  ;;  %v10822_v39 = vld [vmem:[#allocation3 + $0x1ec] ss:$16 sps:$4 sm:$0xff]  }
 0x4b1   :  { %9586 = vtanh.f32 %v2740_v51  ;;  %11930 = vst [vmem:[#allocation55_spill] sm:$0xff] %v10822_v39 }
 0x4b2   :  { %9588 = vtanh.f32 %v2751_v20 }
 0x4bb   :  { %v9583_v58 = vpop.eup %9582 }
 0x4bc   :  { %v2744_v49 = vadd.f32 1.0, %v9583_v58  ;;  %v10814_v58 = vld [vmem:[#allocation3 + $0x200] ss:$16 sps:$4 sm:$0xff]  }
 0x4bd   :  { %v9585_v38 = vpop.eup %9584  ;;  %11927 = vst [vmem:[#allocation52_spill] sm:$0xff] %v10814_v58 }
 0x4be   :  { %v2745_v36 = vmul.f32 0.5, %v2744_v49  ;;  %v2748_v34 = vadd.f32 1.0, %v9585_v38  ;;  %v9587_v41 = vpop.eup %9586  ;;  %v10816_v49 = vld [vmem:[#allocation3 + $0x208] ss:$16 sps:$4 sm:$0xff]   ;;  %v10820_v38 = vld [vmem:[#allocation3 + $0x1e4] ss:$16 sps:$4 sm:$0xff]  }
 0x4bf   :  { %v9589_v25 = vpop.eup %9588  ;;  %11928 = vst [vmem:[#allocation53_spill] sm:$0xff] %v10816_v49  ;;  %11929 = vst [vmem:[#allocation54_spill] sm:$0xff] %v10820_v38 }
 0x4c0   :  { %v2749_v37 = vmul.f32 0.5, %v2748_v34  ;;  %v2759_v31 = vmul.f32 %v9587_v41, %v2745_v36  ;;  %v2753_v40 = vadd.f32 1.0, %v9589_v25  ;;  %v10828_v36 = vld [vmem:[#allocation3 + $0x1e0] ss:$16 sps:$4 sm:$0xff]   ;;  %v10830_v34 = vld [vmem:[#allocation3 + $0x1e8] ss:$16 sps:$4 sm:$0xff]  }
 0x4c1   :  { %11931 = vst [vmem:[#allocation56_spill] sm:$0xff] %v10828_v36  ;;  %11932 = vst [vmem:[#allocation57_spill] sm:$0xff] %v10830_v34  ;;  %v10840_v41 = vld [vmem:[#allocation3 + $0x1c0] ss:$16 sps:$4 sm:$0xff]   ;;  %v10848_v25 = vld [vmem:[#allocation3 + $0x1ac] ss:$16 sps:$4 sm:$0xff]  }
 0x4c2   :  { %v2758_v45 = vmul.f32 %v2756_v30, %v2749_v37  ;;  %v2754_v51 = vmul.f32 0.5, %v2753_v40  ;;  %v10834_v37 = vld [vmem:[#allocation3 + $0x1c4] ss:$16 sps:$4 sm:$0xff]   ;;  %v10836_v30 = vld [vmem:[#allocation3 + $0x1cc] ss:$16 sps:$4 sm:$0xff]   ;;  %11935 = vst [vmem:[#allocation60_spill] sm:$0xff] %v10840_v41 }
 0x4c3   :  { %11933 = vst [vmem:[#allocation58_spill] sm:$0xff] %v10834_v37  ;;  %11934 = vst [vmem:[#allocation59_spill] sm:$0xff] %v10836_v30  ;;  %v10852_v40 = vld [vmem:[#allocation3 + $0x1a0] ss:$16 sps:$4 sm:$0xff]  }
 0x4c4   :  { %v10811_v22 = vadd.f32 %v2759_v31, %v2758_v45  ;;  %v10842_v45 = vld [vmem:[#allocation3 + $0x1c8] ss:$16 sps:$4 sm:$0xff]   ;;  %v10846_v31 = vld [vmem:[#allocation3 + $0x1a4] ss:$16 sps:$4 sm:$0xff]   ;;  %11938 = vst [vmem:[#allocation63_spill] sm:$0xff] %v10848_v25  ;;  %11939 = vst [vmem:[#allocation64_spill] sm:$0xff] %v10852_v40 }
 0x4c5   :  { %11936 = vst [vmem:[#allocation61_spill] sm:$0xff] %v10842_v45  ;;  %11937 = vst [vmem:[#allocation62_spill] sm:$0xff] %v10846_v31 }
 0x4c6   :  { %9590 = vtanh.f32 %v10811_v22 }
 0x4d3   :  { %v9591_v63 = vpop.eup %9590 }
 0x4d4   :  { %v2762_v15 = vmul.f32 %v9591_v63, %v2754_v51  ;;  %v10854_v51 = vld [vmem:[#allocation3 + $0x1a8] ss:$16 sps:$4 sm:$0xff]   ;;  %v10858_v63 = vld [vmem:[#allocation3 + $0x184] ss:$16 sps:$4 sm:$0xff]  }
 0x4d5   :  { %11940 = vst [vmem:[#allocation65_spill] sm:$0xff] %v10854_v51  ;;  %11941 = vst [vmem:[#allocation66_spill] sm:$0xff] %v10858_v63 }
 0x4d6   :  { %v10818_v20 = vpack.c.bf16 %v2762_v15, %v2762_v15  ;;  %v10860_v15 = vld [vmem:[#allocation3 + $0x18c] ss:$16 sps:$4 sm:$0xff]  }
 0x4d7   :  { %11942 = vst [vmem:[#allocation67_spill] sm:$0xff] %v10860_v15 }
 0x4d8   :  { %3485 = vmatmul.mubr.bf16.vlgmr.msra.gmra.mxu0 %v10818_v20  ;;  %3526 = vmatmul.mubr.bf16.vlgmr.msra.gmra.mxu1 %v10818_v20 }
 0x4d9   :  { %3957 = vmatpush1.bf16.msra.mxu0 %v10814_v58  ;;  %3998 = vmatpush1.bf16.msra.mxu1 %v10816_v49 }
 0x4da   :  { %3958 = vmatprep.subr.bf16.mxu0 %v10820_v38  ;;  %3999 = vmatprep.subr.bf16.mxu1 %v10822_v39  ;;  %v10891_v39 = vld [vmem:[#allocation3 + $0x148] ss:$16 sps:$4 sm:$0xff]   ;;  %v10896_v38 = vld [vmem:[#allocation3 + $0x124] ss:$16 sps:$4 sm:$0xff]  }
 0x4dd   :  { %3959 = vmatpush1.bf16.msra.mxu0 %v10828_v36  ;;  %4000 = vmatpush1.bf16.msra.mxu1 %v10830_v34 }
 0x4de   :  { %3960 = vmatprep.subr.bf16.mxu0 %v10834_v37  ;;  %4001 = vmatprep.subr.bf16.mxu1 %v10836_v30  ;;  %v10864_v30 = vld [vmem:[#allocation3 + $0x180] ss:$16 sps:$4 sm:$0xff]  }
 0x4df   :  { %11943 = vst [vmem:[#allocation68_spill] sm:$0xff] %v10864_v30 }
 0x4e1   :  { %3961 = vmatpush1.bf16.msra.mxu0 %v10840_v41  ;;  %4002 = vmatpush1.bf16.msra.mxu1 %v10842_v45  ;;  %v10866_v41 = vld [vmem:[#allocation3 + $0x188] ss:$16 sps:$4 sm:$0xff]   ;;  %v10870_v45 = vld [vmem:[#allocation3 + $0x164] ss:$16 sps:$4 sm:$0xff]  }
 0x4e2   :  { %3962 = vmatprep.subr.bf16.mxu0 %v10846_v31  ;;  %4003 = vmatprep.subr.bf16.mxu1 %v10848_v25  ;;  %11944 = vst [vmem:[#allocation69_spill] sm:$0xff] %v10866_v41  ;;  %11945 = vst [vmem:[#allocation32_spill] sm:$0xff] %v10870_v45  ;;  %v10872_v31 = vld [vmem:[#allocation3 + $0x16c] ss:$16 sps:$4 sm:$0xff]   ;;  %v10876_v25 = vld [vmem:[#allocation3 + $0x160] ss:$16 sps:$4 sm:$0xff]  }
 0x4e3   :  { %11946 = vst [vmem:[#allocation70_spill] sm:$0xff] %v10872_v31  ;;  %11947 = vst [vmem:[#allocation13_spill] sm:$0xff] %v10876_v25 }
 0x4e5   :  { %3963 = vmatpush1.bf16.msra.mxu0 %v10852_v40  ;;  %4004 = vmatpush1.bf16.msra.mxu1 %v10854_v51  ;;  %v10878_v40 = vld [vmem:[#allocation3 + $0x168] ss:$16 sps:$4 sm:$0xff]   ;;  %v10882_v51 = vld [vmem:[#allocation3 + $0x144] ss:$16 sps:$4 sm:$0xff]  }
 0x4e6   :  { %3964 = vmatprep.subr.bf16.mxu0 %v10858_v63  ;;  %4005 = vmatprep.subr.bf16.mxu1 %v10860_v15  ;;  %11948 = vst [vmem:[#allocation28_spill] sm:$0xff] %v10878_v40  ;;  %v10884_v63 = vld [vmem:[#allocation3 + $0x14c] ss:$16 sps:$4 sm:$0xff]  }
 0x4e7   :  { %11949 = vst [vmem:[#allocation16_spill] sm:$0xff] %v10884_v63 }
 0x4e9   :  { %3965 = vmatpush1.bf16.msra.mxu0 %v10864_v30  ;;  %4006 = vmatpush1.bf16.msra.mxu1 %v10866_v41  ;;  %v10889_v41 = vld [vmem:[#allocation3 + $0x140] ss:$16 sps:$4 sm:$0xff]  }
 0x4ea   :  { %3966 = vmatprep.subr.bf16.mxu0 %v10870_v45  ;;  %4007 = vmatprep.subr.bf16.mxu1 %v10872_v31 }
 0x4eb   :  { %v3188_v15 = vpop.f32.mrf.mxu0  ;;  %v3229_v37 = vpop.f32.mrf.mxu1 }
 0x4ec   :  { %v3236_v34 = vadd.f32 %v3188_v15, %v11884_v18  ;;  %v10898_v15 = vld [vmem:[#allocation3 + $0x12c] ss:$16 sps:$4 sm:$0xff]  }
 0x4ed   :  { %v3190_v36 = vpop.f32.mrf.mxu0  ;;  %v3231_v30 = vpop.f32.mrf.mxu1  ;;  %3967 = vmatpush1.bf16.msra.mxu0 %v10876_v25  ;;  %4008 = vmatpush1.bf16.msra.mxu1 %v10878_v40 }
 0x4ee   :  { %v3240_v45 = vmul.f32 0.5, %v3236_v34  ;;  %v3237_v31 = vadd.f32 %v3190_v36, %v10113_v6  ;;  %3968 = vmatprep.subr.bf16.mxu0 %v10882_v51  ;;  %4009 = vmatprep.subr.bf16.mxu1 %v10884_v63  ;;  %v10902_v34 = vld [vmem:[#allocation3 + $0x120] ss:$16 sps:$4 sm:$0xff]   ;;  %v10904_v36 = vld [vmem:[#allocation3 + $0x128] ss:$16 sps:$4 sm:$0xff]   ;;  %v3238_v63 = vadd.f32 %v3229_v37, %v10118_v14 }
 0x4ef   :  { %v3192_v18 = vpop.f32.mrf.mxu0  ;;  %v3233_v49 = vpop.f32.mrf.mxu1 }
 0x4f0   :  { %9592 = vtanh.f32 %v3240_v45  ;;  %v3244_v25 = vmul.f32 0.5, %v3237_v31  ;;  %v3239_v18 = vadd.f32 %v3231_v30, %v11889_v46  ;;  %v11975_v30 = vld [vmem:[#allocation44_spill] sm:$0xff]  ;;  %v11976_v45 = vld [vmem:[#allocation46_spill] sm:$0xff] }
 0x4f1   :  { %v3193_v40 = vpop.f32.mrf.mxu0  ;;  %v3234_v58 = vpop.f32.mrf.mxu1  ;;  %3969 = vmatpush1.bf16.msra.mxu0 %v10889_v41  ;;  %4010 = vmatpush1.bf16.msra.mxu1 %v10891_v39  ;;  %v11977_v31 = vld [vmem:[#allocation48_spill] sm:$0xff] }
 0x4f2   :  { %9594 = vtanh.f32 %v3244_v25  ;;  %3970 = vmatprep.subr.bf16.mxu0 %v10896_v38  ;;  %4011 = vmatprep.subr.bf16.mxu1 %v10898_v15  ;;  %v3249_v58 = vmul.f32 0.5, %v3239_v18  ;;  %v11978_v25 = vld [vmem:[#allocation49_spill] sm:$0xff] }
 0x4f3   :  { %9596 = vtanh.f32 %v3238_v63 }
 0x4f4   :  { %9598 = vtanh.f32 %v3249_v58 }
 0x4f5   :  { %3971 = vmatpush1.bf16.msra.mxu0 %v10902_v34  ;;  %4012 = vmatpush1.bf16.msra.mxu1 %v10904_v36 }
 0x4f6   :  { %3972 = vmatprep.subr.bf16.mxu0 %v10589_v27  ;;  %4013 = vmatprep.subr.bf16.mxu1 %v10591_v28 }
 0x4f9   :  { %3973 = vmatpush2.bf16.msra.mxu0 %v10596_v21  ;;  %4014 = vmatpush2.bf16.msra.mxu1 %v10598_v44 }
 0x4fa   :  { %3974 = vmatprep.subr.bf16.mxu0 %v10602_v48  ;;  %4015 = vmatprep.subr.bf16.mxu1 %v10604_v55 }
 0x4fd   :  { %v9593_v49 = vpop.eup %9592  ;;  %3975 = vmatpush2.bf16.msra.mxu0 %v10608_v8  ;;  %4016 = vmatpush2.bf16.msra.mxu1 %v10610_v32 }
 0x4fe   :  { %v3242_v37 = vadd.f32 1.0, %v9593_v49  ;;  %3976 = vmatprep.subr.bf16.mxu0 %v10614_v35  ;;  %4017 = vmatprep.subr.bf16.mxu1 %v10616_v56 }
 0x4ff   :  { %v9595_v27 = vpop.eup %9594 }
 0x500   :  { %v3243_v28 = vmul.f32 0.5, %v3242_v37  ;;  %v3246_v21 = vadd.f32 1.0, %v9595_v27  ;;  %v9597_v48 = vpop.eup %9596  ;;  %v11979_v37 = vld [vmem:[#allocation14_spill] sm:$0xff] }
 0x501   :  { %3977 = vmatpush2.bf16.msra.mxu0 %v10620_v61  ;;  %4018 = vmatpush2.bf16.msra.mxu1 %v10622_v10  ;;  %v9599_v35 = vpop.eup %9598 }
 0x502   :  { %v3247_v44 = vmul.f32 0.5, %v3246_v21  ;;  %3978 = vmatprep.subr.bf16.mxu0 %v10626_v11  ;;  %4019 = vmatprep.subr.bf16.mxu1 %v10628_v57  ;;  %v3254_v8 = vmul.f32 %v9597_v48, %v3243_v28  ;;  %v3251_v56 = vadd.f32 1.0, %v9599_v35 }
 0x504   :  { %v3253_v55 = vmul.f32 %v3247_v44, %v10631_v7  ;;  %v3252_v61 = vmul.f32 0.5, %v3251_v56  ;;  %v11950_v7 = vmov 0  }
 0x505   :  { %3979 = vmatpush2.bf16.msra.mxu0 %v10635_v47  ;;  %4020 = vmatpush2.bf16.msra.mxu1 %v10637_v50  ;;  %v11951_v50 = vld [vmem:[#allocation17_spill] sm:$0xff] }
 0x506   :  { %v10929_v32 = vadd.f32 %v3254_v8, %v3253_v55  ;;  %3980 = vmatprep.subr.bf16.mxu0 %v10641_v42  ;;  %4021 = vmatprep.subr.bf16.mxu1 %v10643_v53  ;;  %v11952_v42 = vld [vmem:[#allocation18_spill] sm:$0xff]  ;;  %v11953_v53 = vld [vmem:[#allocation19_spill] sm:$0xff] }
 0x508   :  { %9600 = vtanh.f32 %v10929_v32 }
 0x509   :  { %3981 = vmatpush2.bf16.msra.mxu0 %v10648_v59  ;;  %4022 = vmatpush2.bf16.msra.mxu1 %v10650_v52  ;;  %v11954_v59 = vld [vmem:[#allocation20_spill] sm:$0xff]  ;;  %v11955_v52 = vld [vmem:[#allocation21_spill] sm:$0xff] }
 0x50a   :  { %3982 = vmatprep.subr.bf16.mxu0 %v10654_v54  ;;  %4023 = vmatprep.subr.bf16.mxu1 %v10656_v33  ;;  %v11956_v54 = vld [vmem:[#allocation22_spill] sm:$0xff]  ;;  %v11957_v33 = vld [vmem:[#allocation23_spill] sm:$0xff] }
 0x50d   :  { %3983 = vmatpush2.bf16.msra.mxu0 %v10660_v9  ;;  %4024 = vmatpush2.bf16.msra.mxu1 %v10662_v13  ;;  %v11958_v9 = vld [vmem:[#allocation24_spill] sm:$0xff]  ;;  %v11959_v13 = vld [vmem:[#allocation26_spill] sm:$0xff] }
 0x50e   :  { %3984 = vmatprep.subr.bf16.mxu0 %v10666_v16  ;;  %4025 = vmatprep.subr.bf16.mxu1 %v10668_v1  ;;  %v11960_v16 = vld [vmem:[#allocation33_spill] sm:$0xff] }
 0x50f   :  { %v11961_v1 = vld [vmem:[#allocation25_spill] sm:$0xff] }
 0x511   :  { %3985 = vmatpush2.bf16.msra.mxu0 %v10672_v12  ;;  %4026 = vmatpush2.bf16.msra.mxu1 %v10674_v17  ;;  %v11962_v12 = vld [vmem:[#allocation27_spill] sm:$0xff]  ;;  %v11963_v17 = vld [vmem:[#allocation34_spill] sm:$0xff] }
 0x512   :  { %3986 = vmatprep.subr.bf16.mxu0 %v10678_v19  ;;  %4027 = vmatprep.subr.bf16.mxu1 %v10680_v60  ;;  %v11964_v19 = vld [vmem:[#allocation35_spill] sm:$0xff]  ;;  %v11965_v60 = vld [vmem:[#allocation36_spill] sm:$0xff] }
 0x515   :  { %v9601_v10 = vpop.eup %9600  ;;  %3987 = vmatpush2.bf16.msra.mxu0 %v10684_v0  ;;  %4028 = vmatpush2.bf16.msra.mxu1 %v10686_v2  ;;  %v11966_v0 = vld [vmem:[#allocation37_spill] sm:$0xff]  ;;  %v11967_v2 = vld [vmem:[#allocation38_spill] sm:$0xff] }
 0x516   :  { %v3257_v11 = vmul.f32 %v9601_v10, %v3252_v61  ;;  %4257 = vmatprep.subr.bf16.mxu0 %v10696_v23  ;;  %4298 = vmatprep.subr.bf16.mxu1 %v10698_v24  ;;  %v11968_v23 = vld [vmem:[#allocation39_spill] sm:$0xff]  ;;  %v11969_v24 = vld [vmem:[#allocation40_spill] sm:$0xff] }
 0x518   :  { %3258 = vst [vmem:[#allocation2 + $0x6] sm:$0x3] %v3257_v11  ;;  %v3571_v57 = vpack.c.bf16 %v3257_v11, %v3257_v11 }
 0x51a   :  { %3988 = vmatprep.mubr.bf16.mxu0 %v3571_v57  ;;  %4029 = vmatprep.mubr.bf16.mxu1 %v3571_v57 }
 0x51b   :  { %3989 = vmatmul.mubr.bf16.vlgmr.msra.gmra.mxu0 %v10818_v20  ;;  %4030 = vmatmul.mubr.bf16.vlgmr.msra.gmra.mxu1 %v10818_v20  ;;  %v11974_v20 = vld [vmem:[#allocation47_spill] sm:$0xff] }
 0x51c   :  { %4258 = vmatpush1.bf16.msra.mxu0 %v10700_v62  ;;  %4299 = vmatpush1.bf16.msra.mxu1 %v10702_v43  ;;  %v11970_v62 = vld [vmem:[#allocation41_spill] sm:$0xff]  ;;  %v11971_v43 = vld [vmem:[#allocation42_spill] sm:$0xff] }
 0x51d   :  { %4259 = vmatprep.subr.bf16.mxu0 %v10708_v4  ;;  %4300 = vmatprep.subr.bf16.mxu1 %v10710_v29  ;;  %v11972_v4 = vld [vmem:[#allocation43_spill] sm:$0xff]  ;;  %v11973_v29 = vld [vmem:[#allocation45_spill] sm:$0xff] }
 0x51e   :  { %4289 = vmatprep.mubr.bf16.mxu0 %v11950_v7  ;;  %4330 = vmatprep.mubr.bf16.mxu1 %v11950_v7 }
 0x51f   :  { %v6185_v47 = vld [vmem:[#allocation2] sm:$0xff] }
 0x520   :  { %6187 = vadd.xlane.f32.xlu0 %v6185_v47  ;;  %4260 = vmatpush1.bf16.msra.mxu0 %v11951_v50 }
 0x521   :  { %4301 = vmatpush1.bf16.msra.mxu1 %v11952_v42  ;;  %4261 = vmatprep.subr.bf16.mxu0 %v11953_v53 }
 0x522   :  { %4302 = vmatprep.subr.bf16.mxu1 %v11954_v59 }
 0x524   :  { %4262 = vmatpush1.bf16.msra.mxu0 %v11955_v52 }
 0x525   :  { %4303 = vmatpush1.bf16.msra.mxu1 %v11956_v54  ;;  %4263 = vmatprep.subr.bf16.mxu0 %v11957_v33 }
 0x526   :  { %4304 = vmatprep.subr.bf16.mxu1 %v11958_v9 }
 0x528   :  { %4264 = vmatpush1.bf16.msra.mxu0 %v11959_v13 }
 0x529   :  { %4305 = vmatpush1.bf16.msra.mxu1 %v11960_v16  ;;  %4265 = vmatprep.subr.bf16.mxu0 %v11961_v1 }
 0x52a   :  { %4306 = vmatprep.subr.bf16.mxu1 %v11962_v12  ;;  %v3564_v12 = vrot.slane %v10811_v22, 6  ;;  %v11981_v22 = vld [vmem:[#allocation52_spill] sm:$0xff] }
 0x52c   :  { %4266 = vmatpush1.bf16.msra.mxu0 %v11963_v17 }
 0x52d   :  { %4307 = vmatpush1.bf16.msra.mxu1 %v11964_v19  ;;  %4267 = vmatprep.subr.bf16.mxu0 %v11965_v60 }
 0x52e   :  { %4308 = vmatprep.subr.bf16.mxu1 %v11966_v0 }
 0x530   :  { %4268 = vmatpush1.bf16.msra.mxu0 %v11967_v2 }
 0x531   :  { %4309 = vmatpush1.bf16.msra.mxu1 %v11968_v23  ;;  %4269 = vmatprep.subr.bf16.mxu0 %v11969_v24 }
 0x532   :  { %4310 = vmatprep.subr.bf16.mxu1 %v11970_v62 }
 0x534   :  { %4270 = vmatpush1.bf16.msra.mxu0 %v11971_v43 }
 0x535   :  { %4311 = vmatpush1.bf16.msra.mxu1 %v11972_v4  ;;  %4271 = vmatprep.subr.bf16.mxu0 %v11973_v29  ;;  %v11982_v29 = vld [vmem:[#allocation53_spill] sm:$0xff] }
 0x536   :  { %4312 = vmatprep.subr.bf16.mxu1 %v11974_v20  ;;  %v11983_v20 = vld [vmem:[#allocation54_spill] sm:$0xff] }
 0x538   :  { %4272 = vmatpush1.bf16.msra.mxu0 %v11975_v30  ;;  %v11984_v30 = vld [vmem:[#allocation55_spill] sm:$0xff] }
 0x539   :  { %4313 = vmatpush1.bf16.msra.mxu1 %v11976_v45  ;;  %4767 = vmatprep.subr.bf16.mxu0 %v11977_v31  ;;  %v11985_v45 = vld [vmem:[#allocation56_spill] sm:$0xff]  ;;  %v11986_v31 = vld [vmem:[#allocation57_spill] sm:$0xff] }
 0x53a   :  { %4808 = vmatprep.subr.bf16.mxu1 %v11978_v25  ;;  %v11987_v25 = vld [vmem:[#allocation58_spill] sm:$0xff] }
 0x598   :  { %v3486_v40 = vpop.f32.mrf.mxu0  ;;  %v3527_v63 = vpop.f32.mrf.mxu1 }
 0x599   :  { %v3538_v18 = vrot.slane %v3486_v40, 6  ;;  %v3540_v55 = vrot.slane %v3527_v63, 6  ;;  %v11988_v40 = vld [vmem:[#allocation59_spill] sm:$0xff]  ;;  %v11989_v63 = vld [vmem:[#allocation60_spill] sm:$0xff] }
 0x59a   :  { %v3488_v58 = vpop.f32.mrf.mxu0  ;;  %v3529_v49 = vpop.f32.mrf.mxu1 }
 0x59b   :  { %v3546_v27 = vadd.f32 %v3538_v18, %v11979_v37  ;;  %v3539_v28 = vrot.slane %v3488_v58, 6  ;;  %v3548_v10 = vadd.f32 %v3540_v55, %v11923_v26  ;;  %v3541_v11 = vrot.slane %v3529_v49, 6  ;;  %v11990_v18 = vld [vmem:[#allocation61_spill] sm:$0xff]  ;;  %v11991_v58 = vld [vmem:[#allocation62_spill] sm:$0xff]  ;;  %v11992_v49 = vld [vmem:[#allocation63_spill] sm:$0xff] }
 0x59c   :  { %v3490_v21 = vpop.f32.mrf.mxu0  ;;  %v3531_v44 = vpop.f32.mrf.mxu1 }
 0x59d   :  { %v3550_v48 = vmul.f32 0.5, %v3546_v27  ;;  %v3547_v8 = vadd.f32 %v3539_v28, %v10800_v3  ;;  %v3549_v57 = vadd.f32 %v3541_v11, %v10807_v5  ;;  %v11993_v27 = vld [vmem:[#allocation64_spill] sm:$0xff]  ;;  %v11994_v28 = vld [vmem:[#allocation65_spill] sm:$0xff]  ;;  %v11995_v21 = vld [vmem:[#allocation66_spill] sm:$0xff] }
 0x59e   :  { %v3491_v35 = vpop.f32.mrf.mxu0  ;;  %v3532_v56 = vpop.f32.mrf.mxu1  ;;  %v11996_v44 = vld [vmem:[#allocation67_spill] sm:$0xff] }
 0x59f   :  { %9602 = vtanh.f32 %v3550_v48  ;;  %v3554_v61 = vmul.f32 0.5, %v3547_v8  ;;  %v3559_v53 = vmul.f32 0.5, %v3549_v57  ;;  %v11997_v8 = vld [vmem:[#allocation30_spill] sm:$0xff]  ;;  %v11998_v56 = vld [vmem:[#allocation68_spill] sm:$0xff] }
 0x5a0   :  { %v12000_v57 = vld [vmem:[#allocation32_spill] sm:$0xff] }
 0x5a1   :  { %9604 = vtanh.f32 %v3554_v61  ;;  %v11999_v61 = vld [vmem:[#allocation69_spill] sm:$0xff] }
 0x5a2   :  { %9606 = vtanh.f32 %v3548_v10 }
 0x5a3   :  { %9608 = vtanh.f32 %v3559_v53 }
 0x5a9   :  { %v6188_v50 = vpop.xlane.xlu0 %6187 }
 0x5aa   :  { %v6192_v42 = vmul.f32 0.0078125, %v6188_v50  ;;  %v12001_v50 = vld [vmem:[#allocation70_spill] sm:$0xff] }
 0x5ac   :  { %v9603_v59 = vpop.eup %9602  ;;  %v10990_v52 = vsub.f32 %v6185_v47, %v6192_v42 }
 0x5ad   :  { %v3552_v54 = vadd.f32 1.0, %v9603_v59 }
 0x5ae   :  { %11980 = vst [vmem:[#allocation29_spill] sm:$0xff] %v10990_v52  ;;  %v9605_v33 = vpop.eup %9604  ;;  %v6196_v9 = vmul.f32 %v10990_v52, %v10990_v52  ;;  %v11206_v52 = vld [vmem:[#allocation3 + $0x188] ss:$16 sps:$4 sm:$0xff]  }
 0x5af   :  { %v3553_v13 = vmul.f32 0.5, %v3552_v54  ;;  %v3556_v16 = vadd.f32 1.0, %v9605_v33  ;;  %v9607_v17 = vpop.eup %9606  ;;  %12014 = vst [vmem:[#allocation33_spill] sm:$0xff] %v11206_v52 }
 0x5b0   :  { %6198 = vadd.xlane.f32.xlu1 %v6196_v9  ;;  %v9609_v47 = vpop.eup %9608  ;;  %v12002_v9 = vld [vmem:[#allocation13_spill] sm:$0xff] }
 0x5b1   :  { %v3557_v1 = vmul.f32 0.5, %v3556_v16  ;;  %v3567_v60 = vmul.f32 %v9607_v17, %v3553_v13  ;;  %v3561_v2 = vadd.f32 1.0, %v9609_v47  ;;  %v12003_v13 = vld [vmem:[#allocation28_spill] sm:$0xff]  ;;  %v11040_v47 = vld [vmem:[#allocation3 + $0x300] ss:$16 sps:$4 sm:$0xff]  }
 0x5b3   :  { %v3566_v19 = vmul.f32 %v3564_v12, %v3557_v1  ;;  %v3562_v23 = vmul.f32 0.5, %v3561_v2  ;;  %v12004_v12 = vld [vmem:[#allocation16_spill] sm:$0xff] }
 0x5b5   :  { %v10995_v0 = vadd.f32 %v3567_v60, %v3566_v19  ;;  %v11033_v19 = vld [vmem:[#allocation3 + $0x304] ss:$16 sps:$4 sm:$0xff]   ;;  %v11035_v60 = vld [vmem:[#allocation3 + $0x30c] ss:$16 sps:$4 sm:$0xff]  }
 0x5b7   :  { %9610 = vtanh.f32 %v10995_v0 }
 0x5c4   :  { %v9611_v24 = vpop.eup %9610 }
 0x5c5   :  { %v3570_v62 = vmul.f32 %v9611_v24, %v3562_v23  ;;  %v11058_v23 = vld [vmem:[#allocation3 + $0x2c4] ss:$16 sps:$4 sm:$0xff]   ;;  %v11060_v24 = vld [vmem:[#allocation3 + $0x2cc] ss:$16 sps:$4 sm:$0xff]  }
 0x5c7   :  { %v4061_v43 = vpack.c.bf16 %v3570_v62, %v3570_v62 }
 0x5c9   :  { %v10998_v4 = vrot.slane %v4061_v43, 1 }
 0x5cb   :  { %4290 = vmatmul.mubr.bf16.vlgmr.msra.gmra.mxu0 %v10998_v4  ;;  %4331 = vmatmul.mubr.bf16.vlgmr.msra.gmra.mxu1 %v10998_v4 }
 0x5cc   :  { %4768 = vmatpush1.bf16.msra.mxu0 %v11981_v22  ;;  %4809 = vmatpush1.bf16.msra.mxu1 %v11982_v29 }
 0x5cd   :  { %4769 = vmatprep.subr.bf16.mxu0 %v11983_v20  ;;  %4810 = vmatprep.subr.bf16.mxu1 %v11984_v30  ;;  %v11064_v20 = vld [vmem:[#allocation3 + $0x2c0] ss:$16 sps:$4 sm:$0xff]   ;;  %v11066_v30 = vld [vmem:[#allocation3 + $0x2c8] ss:$16 sps:$4 sm:$0xff]  }
 0x5d0   :  { %4770 = vmatpush1.bf16.msra.mxu0 %v11985_v45  ;;  %4811 = vmatpush1.bf16.msra.mxu1 %v11986_v31  ;;  %v11070_v45 = vld [vmem:[#allocation3 + $0x2a4] ss:$16 sps:$4 sm:$0xff]   ;;  %v11072_v31 = vld [vmem:[#allocation3 + $0x2ac] ss:$16 sps:$4 sm:$0xff]  }
 0x5d1   :  { %4771 = vmatprep.subr.bf16.mxu0 %v11987_v25  ;;  %4812 = vmatprep.subr.bf16.mxu1 %v11988_v40 }
 0x5d4   :  { %4772 = vmatpush1.bf16.msra.mxu0 %v11989_v63  ;;  %4813 = vmatpush1.bf16.msra.mxu1 %v11990_v18 }
 0x5d5   :  { %4773 = vmatprep.subr.bf16.mxu0 %v11991_v58  ;;  %4814 = vmatprep.subr.bf16.mxu1 %v11992_v49  ;;  %v11077_v58 = vld [vmem:[#allocation3 + $0x2a0] ss:$16 sps:$4 sm:$0xff]   ;;  %v11079_v49 = vld [vmem:[#allocation3 + $0x2a8] ss:$16 sps:$4 sm:$0xff]  }
 0x5d8   :  { %4774 = vmatpush1.bf16.msra.mxu0 %v11993_v27  ;;  %4815 = vmatpush1.bf16.msra.mxu1 %v11994_v28  ;;  %v11083_v27 = vld [vmem:[#allocation3 + $0x284] ss:$16 sps:$4 sm:$0xff]   ;;  %v11085_v28 = vld [vmem:[#allocation3 + $0x28c] ss:$16 sps:$4 sm:$0xff]  }
 0x5d9   :  { %4775 = vmatprep.subr.bf16.mxu0 %v11995_v21  ;;  %4816 = vmatprep.subr.bf16.mxu1 %v11996_v44  ;;  %v11094_v44 = vld [vmem:[#allocation3 + $0x288] ss:$16 sps:$4 sm:$0xff]  }
 0x5db   :  { %v3990_v48 = vpop.f32.mrf.mxu0  ;;  %v4031_v55 = vpop.f32.mrf.mxu1 }
 0x5dc   :  { %v4038_v35 = vadd.f32 %v3990_v48, %v11997_v8  ;;  %4776 = vmatpush1.bf16.msra.mxu0 %v11998_v56  ;;  %4817 = vmatpush1.bf16.msra.mxu1 %v11999_v61  ;;  %v4040_v17 = vadd.f32 %v4031_v55, %v10118_v14  ;;  %v11098_v48 = vld [vmem:[#allocation3 + $0x264] ss:$16 sps:$4 sm:$0xff]   ;;  %v11100_v55 = vld [vmem:[#allocation3 + $0x26c] ss:$16 sps:$4 sm:$0xff]   ;;  %v11106_v56 = vld [vmem:[#allocation3 + $0x268] ss:$16 sps:$4 sm:$0xff]  }
 0x5dd   :  { %v3992_v10 = vpop.f32.mrf.mxu0  ;;  %v4033_v11 = vpop.f32.mrf.mxu1  ;;  %4777 = vmatprep.subr.bf16.mxu0 %v12000_v57  ;;  %4818 = vmatprep.subr.bf16.mxu1 %v12001_v50  ;;  %v11116_v50 = vld [vmem:[#allocation3 + $0x240] ss:$16 sps:$4 sm:$0xff]  }
 0x5de   :  { %v4042_v42 = vmul.f32 0.5, %v4038_v35  ;;  %v4039_v53 = vadd.f32 %v3992_v10, %v10113_v6  ;;  %v11104_v35 = vld [vmem:[#allocation3 + $0x260] ss:$16 sps:$4 sm:$0xff]   ;;  %v11110_v10 = vld [vmem:[#allocation3 + $0x244] ss:$16 sps:$4 sm:$0xff]  }
 0x5df   :  { %v3994_v59 = vpop.f32.mrf.mxu0  ;;  %v4035_v54 = vpop.f32.mrf.mxu1 }
 0x5e0   :  { %9612 = vtanh.f32 %v4042_v42  ;;  %v4046_v33 = vmul.f32 0.5, %v4039_v53  ;;  %4778 = vmatpush1.bf16.msra.mxu0 %v12002_v9  ;;  %4819 = vmatpush1.bf16.msra.mxu1 %v12003_v13  ;;  %v11118_v42 = vld [vmem:[#allocation3 + $0x248] ss:$16 sps:$4 sm:$0xff]   ;;  %v11122_v53 = vld [vmem:[#allocation3 + $0x224] ss:$16 sps:$4 sm:$0xff]  }
 0x5e1   :  { %v3995_v16 = vpop.f32.mrf.mxu0  ;;  %v4036_v1 = vpop.f32.mrf.mxu1  ;;  %4779 = vmatprep.subr.bf16.mxu0 %v10882_v51  ;;  %4820 = vmatprep.subr.bf16.mxu1 %v12004_v12  ;;  %v4041_v51 = vadd.f32 %v4033_v11, %v11889_v46  ;;  %v11112_v11 = vld [vmem:[#allocation3 + $0x24c] ss:$16 sps:$4 sm:$0xff]   ;;  %v11130_v9 = vld [vmem:[#allocation3 + $0x228] ss:$16 sps:$4 sm:$0xff]  }
 0x5e2   :  { %9614 = vtanh.f32 %v4046_v33  ;;  %v11124_v59 = vld [vmem:[#allocation3 + $0x22c] ss:$16 sps:$4 sm:$0xff]   ;;  %v11128_v33 = vld [vmem:[#allocation3 + $0x220] ss:$16 sps:$4 sm:$0xff]  }
 0x5e3   :  { %9616 = vtanh.f32 %v4040_v17 }
 0x5e4   :  { %4780 = vmatpush1.bf16.msra.mxu0 %v10889_v41  ;;  %4821 = vmatpush1.bf16.msra.mxu1 %v10891_v39  ;;  %v11042_v41 = vld [vmem:[#allocation3 + $0x308] ss:$16 sps:$4 sm:$0xff]   ;;  %v11048_v39 = vld [vmem:[#allocation3 + $0x2ec] ss:$16 sps:$4 sm:$0xff]  }
 0x5e5   :  { %4781 = vmatprep.subr.bf16.mxu0 %v10896_v38  ;;  %4822 = vmatprep.subr.bf16.mxu1 %v10898_v15  ;;  %v11046_v38 = vld [vmem:[#allocation3 + $0x2e4] ss:$16 sps:$4 sm:$0xff]   ;;  %v4051_v15 = vmul.f32 0.5, %v4041_v51 }
 0x5e6   :  { %v9316_v51 = vld [vmem:[#allocation3 + $0x104] ss:$16 sps:$4 sm:$0xff]  }
 0x5e7   :  { %9618 = vtanh.f32 %v4051_v15  ;;  %v9319_v15 = vld [vmem:[#allocation3 + $0x10c] ss:$16 sps:$4 sm:$0xff]  }
 0x5e8   :  { %4782 = vmatpush1.bf16.msra.mxu0 %v10902_v34  ;;  %4823 = vmatpush1.bf16.msra.mxu1 %v10904_v36  ;;  %v11052_v34 = vld [vmem:[#allocation3 + $0x2e0] ss:$16 sps:$4 sm:$0xff]   ;;  %v11054_v36 = vld [vmem:[#allocation3 + $0x2e8] ss:$16 sps:$4 sm:$0xff]  }
 0x5e9   :  { %4783 = vmatprep.subr.bf16.mxu0 %v11033_v19  ;;  %4824 = vmatprep.subr.bf16.mxu1 %v11035_v60 }
 0x5ec   :  { %4784 = vmatpush2.bf16.msra.mxu0 %v11040_v47  ;;  %4825 = vmatpush2.bf16.msra.mxu1 %v11042_v41 }
 0x5ed   :  { %v9613_v2 = vpop.eup %9612  ;;  %4785 = vmatprep.subr.bf16.mxu0 %v11046_v38  ;;  %4826 = vmatprep.subr.bf16.mxu1 %v11048_v39 }
 0x5ee   :  { %v4044_v62 = vadd.f32 1.0, %v9613_v2  ;;  %v9314_v2 = vld [vmem:[#allocation3 + $0x100] ss:$16 sps:$4 sm:$0xff]  }
 0x5ef   :  { %v9615_v43 = vpop.eup %9614 }
 0x5f0   :  { %v4045_v22 = vmul.f32 0.5, %v4044_v62  ;;  %v4048_v29 = vadd.f32 1.0, %v9615_v43  ;;  %4786 = vmatpush2.bf16.msra.mxu0 %v11052_v34  ;;  %4827 = vmatpush2.bf16.msra.mxu1 %v11054_v36  ;;  %v9617_v40 = vpop.eup %9616  ;;  %v9317_v62 = vld [vmem:[#allocation3 + $0x108] ss:$16 sps:$4 sm:$0xff]   ;;  %v9322_v43 = vld [vmem:[#allocation3 + $0xe4] ss:$16 sps:$4 sm:$0xff]  }
 0x5f1   :  { %4787 = vmatprep.subr.bf16.mxu0 %v11058_v23  ;;  %4828 = vmatprep.subr.bf16.mxu1 %v11060_v24 }
 0x5f2   :  { %v4049_v25 = vmul.f32 0.5, %v4048_v29  ;;  %v4056_v18 = vmul.f32 %v9617_v40, %v4045_v22  ;;  %v9325_v22 = vld [vmem:[#allocation3 + $0xec] ss:$16 sps:$4 sm:$0xff]   ;;  %v9320_v29 = vld [vmem:[#allocation3 + $0xe0] ss:$16 sps:$4 sm:$0xff]  }
 0x5f3   :  { %v9331_v40 = vld [vmem:[#allocation3 + $0xcc] ss:$16 sps:$4 sm:$0xff]  }
 0x5f4   :  { %v4055_v63 = vmul.f32 %v4049_v25, %v10929_v32  ;;  %4788 = vmatpush2.bf16.msra.mxu0 %v11064_v20  ;;  %4829 = vmatpush2.bf16.msra.mxu1 %v11066_v30  ;;  %v11092_v32 = vld [vmem:[#allocation3 + $0x280] ss:$16 sps:$4 sm:$0xff]   ;;  %v9619_v61 = vpop.eup %9618  ;;  %v9323_v25 = vld [vmem:[#allocation3 + $0xe8] ss:$16 sps:$4 sm:$0xff]  }
 0x5f5   :  { %4789 = vmatprep.subr.bf16.mxu0 %v11070_v45  ;;  %4830 = vmatprep.subr.bf16.mxu1 %v11072_v31  ;;  %v4053_v57 = vadd.f32 1.0, %v9619_v61  ;;  %v9332_v61 = vld [vmem:[#allocation3 + $0xa0] ss:$16 sps:$4 sm:$0xff]  }
 0x5f6   :  { %v11087_v21 = vadd.f32 %v4056_v18, %v4055_v63  ;;  %v9326_v63 = vld [vmem:[#allocation3 + $0xc0] ss:$16 sps:$4 sm:$0xff]   ;;  %v9329_v18 = vld [vmem:[#allocation3 + $0xc8] ss:$16 sps:$4 sm:$0xff]  }
 0x5f7   :  { %v4054_v54 = vmul.f32 0.5, %v4053_v57  ;;  %v9334_v57 = vld [vmem:[#allocation3 + $0xa4] ss:$16 sps:$4 sm:$0xff]  }
 0x5f8   :  { %9620 = vtanh.f32 %v11087_v21  ;;  %4790 = vmatpush2.bf16.msra.mxu0 %v11077_v58  ;;  %4831 = vmatpush2.bf16.msra.mxu1 %v11079_v49 }
 0x5f9   :  { %4791 = vmatprep.subr.bf16.mxu0 %v11083_v27  ;;  %4832 = vmatprep.subr.bf16.mxu1 %v11085_v28 }
 0x5fc   :  { %4792 = vmatpush2.bf16.msra.mxu0 %v11092_v32  ;;  %4833 = vmatpush2.bf16.msra.mxu1 %v11094_v44 }
 0x5fd   :  { %4793 = vmatprep.subr.bf16.mxu0 %v11098_v48  ;;  %4834 = vmatprep.subr.bf16.mxu1 %v11100_v55 }
 0x600   :  { %4794 = vmatpush2.bf16.msra.mxu0 %v11104_v35  ;;  %4835 = vmatpush2.bf16.msra.mxu1 %v11106_v56 }
 0x601   :  { %4795 = vmatprep.subr.bf16.mxu0 %v11110_v10  ;;  %4836 = vmatprep.subr.bf16.mxu1 %v11112_v11 }
 0x604   :  { %4796 = vmatpush2.bf16.msra.mxu0 %v11116_v50  ;;  %4837 = vmatpush2.bf16.msra.mxu1 %v11118_v42 }
 0x605   :  { %v9621_v13 = vpop.eup %9620  ;;  %4797 = vmatprep.subr.bf16.mxu0 %v11122_v53  ;;  %4838 = vmatprep.subr.bf16.mxu1 %v11124_v59 }
 0x606   :  { %v4059_v16 = vmul.f32 %v9621_v13, %v4054_v54  ;;  %v9335_v54 = vld [vmem:[#allocation3 + $0xa8] ss:$16 sps:$4 sm:$0xff]   ;;  %v9337_v13 = vld [vmem:[#allocation3 + $0xac] ss:$16 sps:$4 sm:$0xff]  }
 0x608   :  { %4798 = vmatpush2.bf16.msra.mxu0 %v11128_v33  ;;  %4839 = vmatpush2.bf16.msra.mxu1 %v11130_v9  ;;  %4060 = vst [vmem:[#allocation2 + $0x8] sm:$0x3] %v4059_v16  ;;  %v4377_v1 = vrot.slane %v4059_v16, 6  ;;  %v9340_v16 = vld [vmem:[#allocation3 + $0x84] ss:$16 sps:$4 sm:$0xff]  }
 0x609   :  { %5068 = vmatprep.subr.bf16.mxu0 %v9316_v51  ;;  %5109 = vmatprep.subr.bf16.mxu1 %v9319_v15  ;;  %v9346_v51 = vld [vmem:[#allocation3 + $0x64] ss:$16 sps:$4 sm:$0xff]   ;;  %v9349_v15 = vld [vmem:[#allocation3 + $0x6c] ss:$16 sps:$4 sm:$0xff]  }
 0x60a   :  { %v4379_v12 = vpack.c.bf16 %v4377_v1, %v4377_v1  ;;  %v9343_v1 = vld [vmem:[#allocation3 + $0x8c] ss:$16 sps:$4 sm:$0xff]  }
 0x60c   :  { %v4445_v17 = vrot.slane %v4379_v12, 1  ;;  %v9338_v12 = vld [vmem:[#allocation3 + $0x80] ss:$16 sps:$4 sm:$0xff]  }
 0x60e   :  { %4799 = vmatprep.mubr.bf16.mxu0 %v4445_v17  ;;  %4840 = vmatprep.mubr.bf16.mxu1 %v4445_v17  ;;  %v9341_v17 = vld [vmem:[#allocation3 + $0x88] ss:$16 sps:$4 sm:$0xff]  }
 0x60f   :  { %4800 = vmatmul.mubr.bf16.vlgmr.msra.gmra.mxu0 %v10998_v4  ;;  %4841 = vmatmul.mubr.bf16.vlgmr.msra.gmra.mxu1 %v10998_v4  ;;  %v9328_v4 = vld [vmem:[#allocation3 + $0xc4] ss:$16 sps:$4 sm:$0xff]  }
 0x610   :  { %5100 = vmatprep.mubr.bf16.mxu0 %v11950_v7  ;;  %5141 = vmatprep.mubr.bf16.mxu1 %v11950_v7  ;;  %v11210_v7 = vld [vmem:[#allocation3 + $0x164] ss:$16 sps:$4 sm:$0xff]  }
 0x611   :  { %5069 = vmatpush1.bf16.msra.mxu0 %v9314_v2  ;;  %5110 = vmatpush1.bf16.msra.mxu1 %v9317_v62  ;;  %v9344_v2 = vld [vmem:[#allocation3 + $0x60] ss:$16 sps:$4 sm:$0xff]   ;;  %v9347_v62 = vld [vmem:[#allocation3 + $0x68] ss:$16 sps:$4 sm:$0xff]   ;;  %12015 = vst [vmem:[#allocation25_spill] sm:$0xff] %v11210_v7 }
 0x612   :  { %5070 = vmatprep.subr.bf16.mxu0 %v9322_v43  ;;  %5111 = vmatprep.subr.bf16.mxu1 %v9325_v22  ;;  %v9352_v43 = vld [vmem:[#allocation3 + $0x44] ss:$16 sps:$4 sm:$0xff]   ;;  %v9355_v22 = vld [vmem:[#allocation3 + $0x4c] ss:$16 sps:$4 sm:$0xff]  }
 0x615   :  { %5071 = vmatpush1.bf16.msra.mxu0 %v9320_v29  ;;  %5112 = vmatpush1.bf16.msra.mxu1 %v9323_v25  ;;  %v9350_v29 = vld [vmem:[#allocation3 + $0x40] ss:$16 sps:$4 sm:$0xff]   ;;  %v9353_v25 = vld [vmem:[#allocation3 + $0x48] ss:$16 sps:$4 sm:$0xff]  }
 0x616   :  { %5072 = vmatprep.subr.bf16.mxu0 %v9328_v4  ;;  %5113 = vmatprep.subr.bf16.mxu1 %v9331_v40  ;;  %v9358_v4 = vld [vmem:[#allocation3 + $0x24] ss:$16 sps:$4 sm:$0xff]   ;;  %v9361_v40 = vld [vmem:[#allocation3 + $0x2c] ss:$16 sps:$4 sm:$0xff]  }
 0x619   :  { %5073 = vmatpush1.bf16.msra.mxu0 %v9326_v63  ;;  %5114 = vmatpush1.bf16.msra.mxu1 %v9329_v18  ;;  %v9356_v63 = vld [vmem:[#allocation3 + $0x20] ss:$16 sps:$4 sm:$0xff]   ;;  %v9359_v18 = vld [vmem:[#allocation3 + $0x28] ss:$16 sps:$4 sm:$0xff]  }
 0x61a   :  { %5074 = vmatprep.subr.bf16.mxu0 %v9334_v57  ;;  %5115 = vmatprep.subr.bf16.mxu1 %v9337_v13  ;;  %v11142_v57 = vld [vmem:[#allocation3 + $0x20c] ss:$16 sps:$4 sm:$0xff]  }
 0x61d   :  { %5075 = vmatpush1.bf16.msra.mxu0 %v9332_v61  ;;  %5116 = vmatpush1.bf16.msra.mxu1 %v9335_v54  ;;  %v11140_v61 = vld [vmem:[#allocation3 + $0x204] ss:$16 sps:$4 sm:$0xff]  }
 0x61e   :  { %5076 = vmatprep.subr.bf16.mxu0 %v9340_v16  ;;  %5117 = vmatprep.subr.bf16.mxu1 %v9343_v1 }
 0x621   :  { %5077 = vmatpush1.bf16.msra.mxu0 %v9338_v12  ;;  %5118 = vmatpush1.bf16.msra.mxu1 %v9341_v17 }
 0x622   :  { %5078 = vmatprep.subr.bf16.mxu0 %v9346_v51  ;;  %5119 = vmatprep.subr.bf16.mxu1 %v9349_v15 }
 0x625   :  { %5079 = vmatpush1.bf16.msra.mxu0 %v9344_v2  ;;  %5120 = vmatpush1.bf16.msra.mxu1 %v9347_v62 }
 0x626   :  { %5080 = vmatprep.subr.bf16.mxu0 %v9352_v43  ;;  %5121 = vmatprep.subr.bf16.mxu1 %v9355_v22 }
 0x629   :  { %5081 = vmatpush1.bf16.msra.mxu0 %v9350_v29  ;;  %5122 = vmatpush1.bf16.msra.mxu1 %v9353_v25 }
 0x62a   :  { %5082 = vmatprep.subr.bf16.mxu0 %v9358_v4  ;;  %5123 = vmatprep.subr.bf16.mxu1 %v9361_v40 }
 0x62d   :  { %5083 = vmatpush1.bf16.msra.mxu0 %v9356_v63  ;;  %5124 = vmatpush1.bf16.msra.mxu1 %v9359_v18 }
 0x62e   :  { %5578 = vmatprep.subr.bf16.mxu0 %v11140_v61  ;;  %5619 = vmatprep.subr.bf16.mxu1 %v11142_v57 }
 0x68b   :  { %v4291_v54 = vpop.f32.mrf.mxu0  ;;  %v4332_v13 = vpop.f32.mrf.mxu1 }
 0x68c   :  { %v4343_v16 = vrot.slane %v4291_v54, 4  ;;  %v4345_v43 = vrot.slane %v4332_v13, 4 }
 0x68d   :  { %v4293_v1 = vpop.f32.mrf.mxu0  ;;  %v4334_v12 = vpop.f32.mrf.mxu1 }
 0x68e   :  { %v4351_v17 = vadd.f32 %v4343_v16, %v11979_v37  ;;  %v4344_v51 = vrot.slane %v4293_v1, 4  ;;  %v4353_v40 = vadd.f32 %v4345_v43, %v11923_v26  ;;  %v4346_v63 = vrot.slane %v4334_v12, 4  ;;  %v11218_v37 = vld [vmem:[#allocation3 + $0x168] ss:$16 sps:$4 sm:$0xff]  }
 0x68f   :  { %v4295_v15 = vpop.f32.mrf.mxu0  ;;  %v4336_v2 = vpop.f32.mrf.mxu1 }
 0x690   :  { %v4355_v62 = vmul.f32 0.5, %v4351_v17  ;;  %v4352_v22 = vadd.f32 %v4344_v51, %v10800_v3  ;;  %v4354_v18 = vadd.f32 %v4346_v63, %v10807_v5  ;;  %v4369_v51 = vrot.slane %v10995_v0, 6  ;;  %v11160_v0 = vld [vmem:[#allocation3 + $0x1e4] ss:$16 sps:$4 sm:$0xff]   ;;  %v11216_v3 = vld [vmem:[#allocation3 + $0x160] ss:$16 sps:$4 sm:$0xff]  }
 0x691   :  { %v4296_v29 = vpop.f32.mrf.mxu0  ;;  %v4337_v25 = vpop.f32.mrf.mxu1 }
 0x692   :  { %9622 = vtanh.f32 %v4355_v62  ;;  %v4359_v4 = vmul.f32 0.5, %v4352_v22  ;;  %v4364_v54 = vmul.f32 0.5, %v4354_v18 }
 0x694   :  { %9624 = vtanh.f32 %v4359_v4 }
 0x695   :  { %9626 = vtanh.f32 %v4353_v40 }
 0x696   :  { %9628 = vtanh.f32 %v4364_v54 }
 0x69f   :  { %v9623_v16 = vpop.eup %9622 }
 0x6a0   :  { %v4357_v1 = vadd.f32 1.0, %v9623_v16  ;;  %v11154_v16 = vld [vmem:[#allocation3 + $0x200] ss:$16 sps:$4 sm:$0xff]  }
 0x6a1   :  { %v9625_v15 = vpop.eup %9624 }
 0x6a2   :  { %v4358_v2 = vmul.f32 0.5, %v4357_v1  ;;  %v4361_v17 = vadd.f32 1.0, %v9625_v15  ;;  %v9627_v29 = vpop.eup %9626  ;;  %v11156_v1 = vld [vmem:[#allocation3 + $0x208] ss:$16 sps:$4 sm:$0xff]   ;;  %v11162_v15 = vld [vmem:[#allocation3 + $0x1ec] ss:$16 sps:$4 sm:$0xff]  }
 0x6a3   :  { %v9629_v12 = vpop.eup %9628 }
 0x6a4   :  { %v4362_v13 = vmul.f32 0.5, %v4361_v17  ;;  %v4372_v22 = vmul.f32 %v9627_v29, %v4358_v2  ;;  %v4366_v43 = vadd.f32 1.0, %v9629_v12  ;;  %v11168_v2 = vld [vmem:[#allocation3 + $0x1e0] ss:$16 sps:$4 sm:$0xff]   ;;  %v11170_v17 = vld [vmem:[#allocation3 + $0x1e8] ss:$16 sps:$4 sm:$0xff]  }
 0x6a5   :  { %v11180_v29 = vld [vmem:[#allocation3 + $0x1c0] ss:$16 sps:$4 sm:$0xff]   ;;  %v11188_v12 = vld [vmem:[#allocation3 + $0x1ac] ss:$16 sps:$4 sm:$0xff]  }
 0x6a6   :  { %v4371_v62 = vmul.f32 %v4369_v51, %v4362_v13  ;;  %v4367_v4 = vmul.f32 0.5, %v4366_v43  ;;  %v11174_v13 = vld [vmem:[#allocation3 + $0x1c4] ss:$16 sps:$4 sm:$0xff]   ;;  %v11176_v51 = vld [vmem:[#allocation3 + $0x1cc] ss:$16 sps:$4 sm:$0xff]   ;;  %12008 = vst [vmem:[#allocation20_spill] sm:$0xff] %v11188_v12 }
 0x6a7   :  { %v11192_v43 = vld [vmem:[#allocation3 + $0x1a0] ss:$16 sps:$4 sm:$0xff]  }
 0x6a8   :  { %v11151_v25 = vadd.f32 %v4372_v22, %v4371_v62  ;;  %v11182_v62 = vld [vmem:[#allocation3 + $0x1c8] ss:$16 sps:$4 sm:$0xff]   ;;  %v11186_v22 = vld [vmem:[#allocation3 + $0x1a4] ss:$16 sps:$4 sm:$0xff]   ;;  %12009 = vst [vmem:[#allocation21_spill] sm:$0xff] %v11192_v43 }
 0x6a9   :  { %12006 = vst [vmem:[#allocation18_spill] sm:$0xff] %v11182_v62  ;;  %12007 = vst [vmem:[#allocation19_spill] sm:$0xff] %v11186_v22 }
 0x6aa   :  { %12005 = vst [vmem:[#allocation17_spill] sm:$0xff] %v11151_v25  ;;  %9630 = vtanh.f32 %v11151_v25  ;;  %v11212_v25 = vld [vmem:[#allocation3 + $0x16c] ss:$16 sps:$4 sm:$0xff]  }
 0x6ab   :  { %12016 = vst [vmem:[#allocation27_spill] sm:$0xff] %v11212_v25 }
 0x6b7   :  { %v9631_v40 = vpop.eup %9630 }
 0x6b8   :  { %v4375_v63 = vmul.f32 %v9631_v40, %v4367_v4  ;;  %v11194_v4 = vld [vmem:[#allocation3 + $0x1a8] ss:$16 sps:$4 sm:$0xff]   ;;  %v11198_v40 = vld [vmem:[#allocation3 + $0x184] ss:$16 sps:$4 sm:$0xff]  }
 0x6b9   :  { %12010 = vst [vmem:[#allocation22_spill] sm:$0xff] %v11194_v4  ;;  %12011 = vst [vmem:[#allocation23_spill] sm:$0xff] %v11198_v40 }
 0x6ba   :  { %v4872_v18 = vpack.c.bf16 %v4375_v63, %v4375_v63  ;;  %v11200_v63 = vld [vmem:[#allocation3 + $0x18c] ss:$16 sps:$4 sm:$0xff]  }
 0x6bb   :  { %12012 = vst [vmem:[#allocation24_spill] sm:$0xff] %v11200_v63 }
 0x6bc   :  { %v11158_v54 = vrot.slane %v4872_v18, 2  ;;  %v11204_v18 = vld [vmem:[#allocation3 + $0x180] ss:$16 sps:$4 sm:$0xff]  }
 0x6bd   :  { %12013 = vst [vmem:[#allocation26_spill] sm:$0xff] %v11204_v18 }
 0x6be   :  { %5101 = vmatmul.mubr.bf16.vlgmr.msra.gmra.mxu0 %v11158_v54  ;;  %5142 = vmatmul.mubr.bf16.vlgmr.msra.gmra.mxu1 %v11158_v54 }
 0x6bf   :  { %5579 = vmatpush1.bf16.msra.mxu0 %v11154_v16  ;;  %5620 = vmatpush1.bf16.msra.mxu1 %v11156_v1 }
 0x6c0   :  { %5580 = vmatprep.subr.bf16.mxu0 %v11160_v0  ;;  %5621 = vmatprep.subr.bf16.mxu1 %v11162_v15 }
 0x6c3   :  { %5581 = vmatpush1.bf16.msra.mxu0 %v11168_v2  ;;  %5622 = vmatpush1.bf16.msra.mxu1 %v11170_v17 }
 0x6c4   :  { %5582 = vmatprep.subr.bf16.mxu0 %v11174_v13  ;;  %5623 = vmatprep.subr.bf16.mxu1 %v11176_v51 }
 0x6c7   :  { %5583 = vmatpush1.bf16.msra.mxu0 %v11180_v29  ;;  %5624 = vmatpush1.bf16.msra.mxu1 %v11182_v62 }
 0x6c8   :  { %5584 = vmatprep.subr.bf16.mxu0 %v11186_v22  ;;  %5625 = vmatprep.subr.bf16.mxu1 %v11188_v12 }
 0x6cb   :  { %5585 = vmatpush1.bf16.msra.mxu0 %v11192_v43  ;;  %5626 = vmatpush1.bf16.msra.mxu1 %v11194_v4 }
 0x6cc   :  { %5586 = vmatprep.subr.bf16.mxu0 %v11198_v40  ;;  %5627 = vmatprep.subr.bf16.mxu1 %v11200_v63  ;;  %v11223_v63 = vld [vmem:[#allocation3 + $0x144] ss:$16 sps:$4 sm:$0xff]   ;;  %v11225_v40 = vld [vmem:[#allocation3 + $0x14c] ss:$16 sps:$4 sm:$0xff]  }
 0x6cf   :  { %v4801_v5 = vpop.f32.mrf.mxu0  ;;  %v4842_v26 = vpop.f32.mrf.mxu1  ;;  %5587 = vmatpush1.bf16.msra.mxu0 %v11204_v18  ;;  %5628 = vmatpush1.bf16.msra.mxu1 %v11206_v52 }
 0x6d0   :  { %v4849_v4 = vadd.f32 %v4801_v5, %v11997_v8  ;;  %5588 = vmatprep.subr.bf16.mxu0 %v11210_v7  ;;  %5629 = vmatprep.subr.bf16.mxu1 %v11212_v25  ;;  %v11230_v5 = vld [vmem:[#allocation3 + $0x140] ss:$16 sps:$4 sm:$0xff]   ;;  %v11232_v8 = vld [vmem:[#allocation3 + $0x148] ss:$16 sps:$4 sm:$0xff]   ;;  %v11236_v7 = vld [vmem:[#allocation3 + $0x124] ss:$16 sps:$4 sm:$0xff]  }
 0x6d1   :  { %v4803_v43 = vpop.f32.mrf.mxu0  ;;  %v4844_v12 = vpop.f32.mrf.mxu1 }
 0x6d2   :  { %v4853_v22 = vmul.f32 0.5, %v4849_v4  ;;  %v4850_v18 = vadd.f32 %v4803_v43, %v10113_v6  ;;  %v11238_v4 = vld [vmem:[#allocation3 + $0x12c] ss:$16 sps:$4 sm:$0xff]   ;;  %v4851_v43 = vadd.f32 %v4842_v26, %v10118_v14  ;;  %v11243_v6 = vld [vmem:[#allocation3 + $0x120] ss:$16 sps:$4 sm:$0xff]   ;;  %v4852_v26 = vadd.f32 %v4844_v12, %v11889_v46 }
 0x6d3   :  { %v4805_v52 = vpop.f32.mrf.mxu0  ;;  %v4846_v62 = vpop.f32.mrf.mxu1  ;;  %5589 = vmatpush1.bf16.msra.mxu0 %v11216_v3  ;;  %5630 = vmatpush1.bf16.msra.mxu1 %v11218_v37 }
 0x6d4   :  { %9632 = vtanh.f32 %v4853_v22  ;;  %v4857_v25 = vmul.f32 0.5, %v4850_v18  ;;  %5590 = vmatprep.subr.bf16.mxu0 %v11223_v63  ;;  %5631 = vmatprep.subr.bf16.mxu1 %v11225_v40  ;;  %v11245_v22 = vld [vmem:[#allocation3 + $0x128] ss:$16 sps:$4 sm:$0xff]  }
 0x6d5   :  { %v4806_v52 = vpop.f32.mrf.mxu0  ;;  %v4847_v62 = vpop.f32.mrf.mxu1 }
 0x6d6   :  { %9634 = vtanh.f32 %v4857_v25  ;;  %v4862_v25 = vmul.f32 0.5, %v4852_v26  ;;  %v9455_v26 = vld [vmem:[#allocation3 + $0x228] ss:$16 sps:$4 sm:$0xff]  }
 0x6d7   :  { %5591 = vmatpush1.bf16.msra.mxu0 %v11230_v5  ;;  %5632 = vmatpush1.bf16.msra.mxu1 %v11232_v8  ;;  %9636 = vtanh.f32 %v4851_v43  ;;  %v9457_v43 = vld [vmem:[#allocation3 + $0x22c] ss:$16 sps:$4 sm:$0xff]  }
 0x6d8   :  { %5592 = vmatprep.subr.bf16.mxu0 %v11236_v7  ;;  %5633 = vmatprep.subr.bf16.mxu1 %v11238_v4  ;;  %9638 = vtanh.f32 %v4862_v25 }
 0x6db   :  { %5593 = vmatpush1.bf16.msra.mxu0 %v11243_v6  ;;  %5634 = vmatpush1.bf16.msra.mxu1 %v11245_v22 }
 0x6dc   :  { %5594 = vmatprep.subr.bf16.mxu0 %v11033_v19  ;;  %5635 = vmatprep.subr.bf16.mxu1 %v11035_v60 }
 0x6df   :  { %5595 = vmatpush2.bf16.msra.mxu0 %v11040_v47  ;;  %5636 = vmatpush2.bf16.msra.mxu1 %v11042_v41 }
 0x6e0   :  { %5596 = vmatprep.subr.bf16.mxu0 %v11046_v38  ;;  %5637 = vmatprep.subr.bf16.mxu1 %v11048_v39 }
 0x6e1   :  { %v9633_v18 = vpop.eup %9632 }
 0x6e2   :  { %v4855_v52 = vadd.f32 1.0, %v9633_v18 }
 0x6e3   :  { %v9635_v62 = vpop.eup %9634  ;;  %5597 = vmatpush2.bf16.msra.mxu0 %v11052_v34  ;;  %5638 = vmatpush2.bf16.msra.mxu1 %v11054_v36 }
 0x6e4   :  { %v4856_v12 = vmul.f32 0.5, %v4855_v52  ;;  %v4859_v19 = vadd.f32 1.0, %v9635_v62  ;;  %5598 = vmatprep.subr.bf16.mxu0 %v11058_v23  ;;  %5639 = vmatprep.subr.bf16.mxu1 %v11060_v24  ;;  %v9637_v47 = vpop.eup %9636 }
 0x6e5   :  { %v9639_v34 = vpop.eup %9638 }
 0x6e6   :  { %v4860_v60 = vmul.f32 0.5, %v4859_v19  ;;  %v4867_v38 = vmul.f32 %v9637_v47, %v4856_v12  ;;  %v4864_v36 = vadd.f32 1.0, %v9639_v34  ;;  %v12028_v19 = vld [vmem:[#allocation14_spill] sm:$0xff] }
 0x6e7   :  { %5599 = vmatpush2.bf16.msra.mxu0 %v11064_v20  ;;  %5640 = vmatpush2.bf16.msra.mxu1 %v11066_v30 }
 0x6e8   :  { %v4866_v41 = vmul.f32 %v4860_v60, %v11087_v21  ;;  %5600 = vmatprep.subr.bf16.mxu0 %v11070_v45  ;;  %5641 = vmatprep.subr.bf16.mxu1 %v11072_v31  ;;  %v4865_v23 = vmul.f32 0.5, %v4864_v36  ;;  %v12021_v21 = vld [vmem:[#allocation22_spill] sm:$0xff] }
 0x6ea   :  { %v11267_v39 = vadd.f32 %v4867_v38, %v4866_v41 }
 0x6eb   :  { %5601 = vmatpush2.bf16.msra.mxu0 %v11077_v58  ;;  %5642 = vmatpush2.bf16.msra.mxu1 %v11079_v49  ;;  %v12017_v58 = vld [vmem:[#allocation18_spill] sm:$0xff]  ;;  %v12018_v49 = vld [vmem:[#allocation19_spill] sm:$0xff] }
 0x6ec   :  { %9640 = vtanh.f32 %v11267_v39  ;;  %5602 = vmatprep.subr.bf16.mxu0 %v11083_v27  ;;  %5643 = vmatprep.subr.bf16.mxu1 %v11085_v28  ;;  %v12019_v27 = vld [vmem:[#allocation20_spill] sm:$0xff]  ;;  %v12020_v28 = vld [vmem:[#allocation21_spill] sm:$0xff] }
 0x6ef   :  { %5603 = vmatpush2.bf16.msra.mxu0 %v11092_v32  ;;  %5644 = vmatpush2.bf16.msra.mxu1 %v11094_v44  ;;  %v12022_v32 = vld [vmem:[#allocation23_spill] sm:$0xff]  ;;  %v12023_v44 = vld [vmem:[#allocation24_spill] sm:$0xff] }
 0x6f0   :  { %5604 = vmatprep.subr.bf16.mxu0 %v11098_v48  ;;  %5645 = vmatprep.subr.bf16.mxu1 %v11100_v55  ;;  %v12024_v48 = vld [vmem:[#allocation26_spill] sm:$0xff]  ;;  %v12025_v55 = vld [vmem:[#allocation33_spill] sm:$0xff] }
 0x6f3   :  { %5605 = vmatpush2.bf16.msra.mxu0 %v11104_v35  ;;  %5646 = vmatpush2.bf16.msra.mxu1 %v11106_v56  ;;  %v12026_v35 = vld [vmem:[#allocation25_spill] sm:$0xff]  ;;  %v12027_v56 = vld [vmem:[#allocation27_spill] sm:$0xff] }
 0x6f4   :  { %5606 = vmatprep.subr.bf16.mxu0 %v11110_v10  ;;  %5647 = vmatprep.subr.bf16.mxu1 %v11112_v11  ;;  %v9412_v10 = vld [vmem:[#allocation3 + $0x304] ss:$16 sps:$4 sm:$0xff]   ;;  %v9410_v11 = vld [vmem:[#allocation3 + $0x300] ss:$16 sps:$4 sm:$0xff]  }
 0x6f7   :  { %5607 = vmatpush2.bf16.msra.mxu0 %v11116_v50  ;;  %5648 = vmatpush2.bf16.msra.mxu1 %v11118_v42  ;;  %v9418_v50 = vld [vmem:[#allocation3 + $0x2e4] ss:$16 sps:$4 sm:$0xff]   ;;  %v9421_v42 = vld [vmem:[#allocation3 + $0x2ec] ss:$16 sps:$4 sm:$0xff]  }
 0x6f8   :  { %5608 = vmatprep.subr.bf16.mxu0 %v11122_v53  ;;  %5649 = vmatprep.subr.bf16.mxu1 %v11124_v59  ;;  %v9416_v53 = vld [vmem:[#allocation3 + $0x2e0] ss:$16 sps:$4 sm:$0xff]  }
 0x6f9   :  { %v9641_v24 = vpop.eup %9640  ;;  %v9422_v59 = vld [vmem:[#allocation3 + $0x2c0] ss:$16 sps:$4 sm:$0xff]  }
 0x6fa   :  { %v4870_v20 = vmul.f32 %v9641_v24, %v4865_v23  ;;  %v12029_v23 = vld [vmem:[#allocation50_spill] sm:$0xff] }
 0x6fb   :  { %5609 = vmatpush2.bf16.msra.mxu0 %v11128_v33  ;;  %5650 = vmatpush2.bf16.msra.mxu1 %v11130_v9  ;;  %v9425_v33 = vld [vmem:[#allocation3 + $0x2c8] ss:$16 sps:$4 sm:$0xff]   ;;  %v9430_v9 = vld [vmem:[#allocation3 + $0x2a4] ss:$16 sps:$4 sm:$0xff]  }
 0x6fc   :  { %4871 = vst [vmem:[#allocation2 + $0xa] sm:$0x3] %v4870_v20  ;;  %v5188_v30 = vrot.slane %v4870_v20, 4  ;;  %6078 = vmatprep.subr.bf16.mxu0 %v11140_v61  ;;  %6119 = vmatprep.subr.bf16.mxu1 %v11142_v57  ;;  %v9428_v61 = vld [vmem:[#allocation3 + $0x2a0] ss:$16 sps:$4 sm:$0xff]  }
 0x6fd   :  { %v9431_v57 = vld [vmem:[#allocation3 + $0x2a8] ss:$16 sps:$4 sm:$0xff]  }
 0x6fe   :  { %v5190_v45 = vpack.c.bf16 %v5188_v30, %v5188_v30 }
 0x700   :  { %v5256_v31 = vrot.slane %v5190_v45, 2  ;;  %v12030_v45 = vld [vmem:[#allocation15_spill] sm:$0xff] }
 0x702   :  { %5610 = vmatprep.mubr.bf16.mxu0 %v5256_v31  ;;  %5651 = vmatprep.mubr.bf16.mxu1 %v5256_v31 }
 0x703   :  { %5611 = vmatmul.mubr.bf16.vlgmr.msra.gmra.mxu0 %v11158_v54  ;;  %5652 = vmatmul.mubr.bf16.vlgmr.msra.gmra.mxu1 %v11158_v54  ;;  %v9439_v54 = vld [vmem:[#allocation3 + $0x28c] ss:$16 sps:$4 sm:$0xff]  }
 0x704   :  { %6079 = vmatpush1.bf16.msra.mxu0 %v11154_v16  ;;  %6120 = vmatpush1.bf16.msra.mxu1 %v11156_v1  ;;  %v9433_v16 = vld [vmem:[#allocation3 + $0x2ac] ss:$16 sps:$4 sm:$0xff]   ;;  %v9436_v1 = vld [vmem:[#allocation3 + $0x284] ss:$16 sps:$4 sm:$0xff]  }
 0x705   :  { %6080 = vmatprep.subr.bf16.mxu0 %v11160_v0  ;;  %6121 = vmatprep.subr.bf16.mxu1 %v11162_v15  ;;  %v9434_v0 = vld [vmem:[#allocation3 + $0x280] ss:$16 sps:$4 sm:$0xff]   ;;  %v9437_v15 = vld [vmem:[#allocation3 + $0x288] ss:$16 sps:$4 sm:$0xff]  }
 0x708   :  { %6081 = vmatpush1.bf16.msra.mxu0 %v11168_v2  ;;  %6122 = vmatpush1.bf16.msra.mxu1 %v11170_v17  ;;  %v9442_v2 = vld [vmem:[#allocation3 + $0x264] ss:$16 sps:$4 sm:$0xff]   ;;  %v9445_v17 = vld [vmem:[#allocation3 + $0x26c] ss:$16 sps:$4 sm:$0xff]  }
 0x709   :  { %6082 = vmatprep.subr.bf16.mxu0 %v11174_v13  ;;  %6123 = vmatprep.subr.bf16.mxu1 %v11176_v51  ;;  %v9440_v13 = vld [vmem:[#allocation3 + $0x260] ss:$16 sps:$4 sm:$0xff]   ;;  %v9443_v51 = vld [vmem:[#allocation3 + $0x268] ss:$16 sps:$4 sm:$0xff]  }
 0x70c   :  { %6083 = vmatpush1.bf16.msra.mxu0 %v11180_v29  ;;  %6124 = vmatpush1.bf16.msra.mxu1 %v12017_v58  ;;  %v9448_v29 = vld [vmem:[#allocation3 + $0x244] ss:$16 sps:$4 sm:$0xff]  }
 0x70d   :  { %6084 = vmatprep.subr.bf16.mxu0 %v12018_v49  ;;  %6125 = vmatprep.subr.bf16.mxu1 %v12019_v27  ;;  %v12031_v27 = vld [vmem:[#allocation51_spill] sm:$0xff] }
 0x710   :  { %6085 = vmatpush1.bf16.msra.mxu0 %v12020_v28  ;;  %6126 = vmatpush1.bf16.msra.mxu1 %v12021_v21 }
 0x711   :  { %6086 = vmatprep.subr.bf16.mxu0 %v12022_v32  ;;  %6127 = vmatprep.subr.bf16.mxu1 %v12023_v44 }
 0x714   :  { %6087 = vmatpush1.bf16.msra.mxu0 %v12024_v48  ;;  %6128 = vmatpush1.bf16.msra.mxu1 %v12025_v55 }
 0x715   :  { %6088 = vmatprep.subr.bf16.mxu0 %v12026_v35  ;;  %6129 = vmatprep.subr.bf16.mxu1 %v12027_v56 }
 0x718   :  { %6089 = vmatpush1.bf16.msra.mxu0 %v11216_v3  ;;  %6130 = vmatpush1.bf16.msra.mxu1 %v11218_v37  ;;  %v9415_v3 = vld [vmem:[#allocation3 + $0x30c] ss:$16 sps:$4 sm:$0xff]   ;;  %v9413_v37 = vld [vmem:[#allocation3 + $0x308] ss:$16 sps:$4 sm:$0xff]  }
 0x719   :  { %6090 = vmatprep.subr.bf16.mxu0 %v11223_v63  ;;  %6131 = vmatprep.subr.bf16.mxu1 %v11225_v40  ;;  %v9451_v40 = vld [vmem:[#allocation3 + $0x24c] ss:$16 sps:$4 sm:$0xff]   ;;  %v9446_v63 = vld [vmem:[#allocation3 + $0x240] ss:$16 sps:$4 sm:$0xff]  }
 0x71c   :  { %6091 = vmatpush1.bf16.msra.mxu0 %v11230_v5  ;;  %6132 = vmatpush1.bf16.msra.mxu1 %v11232_v8  ;;  %v9419_v8 = vld [vmem:[#allocation3 + $0x2e8] ss:$16 sps:$4 sm:$0xff]  }
 0x71d   :  { %6092 = vmatprep.subr.bf16.mxu0 %v11236_v7  ;;  %6133 = vmatprep.subr.bf16.mxu1 %v11238_v4  ;;  %v9424_v7 = vld [vmem:[#allocation3 + $0x2c4] ss:$16 sps:$4 sm:$0xff]   ;;  %v9449_v5 = vld [vmem:[#allocation3 + $0x248] ss:$16 sps:$4 sm:$0xff]  }
 0x71e   :  { %v9454_v4 = vld [vmem:[#allocation3 + $0x224] ss:$16 sps:$4 sm:$0xff]  }
 0x720   :  { %6093 = vmatpush1.bf16.msra.mxu0 %v11243_v6  ;;  %6134 = vmatpush1.bf16.msra.mxu1 %v11245_v22  ;;  %v9427_v6 = vld [vmem:[#allocation3 + $0x2cc] ss:$16 sps:$4 sm:$0xff]   ;;  %v9452_v22 = vld [vmem:[#allocation3 + $0x220] ss:$16 sps:$4 sm:$0xff]  }
 0x721   :  { %6094 = vmatprep.subr.bf16.mxu0 %v9412_v10  ;;  %6135 = vmatprep.subr.bf16.mxu1 %v9415_v3  ;;  %v12032_v3 = vld [vmem:[#allocation17_spill] sm:$0xff] }
 0x724   :  { %6095 = vmatpush2.bf16.msra.mxu0 %v9410_v11  ;;  %6136 = vmatpush2.bf16.msra.mxu1 %v9413_v37  ;;  %v5180_v11 = vrot.slane %v12032_v3, 6 }
 0x725   :  { %6096 = vmatprep.subr.bf16.mxu0 %v9418_v50  ;;  %6137 = vmatprep.subr.bf16.mxu1 %v9421_v42 }
 0x728   :  { %6097 = vmatpush2.bf16.msra.mxu0 %v9416_v53  ;;  %6138 = vmatpush2.bf16.msra.mxu1 %v9419_v8 }
 0x729   :  { %6098 = vmatprep.subr.bf16.mxu0 %v9424_v7  ;;  %6139 = vmatprep.subr.bf16.mxu1 %v9427_v6 }
 0x72c   :  { %6099 = vmatpush2.bf16.msra.mxu0 %v9422_v59  ;;  %6140 = vmatpush2.bf16.msra.mxu1 %v9425_v33 }
 0x72d   :  { %6100 = vmatprep.subr.bf16.mxu0 %v9430_v9  ;;  %6141 = vmatprep.subr.bf16.mxu1 %v9433_v16 }
 0x730   :  { %6101 = vmatpush2.bf16.msra.mxu0 %v9428_v61  ;;  %6142 = vmatpush2.bf16.msra.mxu1 %v9431_v57  ;;  %v12033_v61 = vld [vmem:[#allocation30_spill] sm:$0xff] }
 0x731   :  { %6102 = vmatprep.subr.bf16.mxu0 %v9436_v1  ;;  %6143 = vmatprep.subr.bf16.mxu1 %v9439_v54 }
 0x734   :  { %6103 = vmatpush2.bf16.msra.mxu0 %v9434_v0  ;;  %6144 = vmatpush2.bf16.msra.mxu1 %v9437_v15  ;;  %v12034_v0 = vld [vmem:[#allocation31_spill] sm:$0xff] }
 0x735   :  { %6104 = vmatprep.subr.bf16.mxu0 %v9442_v2  ;;  %6145 = vmatprep.subr.bf16.mxu1 %v9445_v17 }
 0x738   :  { %6105 = vmatpush2.bf16.msra.mxu0 %v9440_v13  ;;  %6146 = vmatpush2.bf16.msra.mxu1 %v9443_v51 }
 0x739   :  { %6106 = vmatprep.subr.bf16.mxu0 %v9448_v29  ;;  %6147 = vmatprep.subr.bf16.mxu1 %v9451_v40 }
 0x73c   :  { %6107 = vmatpush2.bf16.msra.mxu0 %v9446_v63  ;;  %6148 = vmatpush2.bf16.msra.mxu1 %v9449_v5 }
 0x73d   :  { %6108 = vmatprep.subr.bf16.mxu0 %v9454_v4  ;;  %6149 = vmatprep.subr.bf16.mxu1 %v9457_v43 }
 0x740   :  { %6109 = vmatpush2.bf16.msra.mxu0 %v9452_v22  ;;  %6150 = vmatpush2.bf16.msra.mxu1 %v9455_v26 }
 0x77e   :  { %v5102_v25 = vpop.f32.mrf.mxu0  ;;  %v5143_v18 = vpop.f32.mrf.mxu1 }
 0x77f   :  { %v5154_v52 = vrot.slane %v5102_v25, 2  ;;  %v5156_v47 = vrot.slane %v5143_v18, 2 }
 0x780   :  { %v5104_v62 = vpop.f32.mrf.mxu0  ;;  %v5145_v12 = vpop.f32.mrf.mxu1 }
 0x781   :  { %v5162_v60 = vadd.f32 %v5154_v52, %v12028_v19  ;;  %v5155_v41 = vrot.slane %v5104_v62, 2  ;;  %v5164_v31 = vadd.f32 %v5156_v47, %v12030_v45  ;;  %v5157_v49 = vrot.slane %v5145_v12, 2 }
 0x782   :  { %v5106_v38 = vpop.f32.mrf.mxu0  ;;  %v5147_v34 = vpop.f32.mrf.mxu1  ;;  %v12035_v45 = vmov 0  }
 0x783   :  { %v5166_v36 = vmul.f32 0.5, %v5162_v60  ;;  %v5163_v24 = vadd.f32 %v5155_v41, %v12029_v23  ;;  %v5165_v28 = vadd.f32 %v5157_v49, %v12031_v27 }
 0x784   :  { %v5107_v20 = vpop.f32.mrf.mxu0  ;;  %v5148_v30 = vpop.f32.mrf.mxu1 }
 0x785   :  { %9642 = vtanh.f32 %v5166_v36  ;;  %v5170_v58 = vmul.f32 0.5, %v5163_v24  ;;  %v5175_v21 = vmul.f32 0.5, %v5165_v28 }
 0x787   :  { %9644 = vtanh.f32 %v5170_v58 }
 0x788   :  { %9646 = vtanh.f32 %v5164_v31 }
 0x789   :  { %9648 = vtanh.f32 %v5175_v21 }
 0x792   :  { %v9643_v32 = vpop.eup %9642 }
 0x793   :  { %v5168_v44 = vadd.f32 1.0, %v9643_v32 }
 0x794   :  { %v9645_v48 = vpop.eup %9644 }
 0x795   :  { %v5169_v55 = vmul.f32 0.5, %v5168_v44  ;;  %v5172_v35 = vadd.f32 1.0, %v9645_v48  ;;  %v9647_v56 = vpop.eup %9646 }
 0x796   :  { %v9649_v53 = vpop.eup %9648 }
 0x797   :  { %v5173_v10 = vmul.f32 0.5, %v5172_v35  ;;  %v5183_v37 = vmul.f32 %v9647_v56, %v5169_v55  ;;  %v5177_v8 = vadd.f32 1.0, %v9649_v53 }
 0x799   :  { %v5182_v50 = vmul.f32 %v5180_v11, %v5173_v10  ;;  %v5178_v7 = vmul.f32 0.5, %v5177_v8 }
 0x79b   :  { %v5184_v42 = vadd.f32 %v5183_v37, %v5182_v50 }
 0x79d   :  { %9650 = vtanh.f32 %v5184_v42 }
 0x7aa   :  { %v9651_v6 = vpop.eup %9650 }
 0x7ab   :  { %v5186_v59 = vmul.f32 %v9651_v6, %v5178_v7 }
 0x7ad   :  { %v5686_v23 = vpack.c.bf16 %v5186_v59, %v5186_v59 }
 0x7af   :  { %v5754_v30 = vrot.slane %v5686_v23, 3  ;;  %v9489_v23 = vld [vmem:[#allocation5 + $0x8] ss:$16 sps:$4 sm:$0xff]  }
 0x7c3   :  { %v5612_v33 = vpop.f32.mrf.mxu0  ;;  %v5653_v9 = vpop.f32.mrf.mxu1 }
 0x7c4   :  { %v5660_v57 = vadd.f32 %v5612_v33, %v12033_v61  ;;  %v5662_v40 = vadd.f32 %v5653_v9, %v10118_v14 }
 0x7c5   :  { %v5614_v16 = vpop.f32.mrf.mxu0  ;;  %v5655_v1 = vpop.f32.mrf.mxu1 }
 0x7c6   :  { %v5664_v54 = vmul.f32 0.5, %v5660_v57  ;;  %v5661_v15 = vadd.f32 %v5614_v16, %v12034_v0  ;;  %v5663_v63 = vadd.f32 %v5655_v1, %v11889_v46  ;;  %v9458_v1 = vld [vmem:[#allocation5 + $0xe0] ss:$16 sps:$4 sm:$0xff]  }
 0x7c7   :  { %v5616_v2 = vpop.f32.mrf.mxu0  ;;  %v5657_v17 = vpop.f32.mrf.mxu1 }
 0x7c8   :  { %9652 = vtanh.f32 %v5664_v54  ;;  %v5668_v13 = vmul.f32 0.5, %v5661_v15  ;;  %v5673_v5 = vmul.f32 0.5, %v5663_v63  ;;  %v9460_v54 = vld [vmem:[#allocation5 + $0xe4] ss:$16 sps:$4 sm:$0xff]   ;;  %v9461_v15 = vld [vmem:[#allocation5 + $0xe8] ss:$16 sps:$4 sm:$0xff]  }
 0x7c9   :  { %v5617_v51 = vpop.f32.mrf.mxu0  ;;  %v5658_v29 = vpop.f32.mrf.mxu1  ;;  %v9464_v2 = vld [vmem:[#allocation5 + $0xc4] ss:$16 sps:$4 sm:$0xff]   ;;  %6393 = vmatprep.subr.bf16.mxu0 %v9460_v54  ;;  %v9462_v17 = vld [vmem:[#allocation5 + $0xc0] ss:$16 sps:$4 sm:$0xff]   ;;  %v12039_v54 = vld [vmem:[#allocation12_spill] sm:$0xff] }
 0x7ca   :  { %9654 = vtanh.f32 %v5668_v13  ;;  %v9465_v13 = vld [vmem:[#allocation5 + $0xc8] ss:$16 sps:$4 sm:$0xff]  }
 0x7cb   :  { %9656 = vtanh.f32 %v5662_v40 }
 0x7cc   :  { %9658 = vtanh.f32 %v5673_v5  ;;  %v9468_v5 = vld [vmem:[#allocation5 + $0xa4] ss:$16 sps:$4 sm:$0xff]  }
 0x7d5   :  { %v9653_v4 = vpop.eup %9652 }
 0x7d6   :  { %v5666_v43 = vadd.f32 1.0, %v9653_v4  ;;  %v9466_v4 = vld [vmem:[#allocation5 + $0xa0] ss:$16 sps:$4 sm:$0xff]  }
 0x7d7   :  { %v9655_v22 = vpop.eup %9654 }
 0x7d8   :  { %v5667_v26 = vmul.f32 0.5, %v5666_v43  ;;  %v5670_v25 = vadd.f32 1.0, %v9655_v22  ;;  %v9657_v52 = vpop.eup %9656  ;;  %v9469_v43 = vld [vmem:[#allocation5 + $0xa8] ss:$16 sps:$4 sm:$0xff]   ;;  %v9470_v22 = vld [vmem:[#allocation5 + $0x80] ss:$16 sps:$4 sm:$0xff]  }
 0x7d9   :  { %v9659_v60 = vpop.eup %9658 }
 0x7da   :  { %v5671_v18 = vmul.f32 0.5, %v5670_v25  ;;  %v5678_v12 = vmul.f32 %v9657_v52, %v5667_v26  ;;  %v5675_v47 = vadd.f32 1.0, %v9659_v60  ;;  %v9472_v26 = vld [vmem:[#allocation5 + $0x84] ss:$16 sps:$4 sm:$0xff]   ;;  %v9473_v25 = vld [vmem:[#allocation5 + $0x88] ss:$16 sps:$4 sm:$0xff]  }
 0x7db   :  { %v9474_v52 = vld [vmem:[#allocation5 + $0x60] ss:$16 sps:$4 sm:$0xff]   ;;  %v9481_v60 = vld [vmem:[#allocation5 + $0x48] ss:$16 sps:$4 sm:$0xff]  }
 0x7dc   :  { %v5677_v62 = vmul.f32 %v5671_v18, %v11267_v39  ;;  %v5676_v41 = vmul.f32 0.5, %v5675_v47  ;;  %v9476_v18 = vld [vmem:[#allocation5 + $0x64] ss:$16 sps:$4 sm:$0xff]  }
 0x7dd   :  { %v9484_v47 = vld [vmem:[#allocation5 + $0x24] ss:$16 sps:$4 sm:$0xff]  }
 0x7de   :  { %v5679_v19 = vadd.f32 %v5678_v12, %v5677_v62  ;;  %v9477_v62 = vld [vmem:[#allocation5 + $0x68] ss:$16 sps:$4 sm:$0xff]   ;;  %v9480_v12 = vld [vmem:[#allocation5 + $0x44] ss:$16 sps:$4 sm:$0xff]  }
 0x7e0   :  { %9660 = vtanh.f32 %v5679_v19 }
 0x7ed   :  { %v9661_v38 = vpop.eup %9660 }
 0x7ee   :  { %v5681_v34 = vmul.f32 %v9661_v38, %v5676_v41  ;;  %v9482_v41 = vld [vmem:[#allocation5 + $0x20] ss:$16 sps:$4 sm:$0xff]   ;;  %v9485_v38 = vld [vmem:[#allocation5 + $0x28] ss:$16 sps:$4 sm:$0xff]  }
 0x7f0   :  { %5682 = vst [vmem:[#allocation2 + $0xc] sm:$0x3] %v5681_v34  ;;  %v5684_v36 = vrot.slane %v5681_v34, 2  ;;  %v9488_v34 = vld [vmem:[#allocation5 + $0x4] ss:$16 sps:$4 sm:$0xff]  }
 0x7f2   :  { %v5687_v24 = vpack.c.bf16 %v5684_v36, %v5684_v36  ;;  %v9486_v36 = vld [vmem:[#allocation5] ss:$16 sps:$4 sm:$0xff]  }
 0x7f4   :  { %v5755_v20 = vrot.slane %v5687_v24, 3  ;;  %v6199_v24 = vpop.xlane.xlu1 %6198 }
 0x7f6   :  { %6110 = vmatprep.mubr.bf16.mxu0 %v5755_v20  ;;  %6151 = vmatprep.mubr.bf16.mxu1 %v5755_v20  ;;  %v6202_v20 = vmul.f32 0.0078125, %v6199_v24 }
 0x7f7   :  { %6111 = vmatmul.mubr.bf16.vlgmr.msra.gmra.mxu0 %v5754_v30  ;;  %6152 = vmatmul.mubr.bf16.vlgmr.msra.gmra.mxu1 %v5754_v30 }
 0x7f8   :  { %6425 = vmatprep.mubr.bf16.mxu0 %v12035_v45  ;;  %6394 = vmatpush1.bf16.msra.mxu0 %v9458_v1  ;;  %v6204_v30 = vadd.f32 1e-05, %v6202_v20 }
 0x7f9   :  { %6395 = vmatprep.subr.bf16.mxu0 %v9464_v2 }
 0x7fc   :  { %6396 = vmatpush1.bf16.msra.mxu0 %v9462_v17 }
 0x7fd   :  { %6397 = vmatprep.subr.bf16.mxu0 %v9468_v5  ;;  %v12040_v5 = vld [vmem:[#allocation9_spill] sm:$0xff] }
 0x800   :  { %6398 = vmatpush1.bf16.msra.mxu0 %v9466_v4  ;;  %v6481_v4 = vadd.s32 8, %v12040_v5 }
 0x801   :  { %6399 = vmatprep.subr.bf16.mxu0 %v9472_v26 }
 0x802   :  { %v6495_v26 = vand.u32 1, %v6481_v4 }
 0x804   :  { %6400 = vmatpush1.bf16.msra.mxu0 %v9470_v22 }
 0x805   :  { %6401 = vmatprep.subr.bf16.mxu0 %v9476_v18  ;;  %v6488_v18 = vand.u32 1, %v12040_v5 }
 0x808   :  { %6402 = vmatpush1.bf16.msra.mxu0 %v9474_v52  ;;  %v9762_v52 = vmov -1e+30  }
 0x809   :  { %6403 = vmatprep.subr.bf16.mxu0 %v9480_v12 }
 0x8b7   :  { %v6112_v39 = vpop.f32.mrf.mxu0  ;;  %v6153_v31 = vpop.f32.mrf.mxu1 }
 0x8b8   :  { %v6160_v58 = vadd.f32 %v6112_v39, %v12033_v61  ;;  %v6162_v56 = vadd.f32 %v6153_v31, %v10118_v14 }
 0x8b9   :  { %v6114_v49 = vpop.f32.mrf.mxu0  ;;  %v6155_v27 = vpop.f32.mrf.mxu1 }
 0x8ba   :  { %v6164_v28 = vmul.f32 0.5, %v6160_v58  ;;  %v6161_v21 = vadd.f32 %v6114_v49, %v12034_v0  ;;  %v6163_v10 = vadd.f32 %v6155_v27, %v11889_v46  ;;  %v9759_v0 = vmov 0.0   ;;  %v12036_v49 = vld [vmem:[#allocation29_spill] sm:$0xff] }
 0x8bb   :  { %v6116_v32 = vpop.f32.mrf.mxu0  ;;  %v6157_v44 = vpop.f32.mrf.mxu1  ;;  %8717 = vmatprep.subr.bf16.mxu1 %v9759_v0  ;;  %8733 = vmatprep.mubr.msk.bf16.mxu1 %vm9760_vm1, %v9759_v0 }
 0x8bc   :  { %9662 = vtanh.f32 %v6164_v28  ;;  %v6168_v48 = vmul.f32 0.5, %v6161_v21  ;;  %v6173_v3 = vmul.f32 0.5, %v6163_v10  ;;  %8718 = vmatpush3.bf16.msra.mxu1 %v9461_v15  ;;  %v6183_v28 = vld [vmem:[%s11599_s4 + $0x2] ss:$0 sm:$0xff] }
 0x8bd   :  { %v6117_v55 = vpop.f32.mrf.mxu0  ;;  %v6158_v35 = vpop.f32.mrf.mxu1  ;;  %8719 = vmatprep.subr.bf16.mxu1 %v9759_v0 }
 0x8be   :  { %9664 = vtanh.f32 %v6168_v48  ;;  %v6184_v48 = vld [vmem:[%s11599_s4 + $0xa] ss:$0 sm:$0xff] }
 0x8bf   :  { %9666 = vtanh.f32 %v6162_v56 }
 0x8c0   :  { %9668 = vtanh.f32 %v6173_v3  ;;  %8720 = vmatpush3.bf16.msra.mxu1 %v9465_v13  ;;  %v8570_v3 = vld [vmem:[%s11599_s4 + $0x3] ss:$8 sm:$0x7] }
 0x8c1   :  { %8721 = vmatprep.subr.bf16.mxu1 %v9759_v0  ;;  %v6261_v15 = vrot.slane %v8570_v3, %v12039_v54 }
 0x8c4   :  { %8722 = vmatpush3.bf16.msra.mxu1 %v9469_v43  ;;  %v12041_v43 = vlaneseq }
 0x8c5   :  { %8723 = vmatprep.subr.bf16.mxu1 %v9759_v0 }
 0x8c6   :  { %v6483_v22 = vand.u32 127, %v12041_v43 }
 0x8c8   :  { %8724 = vmatpush3.bf16.msra.mxu1 %v9473_v25  ;;  %v6512_v25 = vand.u32 1, %v6483_v22 }
 0x8c9   :  { %v9663_v11 = vpop.eup %9662  ;;  %8725 = vmatprep.subr.bf16.mxu1 %v9759_v0 }
 0x8ca   :  { %v6166_v37 = vadd.f32 1.0, %v9663_v11  ;;  %v12037_v11 = vld [vmem:[#allocation10_spill] sm:$0xff]  ;;  %vm6521_vm3 = vcmp.eq.s32.totalorder %v6495_v26, %v6512_v25  ;;  %vm6520_vm4 = vcmp.eq.s32.totalorder %v6488_v18, %v6512_v25 }
 0x8cb   :  { %v9665_v50 = vpop.eup %9664 }
 0x8cc   :  { %v6167_v42 = vmul.f32 0.5, %v6166_v37  ;;  %v6170_v53 = vadd.f32 1.0, %v9665_v50  ;;  %v9667_v7 = vpop.eup %9666  ;;  %8726 = vmatpush3.bf16.msra.mxu1 %v9477_v62  ;;  %v6253_v37 = vrot.slane %v8570_v3, %v12037_v11  ;;  %v12038_v50 = vld [vmem:[#allocation11_spill] sm:$0xff]  ;;  %v11411_v62 = vsel %vm6521_vm3, 0.0, %v9762_v52 }
 0x8cd   :  { %v9669_v9 = vpop.eup %9668  ;;  %8727 = vmatprep.subr.bf16.mxu1 %v9759_v0 }
 0x8ce   :  { %v6171_v8 = vmul.f32 0.5, %v6170_v53  ;;  %v6178_v59 = vmul.f32 %v9667_v7, %v6167_v42  ;;  %v6175_v61 = vadd.f32 1.0, %v9669_v9  ;;  %v6257_v42 = vrot.slane %v8570_v3, %v12038_v50 }
 0x8d0   :  { %v6177_v6 = vmul.f32 %v6171_v8, %v5679_v19  ;;  %v6176_v14 = vmul.f32 0.5, %v6175_v61  ;;  %v9478_v19 = vld [vmem:[#allocation5 + $0x40] ss:$16 sps:$4 sm:$0xff]   ;;  %8728 = vmatpush3.bf16.msra.mxu1 %v9481_v60 }
 0x8d1   :  { %6404 = vmatpush1.bf16.msra.mxu0 %v9478_v19  ;;  %8729 = vmatprep.subr.bf16.mxu1 %v9759_v0  ;;  %v11413_v19 = vsel %vm6520_vm4, 0.0, %v9762_v52 }
 0x8d2   :  { %v6179_v33 = vadd.f32 %v6178_v59, %v6177_v6  ;;  %6405 = vmatprep.subr.bf16.mxu0 %v9484_v47 }
 0x8d4   :  { %9670 = vtanh.f32 %v6179_v33  ;;  %8730 = vmatpush3.bf16.msra.mxu1 %v9485_v38 }
 0x8d5   :  { %6406 = vmatpush1.bf16.msra.mxu0 %v9482_v41  ;;  %8731 = vmatprep.subr.bf16.mxu1 %v9759_v0  ;;  %9672 = vrsqrt.f32 %v6204_v30 }
 0x8d6   :  { %6407 = vmatprep.subr.bf16.mxu0 %v9488_v34 }
 0x8d8   :  { %8732 = vmatpush3.bf16.msra.mxu1 %v9489_v23 }
 0x8d9   :  { %6408 = vmatpush1.bf16.msra.mxu0 %v9486_v36 }
 0x8e1   :  { %v9671_v57 = vpop.eup %9670 }
 0x8e2   :  { %v6181_v16 = vmul.f32 %v9671_v57, %v6176_v14  ;;  %v9673_v58 = vpop.eup %9672 }
 0x8e3   :  { %v6208_v27 = vmul.f32 %v9673_v58, %v12036_v49 }
 0x8e4   :  { %6182 = vst [vmem:[#allocation2 + $0xe] sm:$0x3] %v6181_v16 }
 0x8e5   :  { %v6210_v44 = vmul.f32 %v6208_v27, %v6183_v28 }
 0x8e7   :  { %v6212_v35 = vadd.f32 %v6210_v44, %v6184_v48 }
 0x8eb   :  { %v6186_v46 = vld [vmem:[#allocation2 + $0x8] sm:$0xff] }
 0x8ec   :  { %6189 = vadd.xlane.f32.xlu0 %v6186_v46 }
 0x975   :  { %v6190_v51 = vpop.xlane.xlu0 %6189 }
 0x976   :  { %v6193_v29 = vmul.f32 0.0078125, %v6190_v51 }
 0x978   :  { %v6195_v40 = vsub.f32 %v6186_v46, %v6193_v29 }
 0x97a   :  { %v6197_v63 = vmul.f32 %v6195_v40, %v6195_v40 }
 0x97c   :  { %6200 = vadd.xlane.f32.xlu1 %v6197_v63 }
 0xa05   :  { %v6201_v45 = vpop.xlane.xlu1 %6200 }
 0xa06   :  { %v6203_v39 = vmul.f32 0.0078125, %v6201_v45 }
 0xa08   :  { %v6205_v31 = vadd.f32 1e-05, %v6203_v39 }
 0xa0a   :  { %9674 = vrsqrt.f32 %v6205_v31 }
 0xa17   :  { %v9675_v21 = vpop.eup %9674 }
 0xa18   :  { %v6209_v32 = vmul.f32 %v9675_v21, %v6195_v40 }
 0xa1a   :  { %v6211_v55 = vmul.f32 %v6209_v32, %v6183_v28 }
 0xa1c   :  { %v11354_v56 = vadd.f32 %v6211_v55, %v6184_v48 }
 0xa1e   :  { %v6214_v10 = vpack.c.bf16 %v11354_v56, %v6212_v35 }
 0xa20   :  { %6426 = vmatmul.mubr.bf16.vlgmr.msra.gmra.mxu0 %v6214_v10  ;;  %8734 = vmatmul.mubr.bf16.vlgmr.msra.gmra.mxu1 %v6214_v10 }
 0xae0   :  { %v6427_v53 = vpop.f32.mrf.mxu0  ;;  %v6470_v8 = vpop.f32.mrf.mxu1 }
 0xae1   :  { %v6428_v7 = vadd.f32 %v6427_v53, %v6253_v37  ;;  %v11392_v13 = vadd.f32 %v6470_v8, %v6261_v15 }
 0xae2   :  { %v6429_v6 = vpop.f32.mrf.mxu0  ;;  %v8735_v59 = vpop.f32.mrf.mxu1 }
 0xae3   :  { %v11362_v33 = vmul.f32 0.17677669, %v6428_v7  ;;  %v11364_v9 = vadd.f32 %v6429_v6, %v6257_v42 }
 0xae4   :  { %v6431_v61 = vpop.f32.mrf.mxu0  ;;  %v6473_v14 = vpop.f32.mrf.mxu1 }
 0xae5   :  { %6730 = vrot.lane.b32.xlu1 %v11364_v9, %s9761_s16  ;;  %8741 = vmatprep.mubr.msk.f32.mxu1 %vm6524_vm2, %v11362_v33  ;;  %v6432_v1 = vadd.f32 %v6431_v61, %v6253_v37  ;;  %v11385_v17 = vadd.f32 %v6473_v14, %v6261_v15 }
 0xae6   :  { %v6433_v57 = vpop.f32.mrf.mxu0  ;;  %v8736_v16 = vpop.f32.mrf.mxu1 }
 0xae7   :  { %v11370_v46 = vadd.f32 %v6433_v57, %v6257_v42  ;;  %v11383_v2 = vmul.f32 0.17677669, %v6432_v1 }
 0xae9   :  { %6732 = vrot.lane.b32.xlu0 %v11370_v46, %s9761_s16  ;;  %8737 = vmatprep.subr.msk.mxu1 %vm6524_vm2, %v11370_v46 }
 0xaea   :  { %6726 = vrot.lane.b32.xlu1 %v11362_v33, %s9761_s16  ;;  %8738 = vmatpush3.xpose.msk.msra.mxu1 %vm6524_vm2, %v11370_v46 }
 0xaeb   :  { %8739 = vmatprep.subr.msk.mxu1 %vm6524_vm2, %v11364_v9 }
 0xaee   :  { %6728 = vrot.lane.b32.xlu1 %v11383_v2, %s9761_s16  ;;  %8740 = vmatpush3.xpose.msk.msra.mxu1 %vm6524_vm2, %v11364_v9 }
 0xaef   :  { %8744 = vmatprep.subr.mxu1 %v11385_v17 }
 0xaf1   :  { %8742 = vmatmul.mubr.msk.f32.vlgmr.msra.gmra.mxu1 %vm6524_vm2, %v11383_v2 }
 0xaf2   :  { %8745 = vmatpush3.msra.mxu1 %v11385_v17 }
 0xaf3   :  { %8746 = vmatprep.subr.mxu1 %v11392_v13 }
 0xaf4   :  { %8747 = vmatpush3.msra.mxu1 %v11392_v13 }
 0xb57   :  { %v6731_v51 = vpop.permute.xlu1 %6730 }
 0xb5b   :  { %v6733_v29 = vpop.permute.xlu0 %6732 }
 0xb5c   :  { %v6727_v40 = vpop.permute.xlu1 %6726  ;;  %8751 = vmatprep.subr.msk.mxu0 %vm6524_vm2, %v6733_v29 }
 0xb5d   :  { %8755 = vmatprep.mubr.msk.f32.mxu0 %vm6524_vm2, %v6727_v40  ;;  %8752 = vmatpush3.xpose.msk.msra.mxu0 %vm6524_vm2, %v6733_v29 }
 0xb5e   :  { %8753 = vmatprep.subr.msk.mxu0 %vm6524_vm2, %v6731_v51 }
 0xb60   :  { %v6729_v63 = vpop.permute.xlu1 %6728 }
 0xb61   :  { %8754 = vmatpush3.xpose.msk.msra.mxu0 %vm6524_vm2, %v6731_v51  ;;  %v9492_v51 = vld [vmem:[#allocation5 + $0x2c] ss:$16 sps:$4 sm:$0xff]  }
 0xb62   :  { %8773 = vmatprep.subr.bf16.mxu0 %v9759_v0 }
 0xb64   :  { %8756 = vmatmul.mubr.msk.f32.vlgmr.msra.gmra.mxu0 %vm6524_vm2, %v6729_v63  ;;  %v9493_v63 = vld [vmem:[#allocation5 + $0xc] ss:$16 sps:$4 sm:$0xff]  }
 0xb65   :  { %8777 = vmatprep.mubr.msk.bf16.mxu0 %vm9760_vm1, %v9759_v0  ;;  %8774 = vmatpush3.bf16.msra.mxu0 %v9492_v51 }
 0xb66   :  { %8775 = vmatprep.subr.bf16.mxu0 %v9759_v0 }
 0xb69   :  { %8776 = vmatpush3.bf16.msra.mxu0 %v9493_v63 }
 0xbb1   :  { %v8743_v12 = vpop.f32.mrf.mxu1 }
 0xbb2   :  { %v6609_v60 = vadd.f32 %v8743_v12, %v11411_v62 }
 0xbb3   :  { %v6603_v47 = vpop.f32.mrf.mxu1 }
 0xbb4   :  { %v6604_v41 = vadd.f32 %v6603_v47, %v11413_v19  ;;  %v6615_v38 = vsel %vm98_vm0, %v6609_v60, -inf }
 0xbb5   :  { %6616 = vmax.xlane.f32.xlu1 %v6615_v38 }
 0xbb6   :  { %v6612_v34 = vsel %vm98_vm0, %v6604_v41, -inf }
 0xbb7   :  { %6613 = vmax.xlane.f32.xlu0 %v6612_v34  ;;  %v9490_v34 = vld [vmem:[#allocation5 + $0x6c] ss:$16 sps:$4 sm:$0xff]  }
 0xc24   :  { %v8757_v36 = vpop.f32.mrf.mxu0 }
 0xc25   :  { %v6814_v20 = vadd.f32 %v8757_v36, %v11411_v62 }
 0xc26   :  { %v6808_v23 = vpop.f32.mrf.mxu0 }
 0xc27   :  { %v6809_v24 = vadd.f32 %v6808_v23, %v11413_v19  ;;  %v6820_v45 = vsel %vm98_vm0, %v6814_v20, -inf  ;;  %v9491_v23 = vld [vmem:[#allocation5 + $0x4c] ss:$16 sps:$4 sm:$0xff]  }
 0xc29   :  { %v6817_v30 = vsel %vm98_vm0, %v6809_v24, -inf }
 0xc2a   :  { %6818 = vmax.xlane.f32.xlu0 %v6817_v30 }
 0xc2e   :  { %6821 = vmax.xlane.f32.xlu0 %v6820_v45 }
 0xc3e   :  { %v6617_v39 = vpop.xlane.xlu1 %6616 }
 0xc3f   :  { %v6619_v31 = vsub.f32 %v6609_v60, %v6617_v39 }
 0xc40   :  { %v6614_v58 = vpop.xlane.xlu0 %6613 }
 0xc41   :  { %v6622_v49 = vmul.f32 1.442695, %v6619_v31  ;;  %v6618_v27 = vsub.f32 %v6604_v41, %v6614_v58 }
 0xc43   :  { %9676 = vpow2.f32 %v6622_v49  ;;  %v6620_v28 = vmul.f32 1.442695, %v6618_v27 }
 0xc45   :  { %9678 = vpow2.f32 %v6620_v28 }
 0xc50   :  { %v9677_v21 = vpop.eup %9676 }
 0xc51   :  { %v6627_v32 = vsel %vm98_vm0, %v9677_v21, 0.0 }
 0xc52   :  { %v9679_v44 = vpop.eup %9678  ;;  %6628 = vadd.xlane.f32.xlu1 %v6627_v32 }
 0xc53   :  { %v6624_v48 = vsel %vm98_vm0, %v9679_v44, 0.0 }
 0xc54   :  { %6625 = vadd.xlane.f32.xlu0 %v6624_v48 }
 0xcb3   :  { %v6819_v55 = vpop.xlane.xlu0 %6818 }
 0xcb4   :  { %v6823_v35 = vsub.f32 %v6809_v24, %v6819_v55 }
 0xcb6   :  { %v6825_v10 = vmul.f32 1.442695, %v6823_v35 }
 0xcb7   :  { %v6822_v3 = vpop.xlane.xlu0 %6821 }
 0xcb8   :  { %9680 = vpow2.f32 %v6825_v10  ;;  %v6824_v11 = vsub.f32 %v6814_v20, %v6822_v3 }
 0xcba   :  { %v6827_v37 = vmul.f32 1.442695, %v6824_v11 }
 0xcbc   :  { %9682 = vpow2.f32 %v6827_v37 }
 0xcc5   :  { %v9681_v50 = vpop.eup %9680 }
 0xcc6   :  { %v6829_v42 = vsel %vm98_vm0, %v9681_v50, 0.0 }
 0xcc7   :  { %6830 = vadd.xlane.f32.xlu0 %v6829_v42 }
 0xcc9   :  { %v9683_v53 = vpop.eup %9682 }
 0xcca   :  { %v6832_v8 = vsel %vm98_vm0, %v9683_v53, 0.0 }
 0xccb   :  { %6833 = vadd.xlane.f32.xlu1 %v6832_v8 }
 0xcdb   :  { %v6629_v7 = vpop.xlane.xlu1 %6628 }
 0xcdc   :  { %9684 = vrcp.f32 %v6629_v7  ;;  %6847 = vrot.lane.b32.xlu1 %v11392_v13, %s9761_s16 }
 0xcdd   :  { %6849 = vrot.lane.b32.xlu0 %v11385_v17, %s9761_s16  ;;  %v6626_v6 = vpop.xlane.xlu0 %6625 }
 0xcde   :  { %9686 = vrcp.f32 %v6626_v6 }
 0xce0   :  { %7055 = vrot.lane.b32.xlu1 %v11370_v46, %s9763_s17 }
 0xce1   :  { %7049 = vrot.lane.b32.xlu0 %v11362_v33, %s9763_s17 }
 0xce4   :  { %7053 = vrot.lane.b32.xlu1 %v11364_v9, %s9763_s17 }
 0xce8   :  { %7051 = vrot.lane.b32.xlu1 %v11383_v2, %s9763_s17 }
 0xce9   :  { %v9685_v59 = vpop.eup %9684 }
 0xcea   :  { %v6633_v61 = vmul.f32 %v9685_v59, %v6629_v7 }
 0xceb   :  { %v9687_v14 = vpop.eup %9686 }
 0xcec   :  { %v6635_v57 = vsub.f32 2.0, %v6633_v61  ;;  %v6632_v16 = vmul.f32 %v9687_v14, %v6626_v6 }
 0xcee   :  { %v6634_v1 = vsub.f32 2.0, %v6632_v16  ;;  %v6637_v54 = vmul.f32 %v9685_v59, %v6635_v57 }
 0xcf0   :  { %v6636_v15 = vmul.f32 %v9687_v14, %v6634_v1  ;;  %v6639_v40 = vmul.f32 %v9677_v21, %v6637_v54 }
 0xcf2   :  { %v6638_v29 = vmul.f32 %v9679_v44, %v6636_v15 }
 0xcf4   :  { %8748 = vmatprep.mubr.msk.f32.mxu1 %vm98_vm0, %v6638_v29 }
 0xcf5   :  { %8749 = vmatmul.mubr.msk.f32.vlgmr.msra.gmra.mxu1 %vm98_vm0, %v6639_v40 }
 0xd50   :  { %v6831_v5 = vpop.xlane.xlu0 %6830 }
 0xd51   :  { %9688 = vrcp.f32 %v6831_v5 }
 0xd54   :  { %v6834_v4 = vpop.xlane.xlu1 %6833  ;;  %v6850_v43 = vpop.permute.xlu0 %6849 }
 0xd55   :  { %9690 = vrcp.f32 %v6834_v4  ;;  %8758 = vmatprep.subr.mxu1 %v6850_v43 }
 0xd56   :  { %8759 = vmatpush3.msra.mxu1 %v6850_v43 }
 0xd58   :  { %v6848_v22 = vpop.permute.xlu1 %6847  ;;  %v7050_v49 = vpop.permute.xlu0 %7049 }
 0xd59   :  { %8760 = vmatprep.subr.mxu1 %v6848_v22 }
 0xd5a   :  { %8761 = vmatpush3.msra.mxu1 %v6848_v22 }
 0xd5b   :  { %8765 = vmatprep.subr.bf16.mxu1 %v9759_v0 }
 0xd5c   :  { %v7056_v24 = vpop.permute.xlu1 %7055 }
 0xd5e   :  { %v9689_v26 = vpop.eup %9688 }
 0xd5f   :  { %v6837_v25 = vmul.f32 %v9689_v26, %v6831_v5 }
 0xd60   :  { %v7054_v27 = vpop.permute.xlu1 %7053 }
 0xd61   :  { %v6839_v18 = vsub.f32 2.0, %v6837_v25 }
 0xd62   :  { %v9691_v52 = vpop.eup %9690 }
 0xd63   :  { %v6841_v12 = vmul.f32 %v9689_v26, %v6839_v18  ;;  %v6838_v60 = vmul.f32 %v9691_v52, %v6834_v4 }
 0xd64   :  { %v7052_v28 = vpop.permute.xlu1 %7051 }
 0xd65   :  { %v6843_v47 = vmul.f32 %v9681_v50, %v6841_v12  ;;  %v6840_v41 = vsub.f32 2.0, %v6838_v60 }
 0xd67   :  { %v6842_v38 = vmul.f32 %v9691_v52, %v6840_v41  ;;  %8762 = vmatprep.mubr.msk.f32.mxu1 %vm98_vm0, %v6843_v47  ;;  %v9495_v41 = vld [vmem:[#allocation5 + $0x8c] ss:$16 sps:$4 sm:$0xff]  }
 0xd69   :  { %v6844_v36 = vmul.f32 %v9683_v53, %v6842_v38 }
 0xd6b   :  { %8763 = vmatmul.mubr.msk.f32.vlgmr.msra.gmra.mxu1 %vm98_vm0, %v6844_v36 }
 0xd6c   :  { %8766 = vmatpush3.bf16.msra.mxu1 %v9490_v34  ;;  %8769 = vmatprep.mubr.msk.bf16.mxu1 %vm9760_vm1, %v9759_v0 }
 0xd6d   :  { %8767 = vmatprep.subr.bf16.mxu1 %v9759_v0 }
 0xd70   :  { %8768 = vmatpush3.bf16.msra.mxu1 %v9491_v23 }
 0xd71   :  { %8781 = vmatprep.subr.msk.mxu1 %vm6524_vm2, %v7056_v24 }
 0xdb5   :  { %v8750_v20 = vpop.f32.mrf.mxu1 }
 0xdb7   :  { %v6712_v30 = vpop.f32.mrf.mxu1 }
 0xdb8   :  { %v6721_v45 = vpack.c.bf16 %v8750_v20, %v6712_v30 }
 0xdba   :  { %8778 = vmatmul.mubr.msk.bf16.vlgmr.msra.gmra.mxu0 %vm6524_vm2, %v6721_v45 }
 0xe2b   :  { %v8764_v39 = vpop.f32.mrf.mxu1 }
 0xe2d   :  { %v6925_v31 = vpop.f32.mrf.mxu1 }
 0xe2e   :  { %v6934_v58 = vpack.c.bf16 %v8764_v39, %v6925_v31 }
 0xe30   :  { %8770 = vmatmul.mubr.msk.bf16.vlgmr.msra.gmra.mxu1 %vm6524_vm2, %v6934_v58 }
 0xe31   :  { %8782 = vmatpush3.xpose.msk.msra.mxu1 %vm6524_vm2, %v7056_v24  ;;  %8785 = vmatprep.mubr.msk.f32.mxu1 %vm6524_vm2, %v7050_v49 }
 0xe32   :  { %8783 = vmatprep.subr.msk.mxu1 %vm6524_vm2, %v7054_v27 }
 0xe35   :  { %8784 = vmatpush3.xpose.msk.msra.mxu1 %vm6524_vm2, %v7054_v27 }
 0xe36   :  { %8795 = vmatprep.subr.bf16.mxu1 %v9759_v0 }
 0xe38   :  { %8786 = vmatmul.mubr.msk.f32.vlgmr.msra.gmra.mxu1 %vm6524_vm2, %v7052_v28 }
 0xe39   :  { %8799 = vmatprep.mubr.msk.bf16.mxu1 %vm9760_vm1, %v9759_v0 }
 0xe7a   :  { %v7043_v21 = vpop.f32.mrf.mxu0 }
 0xe7c   :  { %v8779_v32 = vpop.f32.mrf.mxu0 }
 0xe7e   :  { %v11459_v44 = vpop.f32.mrf.mxu0 }
 0xe80   :  { %v8780_v48 = vpop.f32.mrf.mxu0 }
 0xef0   :  { %v6988_v55 = vpop.f32.mrf.mxu1 }
 0xef2   :  { %v8771_v35 = vpop.f32.mrf.mxu1 }
 0xef4   :  { %v11461_v10 = vpop.f32.mrf.mxu1 }
 0xef5   :  { %v7046_v35 = vadd.f32 %v11459_v44, %v11461_v10 }
 0xef6   :  { %v8772_v3 = vpop.f32.mrf.mxu1 }
 0xef8   :  { %v8787_v11 = vpop.f32.mrf.mxu1 }
 0xef9   :  { %v7137_v37 = vadd.f32 %v8787_v11, %v11411_v62 }
 0xefa   :  { %v7131_v50 = vpop.f32.mrf.mxu1 }
 0xefb   :  { %v7132_v42 = vadd.f32 %v7131_v50, %v11413_v19  ;;  %v7143_v53 = vsel %vm98_vm0, %v7137_v37, -inf  ;;  %v9496_v50 = vld [vmem:[#allocation5 + $0xec] ss:$16 sps:$4 sm:$0xff]  }
 0xefc   :  { %7144 = vmax.xlane.f32.xlu1 %v7143_v53 }
 0xefd   :  { %v7140_v8 = vsel %vm98_vm0, %v7132_v42, -inf }
 0xefe   :  { %7141 = vmax.xlane.f32.xlu0 %v7140_v8 }
 0xf0d   :  { %7168 = vrot.lane.b32.xlu1 %v11392_v13, %s9763_s17 }
 0xf11   :  { %7322 = vrot.lane.b32.xlu1 %v11370_v46, %s9764_s18 }
 0xf15   :  { %7320 = vrot.lane.b32.xlu1 %v11364_v9, %s9764_s18  ;;  %v9494_v9 = vld [vmem:[#allocation5 + $0xac] ss:$16 sps:$4 sm:$0xff]  }
 0xf16   :  { %8796 = vmatpush3.bf16.msra.mxu1 %v9494_v9 }
 0xf17   :  { %8797 = vmatprep.subr.bf16.mxu1 %v9759_v0 }
 0xf19   :  { %7318 = vrot.lane.b32.xlu1 %v11383_v2, %s9764_s18 }
 0xf1a   :  { %8798 = vmatpush3.bf16.msra.mxu1 %v9495_v41  ;;  %v9504_v41 = vld [vmem:[%s11598_s3 + $0x8] sm:$0xff]  }
 0xf1b   :  { %8817 = vmatprep.subr.bf16.mxu1 %v9759_v0 }
 0xf85   :  { %v7145_v7 = vpop.xlane.xlu1 %7144 }
 0xf86   :  { %v7147_v6 = vsub.f32 %v7137_v37, %v7145_v7 }
 0xf87   :  { %v7142_v59 = vpop.xlane.xlu0 %7141 }
 0xf88   :  { %v7150_v61 = vmul.f32 1.442695, %v7147_v6  ;;  %v7146_v14 = vsub.f32 %v7132_v42, %v7142_v59 }
 0xf89   :  { %v7169_v51 = vpop.permute.xlu1 %7168 }
 0xf8a   :  { %9692 = vpow2.f32 %v7150_v61  ;;  %v7148_v57 = vmul.f32 1.442695, %v7146_v14 }
 0xf8c   :  { %9694 = vpow2.f32 %v7148_v57 }
 0xf8d   :  { %v7323_v40 = vpop.permute.xlu1 %7322 }
 0xf91   :  { %v7321_v60 = vpop.permute.xlu1 %7320 }
 0xf95   :  { %v7319_v47 = vpop.permute.xlu1 %7318 }
 0xf97   :  { %v9693_v16 = vpop.eup %9692 }
 0xf98   :  { %v7155_v1 = vsel %vm98_vm0, %v9693_v16, 0.0 }
 0xf99   :  { %v9695_v54 = vpop.eup %9694  ;;  %7156 = vadd.xlane.f32.xlu0 %v7155_v1 }
 0xf9a   :  { %v7152_v46 = vsel %vm98_vm0, %v9695_v54, 0.0 }
 0xf9d   :  { %7153 = vadd.xlane.f32.xlu0 %v7152_v46 }
 0xfb3   :  { %7170 = vrot.lane.b32.xlu0 %v11385_v17, %s9763_s17 }
 0xfb7   :  { %7316 = vrot.lane.b32.xlu0 %v11362_v33, %s9764_s18 }
0x1022   :  { %v7157_v2 = vpop.xlane.xlu0 %7156 }
0x1023   :  { %9696 = vrcp.f32 %v7157_v2 }
0x1026   :  { %v7154_v15 = vpop.xlane.xlu0 %7153 }
0x1027   :  { %9698 = vrcp.f32 %v7154_v15 }
0x102a   :  { %v7171_v29 = vpop.permute.xlu0 %7170 }
0x102b   :  { %8788 = vmatprep.subr.mxu0 %v7171_v29 }
0x102c   :  { %8789 = vmatpush3.msra.mxu0 %v7171_v29 }
0x102d   :  { %8790 = vmatprep.subr.mxu0 %v7169_v51 }
0x102e   :  { %8791 = vmatpush3.msra.mxu0 %v7169_v51  ;;  %v7317_v12 = vpop.permute.xlu0 %7316 }
0x102f   :  { %8803 = vmatprep.subr.msk.mxu0 %vm6524_vm2, %v7323_v40 }
0x1030   :  { %v9697_v63 = vpop.eup %9696 }
0x1031   :  { %v7161_v5 = vmul.f32 %v9697_v63, %v7157_v2 }
0x1033   :  { %v7163_v4 = vsub.f32 2.0, %v7161_v5 }
0x1034   :  { %v9699_v33 = vpop.eup %9698 }
0x1035   :  { %v7160_v43 = vmul.f32 %v9699_v33, %v7154_v15  ;;  %v7165_v26 = vmul.f32 %v9697_v63, %v7163_v4 }
0x1037   :  { %v7162_v22 = vsub.f32 2.0, %v7160_v43  ;;  %v7167_v52 = vmul.f32 %v9693_v16, %v7165_v26  ;;  %v9498_v43 = vld [vmem:[%s11598_s3 + $0x38] sm:$0xff]  }
0x1039   :  { %v7164_v25 = vmul.f32 %v9699_v33, %v7162_v22 }
0x103b   :  { %v7166_v18 = vmul.f32 %v9695_v54, %v7164_v25  ;;  %v9497_v54 = vld [vmem:[#allocation5 + $0xcc] ss:$16 sps:$4 sm:$0xff]  }
0x103d   :  { %8792 = vmatprep.mubr.msk.f32.mxu0 %vm98_vm0, %v7166_v18 }
0x103e   :  { %8793 = vmatmul.mubr.msk.f32.vlgmr.msra.gmra.mxu0 %vm98_vm0, %v7167_v52  ;;  %v9499_v52 = vld [vmem:[%s11598_s3 + $0x30] sm:$0xff]  }
0x103f   :  { %8804 = vmatpush3.xpose.msk.msra.mxu0 %vm6524_vm2, %v7323_v40  ;;  %8807 = vmatprep.mubr.msk.f32.mxu0 %vm6524_vm2, %v7317_v12  ;;  %v7583_v40 = vld [vmem:[%s11599_s4 + $0x1b] ss:$0 sm:$0xff]  ;;  %v9501_v12 = vld [vmem:[%s11598_s3 + $0x20] sm:$0xff]  }
0x1040   :  { %8805 = vmatprep.subr.msk.mxu0 %vm6524_vm2, %v7321_v60 }
0x1043   :  { %8806 = vmatpush3.xpose.msk.msra.mxu0 %vm6524_vm2, %v7321_v60  ;;  %v9502_v60 = vld [vmem:[%s11598_s3 + $0x18] sm:$0xff]  }
0x1046   :  { %8808 = vmatmul.mubr.msk.f32.vlgmr.msra.gmra.mxu0 %vm6524_vm2, %v7319_v47  ;;  %v9503_v47 = vld [vmem:[%s11598_s3 + $0x10] sm:$0xff]  }
0x10fe   :  { %v8794_v38 = vpop.f32.mrf.mxu0 }
0x1100   :  { %v7246_v34 = vpop.f32.mrf.mxu0 }
0x1101   :  { %v7255_v36 = vpack.c.bf16 %v8794_v38, %v7246_v34  ;;  %v9505_v38 = vld [vmem:[%s11598_s3] sm:$0xff]   ;;  %v9506_v34 = vld [vmem:[%s11598_s3 + $0x58] sm:$0xff]  }
0x1103   :  { %8800 = vmatmul.mubr.msk.bf16.vlgmr.msra.gmra.mxu1 %vm6524_vm2, %v7255_v36  ;;  %v9507_v36 = vld [vmem:[%s11598_s3 + $0x50] sm:$0xff]  }
0x1104   :  { %8821 = vmatprep.mubr.msk.bf16.mxu1 %vm9760_vm1, %v9759_v0  ;;  %8818 = vmatpush3.bf16.msra.mxu1 %v9496_v50  ;;  %v9511_v50 = vld [vmem:[%s11598_s3 + $0x60] sm:$0xff]  }
0x1105   :  { %8819 = vmatprep.subr.bf16.mxu1 %v9759_v0 }
0x1106   :  { %v8809_v23 = vpop.f32.mrf.mxu0 }
0x1107   :  { %v7404_v24 = vadd.f32 %v8809_v23, %v11411_v62 }
0x1108   :  { %v7398_v20 = vpop.f32.mrf.mxu0  ;;  %8820 = vmatpush3.bf16.msra.mxu1 %v9497_v54 }
0x1109   :  { %v7399_v30 = vadd.f32 %v7398_v20, %v11413_v19  ;;  %v7410_v45 = vsel %vm98_vm0, %v7404_v24, -inf  ;;  %8845 = vmatprep.subr.bf16.mxu1 %v9759_v0 }
0x110a   :  { %7411 = vmax.xlane.f32.xlu1 %v7410_v45  ;;  %v7585_v45 = vld [vmem:[%s11599_s4 + $0x12] ss:$0 sm:$0xff] }
0x110b   :  { %v7407_v39 = vsel %vm98_vm0, %v7399_v30, -inf }
0x110c   :  { %7408 = vmax.xlane.f32.xlu0 %v7407_v39 }
0x111b   :  { %7435 = vrot.lane.b32.xlu1 %v11392_v13, %s9764_s18 }
0x1193   :  { %v7412_v31 = vpop.xlane.xlu1 %7411 }
0x1194   :  { %v7414_v58 = vsub.f32 %v7404_v24, %v7412_v31  ;;  %v7586_v31 = vld [vmem:[%s11599_s4 + $0x1a] ss:$0 sm:$0xff] }
0x1195   :  { %v7409_v49 = vpop.xlane.xlu0 %7408 }
0x1196   :  { %v7417_v27 = vmul.f32 1.442695, %v7414_v58  ;;  %v7413_v28 = vsub.f32 %v7399_v30, %v7409_v49 }
0x1197   :  { %v7436_v7 = vpop.permute.xlu1 %7435 }
0x1198   :  { %9700 = vpow2.f32 %v7417_v27  ;;  %v7415_v21 = vmul.f32 1.442695, %v7413_v28 }
0x119a   :  { %9702 = vpow2.f32 %v7415_v21  ;;  %v9508_v21 = vld [vmem:[%s11598_s3 + $0x48] sm:$0xff]  }
0x11a5   :  { %v9701_v62 = vpop.eup %9700 }
0x11a6   :  { %v7422_v19 = vsel %vm98_vm0, %v9701_v62, 0.0 }
0x11a7   :  { %v9703_v32 = vpop.eup %9702  ;;  %7423 = vadd.xlane.f32.xlu0 %v7422_v19  ;;  %v7618_v19 = vld [vmem:[%s11599_s4 + $0x4] ss:$0 sm:$0xff] }
0x11a8   :  { %v7419_v48 = vsel %vm98_vm0, %v9703_v32, 0.0 }
0x11ab   :  { %7420 = vadd.xlane.f32.xlu0 %v7419_v48 }
0x11c1   :  { %7437 = vrot.lane.b32.xlu0 %v11385_v17, %s9764_s18 }
0x11c3   :  { %v7309_v13 = vpop.f32.mrf.mxu1 }
0x11c5   :  { %v8801_v55 = vpop.f32.mrf.mxu1 }
0x11c7   :  { %v7311_v3 = vpop.f32.mrf.mxu1 }
0x11c8   :  { %v7315_v11 = vadd.f32 %v7311_v3, %v7046_v35 }
0x11c9   :  { %v8802_v37 = vpop.f32.mrf.mxu1 }
0x11ca   :  { %v9510_v37 = vld [vmem:[%s11598_s3 + $0x68] sm:$0xff]  }
0x1230   :  { %v7424_v42 = vpop.xlane.xlu0 %7423 }
0x1231   :  { %9704 = vrcp.f32 %v7424_v42 }
0x1234   :  { %v7421_v53 = vpop.xlane.xlu0 %7420 }
0x1235   :  { %9706 = vrcp.f32 %v7421_v53 }
0x1238   :  { %v7438_v8 = vpop.permute.xlu0 %7437 }
0x1239   :  { %8810 = vmatprep.subr.mxu0 %v7438_v8 }
0x123a   :  { %8811 = vmatpush3.msra.mxu0 %v7438_v8 }
0x123b   :  { %8812 = vmatprep.subr.mxu0 %v7436_v7 }
0x123c   :  { %8813 = vmatpush3.msra.mxu0 %v7436_v7 }
0x123d   :  { %8825 = vmatprep.subr.bf16.mxu0 %v9759_v0 }
0x123e   :  { %v9705_v17 = vpop.eup %9704 }
0x123f   :  { %v7428_v44 = vmul.f32 %v9705_v17, %v7424_v42  ;;  %v7720_v42 = vld [vmem:[%s11599_s4 + $0xc] ss:$0 sm:$0xff] }
0x1241   :  { %v7430_v6 = vsub.f32 2.0, %v7428_v44 }
0x1242   :  { %v9707_v10 = vpop.eup %9706 }
0x1243   :  { %v7427_v59 = vmul.f32 %v9707_v10, %v7421_v53  ;;  %v7432_v14 = vmul.f32 %v9705_v17, %v7430_v6 }
0x1245   :  { %v7429_v61 = vsub.f32 2.0, %v7427_v59  ;;  %v7434_v1 = vmul.f32 %v9701_v62, %v7432_v14  ;;  %v9509_v62 = vld [vmem:[%s11598_s3 + $0x40] sm:$0xff]  }
0x1247   :  { %v7431_v57 = vmul.f32 %v9707_v10, %v7429_v61 }
0x1249   :  { %v7433_v16 = vmul.f32 %v9703_v32, %v7431_v57 }
0x124b   :  { %8814 = vmatprep.mubr.msk.f32.mxu0 %vm98_vm0, %v7433_v16 }
0x124c   :  { %8815 = vmatmul.mubr.msk.f32.vlgmr.msra.gmra.mxu0 %vm98_vm0, %v7434_v1 }
0x124d   :  { %8841 = vmatprep.mubr.msk.bf16.mxu0 %vm9760_vm1, %v9759_v0  ;;  %8826 = vmatpush3.bf16.msra.mxu0 %v9498_v43 }
0x124e   :  { %8827 = vmatprep.subr.bf16.mxu0 %v9759_v0 }
0x1251   :  { %8828 = vmatpush3.bf16.msra.mxu0 %v9499_v52 }
0x1252   :  { %8829 = vmatprep.subr.bf16.mxu0 %v9759_v0 }
0x130c   :  { %v8816_v46 = vpop.f32.mrf.mxu0 }
0x130e   :  { %v7513_v9 = vpop.f32.mrf.mxu0 }
0x130f   :  { %v7522_v2 = vpack.c.bf16 %v8816_v46, %v7513_v9 }
0x1311   :  { %8822 = vmatmul.mubr.msk.bf16.vlgmr.msra.gmra.mxu1 %vm6524_vm2, %v7522_v2 }
0x1312   :  { %8853 = vmatprep.mubr.msk.bf16.mxu1 %vm9760_vm1, %v9759_v0  ;;  %8846 = vmatpush3.bf16.msra.mxu1 %v9506_v34 }
0x1313   :  { %8847 = vmatprep.subr.bf16.mxu1 %v9759_v0 }
0x1316   :  { %8848 = vmatpush3.bf16.msra.mxu1 %v9507_v36 }
0x1317   :  { %8849 = vmatprep.subr.bf16.mxu1 %v9759_v0 }
0x131a   :  { %8850 = vmatpush3.bf16.msra.mxu1 %v9508_v21 }
0x131b   :  { %8851 = vmatprep.subr.bf16.mxu1 %v9759_v0 }
0x131e   :  { %8852 = vmatpush3.bf16.msra.mxu1 %v9509_v62 }
0x131f   :  { %8857 = vmatprep.subr.bf16.mxu1 %v9759_v0 }
0x13d1   :  { %v7576_v15 = vpop.f32.mrf.mxu1 }
0x13d3   :  { %v8823_v51 = vpop.f32.mrf.mxu1 }
0x13d5   :  { %v7578_v29 = vpop.f32.mrf.mxu1 }
0x13d6   :  { %v7582_v63 = vadd.f32 %v7578_v29, %v7315_v11 }
0x13d7   :  { %v8824_v5 = vpop.f32.mrf.mxu1 }
0x13d8   :  { %v7584_v33 = vadd.f32 %v7583_v40, %v7582_v63 }
0x13da   :  { %v7587_v4 = vadd.f32 %v7584_v33, %v11354_v56  ;;  %v9500_v56 = vld [vmem:[%s11598_s3 + $0x28] sm:$0xff]  }
0x13db   :  { %8830 = vmatpush3.bf16.msra.mxu0 %v9500_v56 }
0x13dc   :  { %7588 = vadd.xlane.f32.xlu1 %v7587_v4  ;;  %8831 = vmatprep.subr.bf16.mxu0 %v9759_v0 }
0x13df   :  { %8832 = vmatpush3.bf16.msra.mxu0 %v9501_v12 }
0x13e0   :  { %8833 = vmatprep.subr.bf16.mxu0 %v9759_v0 }
0x13e3   :  { %8834 = vmatpush3.bf16.msra.mxu0 %v9502_v60 }
0x13e4   :  { %8835 = vmatprep.subr.bf16.mxu0 %v9759_v0 }
0x13e7   :  { %8836 = vmatpush3.bf16.msra.mxu0 %v9503_v47 }
0x13e8   :  { %8837 = vmatprep.subr.bf16.mxu0 %v9759_v0 }
0x13eb   :  { %8838 = vmatpush3.bf16.msra.mxu0 %v9504_v41 }
0x13ec   :  { %8839 = vmatprep.subr.bf16.mxu0 %v9759_v0 }
0x13ef   :  { %8840 = vmatpush3.bf16.msra.mxu0 %v9505_v38 }
0x1465   :  { %v7589_v22 = vpop.xlane.xlu1 %7588 }
0x1466   :  { %v7590_v26 = vmul.f32 0.0078125, %v7589_v22 }
0x1468   :  { %v7591_v25 = vsub.f32 %v7587_v4, %v7590_v26 }
0x146a   :  { %v7592_v18 = vmul.f32 %v7591_v25, %v7591_v25 }
0x146c   :  { %7593 = vadd.xlane.f32.xlu0 %v7592_v18 }
0x14f5   :  { %v7594_v23 = vpop.xlane.xlu0 %7593 }
0x14f6   :  { %v7595_v24 = vmul.f32 0.0078125, %v7594_v23 }
0x14f8   :  { %v7596_v20 = vadd.f32 1e-05, %v7595_v24 }
0x14fa   :  { %9708 = vrsqrt.f32 %v7596_v20 }
0x1507   :  { %v9709_v30 = vpop.eup %9708 }
0x1508   :  { %v7598_v39 = vmul.f32 %v9709_v30, %v7591_v25 }
0x150a   :  { %v7599_v58 = vmul.f32 %v7598_v39, %v7585_v45 }
0x150c   :  { %v7600_v49 = vadd.f32 %v7599_v58, %v7586_v31 }
0x150e   :  { %v7601_v27 = vpack.c.bf16 %v7600_v49, %v7600_v49 }
0x1510   :  { %v7620_v28 = vrot.slane %v7601_v27, 3 }
0x1512   :  { %8842 = vmatmul.mubr.bf16.vlgmr.msra.gmra.mxu0 %v7620_v28 }
0x15d2   :  { %v7704_v32 = vpop.f32.mrf.mxu0 }
0x15d3   :  { %v7705_v48 = vadd.f32 %v7704_v32, %v7618_v19 }
0x15d4   :  { %v8843_v13 = vpop.f32.mrf.mxu0 }
0x15d5   :  { %v7710_v55 = vmax.f32 %v7705_v48, 0.0 }
0x15d6   :  { %v7707_v35 = vpop.f32.mrf.mxu0 }
0x15d7   :  { %v7711_v3 = vpack.c.bf16 %v7710_v55, %v7710_v55 }
0x15d8   :  { %v8844_v11 = vpop.f32.mrf.mxu0 }
0x15d9   :  { %8854 = vmatmul.mubr.msk.bf16.vlgmr.msra.gmra.mxu1 %vm7745_vm5, %v7711_v3 }
0x15da   :  { %8861 = vmatprep.mubr.msk.bf16.mxu1 %vm9760_vm1, %v9759_v0  ;;  %8858 = vmatpush3.bf16.msra.mxu1 %v9510_v37 }
0x15db   :  { %8859 = vmatprep.subr.bf16.mxu1 %v9759_v0  ;;  %v7795_v0 = vld [vmem:[%s11599_s4 + $0x14] ss:$0 sm:$0xff] }
0x15de   :  { %8860 = vmatpush3.bf16.msra.mxu1 %v9511_v50 }
0x1699   :  { %v7783_v53 = vpop.f32.mrf.mxu1 }
0x169a   :  { %v7784_v8 = vadd.f32 %v7783_v53, %v7720_v42 }
0x169b   :  { %v8855_v7 = vpop.f32.mrf.mxu1 }
0x169c   :  { %v7789_v17 = vmax.f32 %v7784_v8, 0.0 }
0x169d   :  { %v7786_v44 = vpop.f32.mrf.mxu1 }
0x169e   :  { %v7790_v10 = vpack.c.bf16 %v7789_v17, %v7789_v17 }
0x169f   :  { %v8856_v6 = vpop.f32.mrf.mxu1 }
0x16a0   :  { %8862 = vmatmul.mubr.msk.bf16.vlgmr.msra.gmra.mxu1 %vm6524_vm2, %v7790_v10 }
0x1760   :  { %v7845_v59 = vpop.f32.mrf.mxu1 }
0x1761   :  { %v7846_v61 = vadd.f32 %v7845_v59, %v7795_v0 }
0x1762   :  { %v8863_v14 = vpop.f32.mrf.mxu1 }
0x1763   :  { %7852 = vst.msk [vmem:[%s11600_s5] sm:$0x3] %vm7851_vm6, %v7846_v61 }
0x1764   :  { %v7848_v57 = vpop.f32.mrf.mxu1 }
0x1766   :  { %v8864_v16 = vpop.f32.mrf.mxu1 }
0x1767   :  { %7857 = vsyncpa [#allocation4], 1 }
0x1768   :  { %7858 = vsyncpa [#allocation6], 1 }

</bundles_post_ra>
